<compile_context>
chip_gen: v7x
topology: tpu7x:2x2x1
jax: 0.10.0
libtpu: 0.0.40
codegen_flags: <defaults>
</compile_context>

<pallas_src>
import functools

import numpy as np
import jax
import jax.numpy as jnp
from jax import lax
from jax.experimental import pallas as pl
from jax.experimental.pallas import tpu as pltpu


def _round_up(x, m):
    return (x + m - 1) // m * m


# ---------------------------------------------------------------------------
# Fused Pallas kernel (whole network, one batch *block* per grid step)
# ---------------------------------------------------------------------------
def _lenet_kernel(n_conv, phase_counts, *refs):
    """refs = (x_ref,
               [banded_w, bias_row, colpool_sel] * n_conv,
               whk_ref, bh_ref, wt_ref, bt_ref,
               o_ref)

    Feature maps are `two_p` row-phase planes, each a 2-D value of shape
    (TILE_B * R, W*C): rows of all images stacked along sublanes (R rows per
    image), channels fastest on lanes.  Row shifts are global contiguous
    slices; the last few rows of each plane are "don't care" garbage that is
    never read for valid outputs.
    """
    f32 = jnp.float32
    x_ref = refs[0]
    o_ref = refs[-1]
    conv_refs = refs[1:1 + 3 * n_conv]
    whk_ref, bh_ref, wt_ref, bt_ref = refs[1 + 3 * n_conv:-1]

    # Input row-phase planes (cast once to f32; MXU operands are cast to bf16
    # right at each dot).
    planes = [x_ref[v].astype(f32) for v in range(phase_counts[0])]
    cur_len = planes[0].shape[0]

    for l in range(n_conv):
        m_ref, brow_ref, qsel_ref = conv_refs[3 * l:3 * l + 3]
        two_p = phase_counts[l]                  # input phase count (= 2*P_out)
        k = m_ref.shape[0]                       # conv kernel height
        d_max = (two_p + k - 2) // two_p         # max within-plane row shift
        out_len = cur_len - d_max
        mxu_dt = m_ref.dtype

        new_planes = []
        for t in range(two_p // 2):              # P_out pooled output phases
            pooled = None
            for sub in range(2):                 # conv rows 2p+t*... pair
                s = 2 * t + sub                  # conv-row residue mod two_p
                acc = jnp.zeros((out_len, m_ref.shape[2]), f32)
                for i in range(k):
                    v = (s + i) % two_p          # source phase plane
                    d = (s + i) // two_p         # global row shift (0..d_max)
                    lhs = planes[v][d:d + out_len, :].astype(mxu_dt)
                    acc = acc + jnp.dot(lhs, m_ref[i],
                                        preferred_element_type=f32)
                # row half of the 2x2 max-pool: pure VPU max of phase pair
                pooled = acc if pooled is None else jnp.maximum(pooled, acc)
            # bias + ReLU in f32 (commutes exactly with the max-pool)
            pooled = jnp.maximum(pooled + brow_ref[...], 0.0)
            # column half of the pool: right-side one-hot matmuls (batches
            # with M = TILE_B*R) + elementwise max
            pb = pooled.astype(qsel_ref.dtype)
            g = jnp.maximum(
                jnp.dot(pb, qsel_ref[0], preferred_element_type=f32),
                jnp.dot(pb, qsel_ref[1], preferred_element_type=f32))
            new_planes.append(g)
        planes = new_planes
        cur_len = out_len

    # hidden0: torch NCHW-flatten order folded into whk; the per-image feature
    # rows are contracted via global row shifts, so row b*R of `hid` holds the
    # true hidden vector of image b (other rows are garbage, dropped host-side)
    g = planes[0]
    hf = whk_ref.shape[0]
    hid_len = cur_len - (hf - 1)
    hid = jnp.zeros((hid_len, whk_ref.shape[2]), f32)
    for y in range(hf):
        hid = hid + jnp.dot(g[y:y + hid_len, :].astype(whk_ref.dtype),
                            whk_ref[y], preferred_element_type=f32)
    hid = hid + bh_ref[...]

    # both task heads fused; lanes padded to 128 -> unmasked, lane-dense store
    out = jnp.dot(hid.astype(wt_ref.dtype), wt_ref[...],
                  preferred_element_type=f32) + bt_ref[...]
    o_ref[0] = out.astype(o_ref.dtype)


# ---------------------------------------------------------------------------
# One-time weight preprocessing (plain JAX / numpy, outside the hot path)
# ---------------------------------------------------------------------------
def _band_conv_weight(w_oihw, w_in):
    """(Cout, Cin, KH, KW) -> (KH, W_in*Cin, W_out*Cout) banded matrices M[i]
    such that  sum_i feat_rows_shifted_by_i @ M[i]  equals the valid
    cross-correlation output laid out (rows, W_out*Cout), channels fastest."""
    cout, cin, kh, kw = w_oihw.shape
    wo = w_in - kw + 1
    A, B = w_in * cin, wo * cout
    a = jnp.arange(A)
    b = jnp.arange(B)
    w_idx_in, c_in = a // cin, a % cin
    w_idx_out, c_out = b // cout, b % cout
    j = w_idx_in[:, None] - w_idx_out[None, :]                # (A, B)
    valid = (j >= 0) & (j < kw)
    jc = jnp.clip(j, 0, kw - 1)
    wkk = jnp.transpose(w_oihw, (2, 3, 1, 0))                 # (kh, kw, cin, cout)
    cin_b = jnp.broadcast_to(c_in[:, None], (A, B))
    cout_b = jnp.broadcast_to(c_out[None, :], (A, B))
    m = wkk[:, jc, cin_b, cout_b]                             # (kh, A, B)
    return jnp.where(valid[None, :, :], m, 0.0).astype(jnp.float32)


def _col_pool_selector(wo, c):
    """One-hot matrices for the column half of a 2x2/stride-2 max pool on an
    (rows, wo*c) map: returns (2, wo*c, (wo//2)*c)."""
    wp = wo // 2
    s = np.zeros((2, wo, wp), np.float32)
    s[0, 2 * np.arange(wp), np.arange(wp)] = 1.0
    s[1, 2 * np.arange(wp) + 1, np.arange(wp)] = 1.0
    eye = np.eye(c, dtype=np.float32)
    q = np.stack([np.kron(s[0], eye), np.kron(s[1], eye)])    # (2, wo*c, wp*c)
    return jnp.asarray(q)


# ---------------------------------------------------------------------------
# Model
# ---------------------------------------------------------------------------
class LeNetTargetPallas:
    """Pallas port of LeNetTarget.forward (weights supplied as a flat dict)."""

    def __init__(self, kernel_size, n_kernels=10, out_dim=10,
                 target_hidden_dim=50, n_conv_layers=2, n_tasks=2,
                 mxu_dtype=jnp.bfloat16, max_tile_b=128):
        assert len(kernel_size) == n_conv_layers
        self.kernel_size = kernel_size
        self.n_kernels = n_kernels
        self.out_dim = out_dim
        self.target_hidden_dim = target_hidden_dim
        self.n_conv_layers = n_conv_layers
        self.n_tasks = n_tasks
        self.mxu_dtype = mxu_dtype
        self.max_tile_b = max_tile_b

    # ---- static row-phase plan (per-layer phase counts / shifts / asserts)
    def _row_plan(self, H):
        L = self.n_conv_layers
        p0 = 2 ** L
        assert H % p0 == 0, "input height must be divisible by 2**n_conv_layers"
        R = H // p0
        phase_counts = []
        h = H
        valid_in = R
        cum_d = 0
        for l in range(L):
            two_p = 2 ** (L - l)
            k = self.kernel_size[l]
            ho = h - k + 1
            # TODO(synk): odd conv-output sizes (MaxPool2d floor mode) would
            # need masked pooling; default LeNet/MultiMNIST shapes are even.
            assert ho >= 2 and ho % 2 == 0, "conv output height must be even"
            hp = ho // 2
            p_out = two_p // 2
            assert hp % p_out == 0
            np_out = hp // p_out
            d_max = (two_p + k - 2) // two_p
            cum_d += d_max
            assert np_out - 1 + d_max <= valid_in - 1, "phase plan: reads past valid rows"
            assert np_out <= R - cum_d, "phase plan: last image rows not materialized"
            phase_counts.append(two_p)
            valid_in = np_out
            h = hp
        hf = h
        assert R >= cum_d + hf, "phase plan: hidden row of last image not materialized"
        return R, tuple(phase_counts), cum_d, hf

    # ---- one-time weight preprocessing (call once, outside the per-step jit)
    def prepare_params(self, weights, input_hw):
        H, W = input_hw
        params = []
        h, w, cin = H, W, 1
        for l in range(self.n_conv_layers):
            cout = int(2 ** l * self.n_kernels)
            k = self.kernel_size[l]
            w_oihw = jnp.asarray(weights[f'conv{l}.weights'],
                                 jnp.float32).reshape(cout, cin, k, k)
            bias = jnp.asarray(weights[f'conv{l}.bias'], jnp.float32)
            ho, wo = h - k + 1, w - k + 1
            assert ho % 2 == 0 and wo % 2 == 0, "even conv outputs required"
            m = _band_conv_weight(w_oihw, w).astype(self.mxu_dtype)   # (k, w*cin, wo*cout)
            brow = jnp.tile(bias, wo).reshape(1, wo * cout)           # f32 bias row
            qsel = _col_pool_selector(wo, cout).astype(self.mxu_dtype)
            params += [m, brow, qsel]
            h, w, cin = ho // 2, wo // 2, cout

        flat = cin * h * w
        wh = jnp.asarray(weights['hidden0.weights'],
                         jnp.float32).reshape(self.target_hidden_dim, flat)
        # fold torch.flatten(NCHW) ordering into the weight: (h, w*c, hidden)
        whk = jnp.transpose(wh.reshape(self.target_hidden_dim, cin, h, w),
                            (2, 3, 1, 0)).reshape(h, w * cin,
                                                  self.target_hidden_dim)
        whk = whk.astype(self.mxu_dtype)
        bh = jnp.asarray(weights['hidden0.bias'], jnp.float32).reshape(1, -1)

        n_out = self.n_tasks * self.out_dim
        nout_pad = _round_up(n_out, 128)        # lane-dense, unmasked output store
        wt = jnp.concatenate(
            [jnp.asarray(weights[f'task{j}.weights'], jnp.float32)
             .reshape(self.out_dim, self.target_hidden_dim).T
             for j in range(self.n_tasks)], axis=1)
        wt = jnp.pad(wt, ((0, 0), (0, nout_pad - n_out))).astype(self.mxu_dtype)
        bt = jnp.concatenate([jnp.asarray(weights[f'task{j}.bias'], jnp.float32)
                              for j in range(self.n_tasks)])
        bt = jnp.pad(bt, (0, nout_pad - n_out)).reshape(1, nout_pad)
        params += [whk, bh, wt, bt]
        return tuple(params)

    # ---- fused forward: one pallas_call for the whole network
    def apply(self, x_nchw, params, tile_b=None):
        n, c, H, W = x_nchw.shape
        assert c == 1, "LeNetTarget expects single-channel input"
        R, phase_counts, cum_d, hf = self._row_plan(H)
        p0 = phase_counts[0]

        if tile_b is None:
            tile_b = min(self.max_tile_b, _round_up(n, 8))
        tile_b = _round_up(tile_b, 8)            # keeps TILE_B*R sublane-aligned
        n_pad = _round_up(n, tile_b)
        num_blocks = n_pad // tile_b
        hid_len = tile_b * R - cum_d - (hf - 1)
        n_out = self.n_tasks * self.out_dim
        nout_pad = params[-1].shape[1]

        # host-side layout plumbing: pad batch + split rows into 2^L phases
        x = jnp.asarray(x_nchw, jnp.float32)
        if n_pad != n:
            x = jnp.pad(x, ((0, n_pad - n), (0, 0), (0, 0), (0, 0)))
        xp = (x.reshape(n_pad, R, p0, W)
               .transpose(2, 0, 1, 3)
               .reshape(p0, n_pad * R, W)
               .astype(self.mxu_dtype))          # bf16 input halves the DMA

        def full_spec(a):
            zero = (0,) * a.ndim
            return pl.BlockSpec(a.shape, lambda i, _z=zero: _z)

        in_specs = [pl.BlockSpec((p0, tile_b * R, W), lambda i: (0, i, 0))]
        in_specs += [full_spec(p) for p in params]
        out_specs = pl.BlockSpec((1, hid_len, nout_pad), lambda i: (i, 0, 0))

        # advisory cost estimate for the XLA scheduler
        flops = 0
        cur_len = tile_b * R
        a_lanes = W
        h, w = H, W
        for l in range(self.n_conv_layers):
            two_p = phase_counts[l]
            k = self.kernel_size[l]
            cout = int(2 ** l * self.n_kernels)
            wo = w - k + 1
            B = wo * cout
            B2 = (wo // 2) * cout
            out_len = cur_len - (two_p + k - 2) // two_p
            flops += two_p * k * 2 * out_len * a_lanes * B     # conv banded matmuls
            flops += (two_p // 2) * 2 * 2 * out_len * B * B2   # column-pool matmuls
            cur_len, a_lanes = out_len, B2
            h, w = (h - k + 1) // 2, wo // 2
        flops += hf * 2 * hid_len * a_lanes * self.target_hidden_dim
        flops += 2 * hid_len * self.target_hidden_dim * nout_pad
        flops *= num_blocks
        bytes_accessed = int(xp.size) * xp.dtype.itemsize
        bytes_accessed += sum(int(p.size) * p.dtype.itemsize for p in params)
        bytes_accessed += num_blocks * hid_len * nout_pad * 4

        kernel = functools.partial(_lenet_kernel, self.n_conv_layers,
                                   phase_counts)
        out = pl.pallas_call(
            kernel,
            out_shape=jax.ShapeDtypeStruct((num_blocks, hid_len, nout_pad),
                                           jnp.float32),
            grid_spec=pltpu.PrefetchScalarGridSpec(
                num_scalar_prefetch=0,
                grid=(num_blocks,),
                in_specs=in_specs,
                out_specs=out_specs),
            compiler_params=pltpu.CompilerParams(
                dimension_semantics=("parallel",)),
            cost_estimate=pl.CostEstimate(
                flops=int(flops), transcendentals=0,
                bytes_accessed=int(bytes_accessed)),
        )(xp, *params)

        # host-side extraction: image b of block i lives at row b*R, lanes :n_out
        logits = out[:, 0:(tile_b - 1) * R + 1:R, :n_out]      # (blocks, TILE_B, n_out)
        logits = logits.reshape(n_pad, n_out)[:n]
        return [logits[:, j * self.out_dim:(j + 1) * self.out_dim]
                for j in range(self.n_tasks)]

    def __call__(self, x_nchw, weights):
        params = self.prepare_params(weights, x_nchw.shape[2:])
        return self.apply(x_nchw, params)


# ---------------------------------------------------------------------------
# Pure-JAX reference (correctness checking only).
# operand_dtype=None -> full f32; operand_dtype=bf16 -> same MXU-operand
# quantization as the kernel (f32 accumulation), for a tight comparison.
# ---------------------------------------------------------------------------
def _reference(x_nchw, weights, model, operand_dtype=None):
    def q(a):
        a = jnp.asarray(a, jnp.float32)
        return a.astype(operand_dtype) if operand_dtype is not None else a

    x = jnp.asarray(x_nchw, jnp.float32)
    cin = 1
    for i in range(model.n_conv_layers):
        cout = int(2 ** i * model.n_kernels)
        k = model.kernel_size[i]
        wgt = jnp.asarray(weights[f'conv{i}.weights'],
                          jnp.float32).reshape(cout, cin, k, k)
        y = lax.conv_general_dilated(
            q(x), q(wgt), (1, 1), 'VALID',
            dimension_numbers=('NCHW', 'OIHW', 'NCHW'),
            preferred_element_type=jnp.float32)
        y = jnp.maximum(
            y + jnp.asarray(weights[f'conv{i}.bias'],
                            jnp.float32)[None, :, None, None], 0.0)
        x = lax.reduce_window(y, -jnp.inf, lax.max,
                              (1, 1, 2, 2), (1, 1, 2, 2), 'VALID')
        cin = cout
    flat = x.reshape(x.shape[0], -1)
    wh = jnp.asarray(weights['hidden0.weights'],
                     jnp.float32).reshape(model.target_hidden_dim, flat.shape[-1])
    hid = jnp.dot(q(flat), q(wh).T, preferred_element_type=jnp.float32) \
        + jnp.asarray(weights['hidden0.bias'], jnp.float32)
    outs = []
    for j in range(model.n_tasks):
        wt = jnp.asarray(weights[f'task{j}.weights'],
                         jnp.float32).reshape(model.out_dim, model.target_hidden_dim)
        outs.append(jnp.dot(q(hid), q(wt).T, preferred_element_type=jnp.float32)
                    + jnp.asarray(weights[f'task{j}.bias'], jnp.float32))
    return outs


# ---------------------------------------------------------------------------
if __name__ == "__main__":
    key = jax.random.PRNGKey(0)
    N, H, W = 18, 28, 28
    kernel_size = [5, 5]
    n_kernels, out_dim, hidden, n_tasks = 10, 10, 50, 2

    model = LeNetTargetPallas(kernel_size, n_kernels=n_kernels, out_dim=out_dim,
                              target_hidden_dim=hidden, n_conv_layers=2,
                              n_tasks=n_tasks)

    # flat dim after conv0/pool/conv1/pool
    h1 = (H - kernel_size[0] + 1) // 2
    h2 = (h1 - kernel_size[1] + 1) // 2
    flat_dim = 2 * n_kernels * h2 * h2

    keys = jax.random.split(key, 11)

    def nrm(k, shape, scale=0.1):
        return scale * jax.random.normal(k, shape, dtype=jnp.float32)

    weights = {
        'conv0.weights': nrm(keys[0], (n_kernels * 1 * kernel_size[0] ** 2,)),
        'conv0.bias': nrm(keys[1], (n_kernels,)),
        'conv1.weights': nrm(keys[2], (2 * n_kernels * n_kernels * kernel_size[1] ** 2,)),
        'conv1.bias': nrm(keys[3], (2 * n_kernels,)),
        'hidden0.weights': nrm(keys[4], (hidden * flat_dim,)),
        'hidden0.bias': nrm(keys[5], (hidden,)),
        'task0.weights': nrm(keys[6], (out_dim * hidden,)),
        'task0.bias': nrm(keys[7], (out_dim,)),
        'task1.weights': nrm(keys[8], (out_dim * hidden,)),
        'task1.bias': nrm(keys[9], (out_dim,)),
    }
    x = jax.random.normal(keys[10], (N, 1, H, W), dtype=jnp.float32)

    # One-time weight preprocessing, then a single fused pallas_call per batch
    # block.  tile_b=8 -> 3 grid steps (exercises the batch blocking).
    params = model.prepare_params(weights, (H, W))
    forward = jax.jit(lambda xb, pp: model.apply(xb, pp, tile_b=8))
    logits = forward(x, params)
    logits = [jax.block_until_ready(l) for l in logits]

    # matched-precision reference (same bf16 MXU operands, f32 accumulation)
    ref_q = _reference(x, weights, model, operand_dtype=jnp.bfloat16)
    # full-f32 reference (loose sanity bound on the bf16 quantization error)
    ref_f = _reference(x, weights, model)

    assert len(logits) == n_tasks
    for a, bq, bf in zip(logits, ref_q, ref_f):
        assert a.shape == (N, out_dim), a.shape
        assert jnp.allclose(a, bq, rtol=5e-3, atol=5e-3), \
            float(jnp.max(jnp.abs(a - bq)))
        assert jnp.allclose(a, bf, rtol=3.5e-1, atol=3.5e-1), \
            float(jnp.max(jnp.abs(a - bf)))

    print("KERNEL_OK")
</pallas_src>

<mosaic_0001>
module attributes {stable_mosaic.version = 11 : i64} {
  func.func @_lenet_kernel(%arg0: i32, %arg1: memref<4x56x28xbf16, #tpu.memory_space<vmem>>, %arg2: memref<5x28x240xbf16, #tpu.memory_space<vmem>>, %arg3: memref<1x240xf32, #tpu.memory_space<vmem>>, %arg4: memref<2x240x120xbf16, #tpu.memory_space<vmem>>, %arg5: memref<5x120x160xbf16, #tpu.memory_space<vmem>>, %arg6: memref<1x160xf32, #tpu.memory_space<vmem>>, %arg7: memref<2x160x80xbf16, #tpu.memory_space<vmem>>, %arg8: memref<4x80x50xbf16, #tpu.memory_space<vmem>>, %arg9: memref<1x50xf32, #tpu.memory_space<vmem>>, %arg10: memref<50x128xbf16, #tpu.memory_space<vmem>>, %arg11: memref<1x128xf32, #tpu.memory_space<vmem>>, %arg12: memref<1x50x128xf32, #tpu.memory_space<vmem>>) attributes {dimension_semantics = [#tpu.dimension_semantics<parallel>], iteration_bounds = array<i64: 3>, scalar_prefetch = 0 : i64, scratch_operands = 0 : i64, tpu.core_type = #tpu.core_type<tc>, window_params = [{transform_indices = @transform_0, window_bounds = array<i64: 4, 56, 28>}, {pipeline_mode = #tpu.pipeline_mode<synchronous>, transform_indices = @transform_1, window_bounds = array<i64: 5, 28, 240>}, {pipeline_mode = #tpu.pipeline_mode<synchronous>, transform_indices = @transform_2, window_bounds = array<i64: 1, 240>}, {pipeline_mode = #tpu.pipeline_mode<synchronous>, transform_indices = @transform_3, window_bounds = array<i64: 2, 240, 120>}, {pipeline_mode = #tpu.pipeline_mode<synchronous>, transform_indices = @transform_4, window_bounds = array<i64: 5, 120, 160>}, {pipeline_mode = #tpu.pipeline_mode<synchronous>, transform_indices = @transform_5, window_bounds = array<i64: 1, 160>}, {pipeline_mode = #tpu.pipeline_mode<synchronous>, transform_indices = @transform_6, window_bounds = array<i64: 2, 160, 80>}, {pipeline_mode = #tpu.pipeline_mode<synchronous>, transform_indices = @transform_7, window_bounds = array<i64: 4, 80, 50>}, {pipeline_mode = #tpu.pipeline_mode<synchronous>, transform_indices = @transform_8, window_bounds = array<i64: 1, 50>}, {pipeline_mode = #tpu.pipeline_mode<synchronous>, transform_indices = @transform_9, window_bounds = array<i64: 50, 128>}, {pipeline_mode = #tpu.pipeline_mode<synchronous>, transform_indices = @transform_10, window_bounds = array<i64: 1, 128>}, {transform_indices = @transform_11, window_bounds = array<i64: 1, 50, 128>}]} {
    %c0 = arith.constant 0 : index
    %c0_0 = arith.constant 0 : index
    %c0_1 = arith.constant 0 : index
    %0 = vector.load %arg1[%c0, %c0_0, %c0_1] : memref<4x56x28xbf16, #tpu.memory_space<vmem>>, vector<1x56x28xbf16>
    %1 = vector.shape_cast %0 : vector<1x56x28xbf16> to vector<56x28xbf16>
    %2 = arith.extf %1 : vector<56x28xbf16> to vector<56x28xf32>
    %c1 = arith.constant 1 : index
    %c0_2 = arith.constant 0 : index
    %c0_3 = arith.constant 0 : index
    %3 = vector.load %arg1[%c1, %c0_2, %c0_3] : memref<4x56x28xbf16, #tpu.memory_space<vmem>>, vector<1x56x28xbf16>
    %4 = vector.shape_cast %3 : vector<1x56x28xbf16> to vector<56x28xbf16>
    %5 = arith.extf %4 : vector<56x28xbf16> to vector<56x28xf32>
    %c2 = arith.constant 2 : index
    %c0_4 = arith.constant 0 : index
    %c0_5 = arith.constant 0 : index
    %6 = vector.load %arg1[%c2, %c0_4, %c0_5] : memref<4x56x28xbf16, #tpu.memory_space<vmem>>, vector<1x56x28xbf16>
    %7 = vector.shape_cast %6 : vector<1x56x28xbf16> to vector<56x28xbf16>
    %8 = arith.extf %7 : vector<56x28xbf16> to vector<56x28xf32>
    %c3 = arith.constant 3 : index
    %c0_6 = arith.constant 0 : index
    %c0_7 = arith.constant 0 : index
    %9 = vector.load %arg1[%c3, %c0_6, %c0_7] : memref<4x56x28xbf16, #tpu.memory_space<vmem>>, vector<1x56x28xbf16>
    %10 = vector.shape_cast %9 : vector<1x56x28xbf16> to vector<56x28xbf16>
    %11 = arith.extf %10 : vector<56x28xbf16> to vector<56x28xf32>
    %cst = arith.constant 0.000000e+00 : f32
    %12 = vector.broadcast %cst : f32 to vector<55x240xf32>
    %13 = vector.extract_strided_slice %2 {offsets = [0, 0], sizes = [55, 28], strides = [1, 1]} : vector<56x28xf32> to vector<55x28xf32>
    %14 = arith.truncf %13 : vector<55x28xf32> to vector<55x28xbf16>
    %c0_8 = arith.constant 0 : index
    %c0_9 = arith.constant 0 : index
    %c0_10 = arith.constant 0 : index
    %15 = vector.load %arg2[%c0_8, %c0_9, %c0_10] : memref<5x28x240xbf16, #tpu.memory_space<vmem>>, vector<1x28x240xbf16>
    %16 = vector.shape_cast %15 : vector<1x28x240xbf16> to vector<28x240xbf16>
    %cst_11 = arith.constant dense<0.000000e+00> : vector<55x240xf32>
    %17 = tpu.matmul %14, %16, %cst_11 {dimension_numbers = #tpu.dot_dimension_numbers<[1], [0], [0], [1], [0, 0, 1, 1], [], []>} : vector<55x28xbf16>, vector<28x240xbf16>, vector<55x240xf32> -> vector<55x240xf32>
    %18 = arith.addf %12, %17 : vector<55x240xf32>
    %19 = vector.extract_strided_slice %5 {offsets = [0, 0], sizes = [55, 28], strides = [1, 1]} : vector<56x28xf32> to vector<55x28xf32>
    %20 = arith.truncf %19 : vector<55x28xf32> to vector<55x28xbf16>
    %c1_12 = arith.constant 1 : index
    %c0_13 = arith.constant 0 : index
    %c0_14 = arith.constant 0 : index
    %21 = vector.load %arg2[%c1_12, %c0_13, %c0_14] : memref<5x28x240xbf16, #tpu.memory_space<vmem>>, vector<1x28x240xbf16>
    %22 = vector.shape_cast %21 : vector<1x28x240xbf16> to vector<28x240xbf16>
    %cst_15 = arith.constant dense<0.000000e+00> : vector<55x240xf32>
    %23 = tpu.matmul %20, %22, %cst_15 {dimension_numbers = #tpu.dot_dimension_numbers<[1], [0], [0], [1], [0, 0, 1, 1], [], []>} : vector<55x28xbf16>, vector<28x240xbf16>, vector<55x240xf32> -> vector<55x240xf32>
    %24 = arith.addf %18, %23 : vector<55x240xf32>
    %25 = vector.extract_strided_slice %8 {offsets = [0, 0], sizes = [55, 28], strides = [1, 1]} : vector<56x28xf32> to vector<55x28xf32>
    %26 = arith.truncf %25 : vector<55x28xf32> to vector<55x28xbf16>
    %c2_16 = arith.constant 2 : index
    %c0_17 = arith.constant 0 : index
    %c0_18 = arith.constant 0 : index
    %27 = vector.load %arg2[%c2_16, %c0_17, %c0_18] : memref<5x28x240xbf16, #tpu.memory_space<vmem>>, vector<1x28x240xbf16>
    %28 = vector.shape_cast %27 : vector<1x28x240xbf16> to vector<28x240xbf16>
    %cst_19 = arith.constant dense<0.000000e+00> : vector<55x240xf32>
    %29 = tpu.matmul %26, %28, %cst_19 {dimension_numbers = #tpu.dot_dimension_numbers<[1], [0], [0], [1], [0, 0, 1, 1], [], []>} : vector<55x28xbf16>, vector<28x240xbf16>, vector<55x240xf32> -> vector<55x240xf32>
    %30 = arith.addf %24, %29 : vector<55x240xf32>
    %31 = vector.extract_strided_slice %11 {offsets = [0, 0], sizes = [55, 28], strides = [1, 1]} : vector<56x28xf32> to vector<55x28xf32>
    %32 = arith.truncf %31 : vector<55x28xf32> to vector<55x28xbf16>
    %c3_20 = arith.constant 3 : index
    %c0_21 = arith.constant 0 : index
    %c0_22 = arith.constant 0 : index
    %33 = vector.load %arg2[%c3_20, %c0_21, %c0_22] : memref<5x28x240xbf16, #tpu.memory_space<vmem>>, vector<1x28x240xbf16>
    %34 = vector.shape_cast %33 : vector<1x28x240xbf16> to vector<28x240xbf16>
    %cst_23 = arith.constant dense<0.000000e+00> : vector<55x240xf32>
    %35 = tpu.matmul %32, %34, %cst_23 {dimension_numbers = #tpu.dot_dimension_numbers<[1], [0], [0], [1], [0, 0, 1, 1], [], []>} : vector<55x28xbf16>, vector<28x240xbf16>, vector<55x240xf32> -> vector<55x240xf32>
    %36 = arith.addf %30, %35 : vector<55x240xf32>
    %37 = vector.extract_strided_slice %2 {offsets = [1, 0], sizes = [55, 28], strides = [1, 1]} : vector<56x28xf32> to vector<55x28xf32>
    %38 = arith.truncf %37 : vector<55x28xf32> to vector<55x28xbf16>
    %c4 = arith.constant 4 : index
    %c0_24 = arith.constant 0 : index
    %c0_25 = arith.constant 0 : index
    %39 = vector.load %arg2[%c4, %c0_24, %c0_25] : memref<5x28x240xbf16, #tpu.memory_space<vmem>>, vector<1x28x240xbf16>
    %40 = vector.shape_cast %39 : vector<1x28x240xbf16> to vector<28x240xbf16>
    %cst_26 = arith.constant dense<0.000000e+00> : vector<55x240xf32>
    %41 = tpu.matmul %38, %40, %cst_26 {dimension_numbers = #tpu.dot_dimension_numbers<[1], [0], [0], [1], [0, 0, 1, 1], [], []>} : vector<55x28xbf16>, vector<28x240xbf16>, vector<55x240xf32> -> vector<55x240xf32>
    %42 = arith.addf %36, %41 : vector<55x240xf32>
    %cst_27 = arith.constant 0.000000e+00 : f32
    %43 = vector.broadcast %cst_27 : f32 to vector<55x240xf32>
    %44 = vector.extract_strided_slice %5 {offsets = [0, 0], sizes = [55, 28], strides = [1, 1]} : vector<56x28xf32> to vector<55x28xf32>
    %45 = arith.truncf %44 : vector<55x28xf32> to vector<55x28xbf16>
    %c0_28 = arith.constant 0 : index
    %c0_29 = arith.constant 0 : index
    %c0_30 = arith.constant 0 : index
    %46 = vector.load %arg2[%c0_28, %c0_29, %c0_30] : memref<5x28x240xbf16, #tpu.memory_space<vmem>>, vector<1x28x240xbf16>
    %47 = vector.shape_cast %46 : vector<1x28x240xbf16> to vector<28x240xbf16>
    %cst_31 = arith.constant dense<0.000000e+00> : vector<55x240xf32>
    %48 = tpu.matmul %45, %47, %cst_31 {dimension_numbers = #tpu.dot_dimension_numbers<[1], [0], [0], [1], [0, 0, 1, 1], [], []>} : vector<55x28xbf16>, vector<28x240xbf16>, vector<55x240xf32> -> vector<55x240xf32>
    %49 = arith.addf %43, %48 : vector<55x240xf32>
    %50 = vector.extract_strided_slice %8 {offsets = [0, 0], sizes = [55, 28], strides = [1, 1]} : vector<56x28xf32> to vector<55x28xf32>
    %51 = arith.truncf %50 : vector<55x28xf32> to vector<55x28xbf16>
    %c1_32 = arith.constant 1 : index
    %c0_33 = arith.constant 0 : index
    %c0_34 = arith.constant 0 : index
    %52 = vector.load %arg2[%c1_32, %c0_33, %c0_34] : memref<5x28x240xbf16, #tpu.memory_space<vmem>>, vector<1x28x240xbf16>
    %53 = vector.shape_cast %52 : vector<1x28x240xbf16> to vector<28x240xbf16>
    %cst_35 = arith.constant dense<0.000000e+00> : vector<55x240xf32>
    %54 = tpu.matmul %51, %53, %cst_35 {dimension_numbers = #tpu.dot_dimension_numbers<[1], [0], [0], [1], [0, 0, 1, 1], [], []>} : vector<55x28xbf16>, vector<28x240xbf16>, vector<55x240xf32> -> vector<55x240xf32>
    %55 = arith.addf %49, %54 : vector<55x240xf32>
    %56 = vector.extract_strided_slice %11 {offsets = [0, 0], sizes = [55, 28], strides = [1, 1]} : vector<56x28xf32> to vector<55x28xf32>
    %57 = arith.truncf %56 : vector<55x28xf32> to vector<55x28xbf16>
    %c2_36 = arith.constant 2 : index
    %c0_37 = arith.constant 0 : index
    %c0_38 = arith.constant 0 : index
    %58 = vector.load %arg2[%c2_36, %c0_37, %c0_38] : memref<5x28x240xbf16, #tpu.memory_space<vmem>>, vector<1x28x240xbf16>
    %59 = vector.shape_cast %58 : vector<1x28x240xbf16> to vector<28x240xbf16>
    %cst_39 = arith.constant dense<0.000000e+00> : vector<55x240xf32>
    %60 = tpu.matmul %57, %59, %cst_39 {dimension_numbers = #tpu.dot_dimension_numbers<[1], [0], [0], [1], [0, 0, 1, 1], [], []>} : vector<55x28xbf16>, vector<28x240xbf16>, vector<55x240xf32> -> vector<55x240xf32>
    %61 = arith.addf %55, %60 : vector<55x240xf32>
    %62 = vector.extract_strided_slice %2 {offsets = [1, 0], sizes = [55, 28], strides = [1, 1]} : vector<56x28xf32> to vector<55x28xf32>
    %63 = arith.truncf %62 : vector<55x28xf32> to vector<55x28xbf16>
    %c3_40 = arith.constant 3 : index
    %c0_41 = arith.constant 0 : index
    %c0_42 = arith.constant 0 : index
    %64 = vector.load %arg2[%c3_40, %c0_41, %c0_42] : memref<5x28x240xbf16, #tpu.memory_space<vmem>>, vector<1x28x240xbf16>
    %65 = vector.shape_cast %64 : vector<1x28x240xbf16> to vector<28x240xbf16>
    %cst_43 = arith.constant dense<0.000000e+00> : vector<55x240xf32>
    %66 = tpu.matmul %63, %65, %cst_43 {dimension_numbers = #tpu.dot_dimension_numbers<[1], [0], [0], [1], [0, 0, 1, 1], [], []>} : vector<55x28xbf16>, vector<28x240xbf16>, vector<55x240xf32> -> vector<55x240xf32>
    %67 = arith.addf %61, %66 : vector<55x240xf32>
    %68 = vector.extract_strided_slice %5 {offsets = [1, 0], sizes = [55, 28], strides = [1, 1]} : vector<56x28xf32> to vector<55x28xf32>
    %69 = arith.truncf %68 : vector<55x28xf32> to vector<55x28xbf16>
    %c4_44 = arith.constant 4 : index
    %c0_45 = arith.constant 0 : index
    %c0_46 = arith.constant 0 : index
    %70 = vector.load %arg2[%c4_44, %c0_45, %c0_46] : memref<5x28x240xbf16, #tpu.memory_space<vmem>>, vector<1x28x240xbf16>
    %71 = vector.shape_cast %70 : vector<1x28x240xbf16> to vector<28x240xbf16>
    %cst_47 = arith.constant dense<0.000000e+00> : vector<55x240xf32>
    %72 = tpu.matmul %69, %71, %cst_47 {dimension_numbers = #tpu.dot_dimension_numbers<[1], [0], [0], [1], [0, 0, 1, 1], [], []>} : vector<55x28xbf16>, vector<28x240xbf16>, vector<55x240xf32> -> vector<55x240xf32>
    %73 = arith.addf %67, %72 : vector<55x240xf32>
    %74 = arith.maximumf %42, %73 : vector<55x240xf32>
    %c0_48 = arith.constant 0 : index
    %c0_49 = arith.constant 0 : index
    %75 = vector.load %arg3[%c0_48, %c0_49] : memref<1x240xf32, #tpu.memory_space<vmem>>, vector<1x240xf32>
    %76 = vector.broadcast %75 : vector<1x240xf32> to vector<55x240xf32>
    %77 = arith.addf %74, %76 : vector<55x240xf32>
    %cst_50 = arith.constant 0.000000e+00 : f32
    %78 = vector.broadcast %cst_50 : f32 to vector<55x240xf32>
    %79 = arith.maximumf %77, %78 : vector<55x240xf32>
    %80 = arith.truncf %79 : vector<55x240xf32> to vector<55x240xbf16>
    %c0_51 = arith.constant 0 : index
    %c0_52 = arith.constant 0 : index
    %c0_53 = arith.constant 0 : index
    %81 = vector.load %arg4[%c0_51, %c0_52, %c0_53] : memref<2x240x120xbf16, #tpu.memory_space<vmem>>, vector<1x240x120xbf16>
    %82 = vector.shape_cast %81 : vector<1x240x120xbf16> to vector<240x120xbf16>
    %cst_54 = arith.constant dense<0.000000e+00> : vector<55x120xf32>
    %83 = tpu.matmul %80, %82, %cst_54 {dimension_numbers = #tpu.dot_dimension_numbers<[1], [0], [0], [1], [0, 0, 1, 1], [], []>} : vector<55x240xbf16>, vector<240x120xbf16>, vector<55x120xf32> -> vector<55x120xf32>
    %c1_55 = arith.constant 1 : index
    %c0_56 = arith.constant 0 : index
    %c0_57 = arith.constant 0 : index
    %84 = vector.load %arg4[%c1_55, %c0_56, %c0_57] : memref<2x240x120xbf16, #tpu.memory_space<vmem>>, vector<1x240x120xbf16>
    %85 = vector.shape_cast %84 : vector<1x240x120xbf16> to vector<240x120xbf16>
    %cst_58 = arith.constant dense<0.000000e+00> : vector<55x120xf32>
    %86 = tpu.matmul %80, %85, %cst_58 {dimension_numbers = #tpu.dot_dimension_numbers<[1], [0], [0], [1], [0, 0, 1, 1], [], []>} : vector<55x240xbf16>, vector<240x120xbf16>, vector<55x120xf32> -> vector<55x120xf32>
    %87 = arith.maximumf %83, %86 : vector<55x120xf32>
    %cst_59 = arith.constant 0.000000e+00 : f32
    %88 = vector.broadcast %cst_59 : f32 to vector<55x240xf32>
    %89 = vector.extract_strided_slice %8 {offsets = [0, 0], sizes = [55, 28], strides = [1, 1]} : vector<56x28xf32> to vector<55x28xf32>
    %90 = arith.truncf %89 : vector<55x28xf32> to vector<55x28xbf16>
    %c0_60 = arith.constant 0 : index
    %c0_61 = arith.constant 0 : index
    %c0_62 = arith.constant 0 : index
    %91 = vector.load %arg2[%c0_60, %c0_61, %c0_62] : memref<5x28x240xbf16, #tpu.memory_space<vmem>>, vector<1x28x240xbf16>
    %92 = vector.shape_cast %91 : vector<1x28x240xbf16> to vector<28x240xbf16>
    %cst_63 = arith.constant dense<0.000000e+00> : vector<55x240xf32>
    %93 = tpu.matmul %90, %92, %cst_63 {dimension_numbers = #tpu.dot_dimension_numbers<[1], [0], [0], [1], [0, 0, 1, 1], [], []>} : vector<55x28xbf16>, vector<28x240xbf16>, vector<55x240xf32> -> vector<55x240xf32>
    %94 = arith.addf %88, %93 : vector<55x240xf32>
    %95 = vector.extract_strided_slice %11 {offsets = [0, 0], sizes = [55, 28], strides = [1, 1]} : vector<56x28xf32> to vector<55x28xf32>
    %96 = arith.truncf %95 : vector<55x28xf32> to vector<55x28xbf16>
    %c1_64 = arith.constant 1 : index
    %c0_65 = arith.constant 0 : index
    %c0_66 = arith.constant 0 : index
    %97 = vector.load %arg2[%c1_64, %c0_65, %c0_66] : memref<5x28x240xbf16, #tpu.memory_space<vmem>>, vector<1x28x240xbf16>
    %98 = vector.shape_cast %97 : vector<1x28x240xbf16> to vector<28x240xbf16>
    %cst_67 = arith.constant dense<0.000000e+00> : vector<55x240xf32>
    %99 = tpu.matmul %96, %98, %cst_67 {dimension_numbers = #tpu.dot_dimension_numbers<[1], [0], [0], [1], [0, 0, 1, 1], [], []>} : vector<55x28xbf16>, vector<28x240xbf16>, vector<55x240xf32> -> vector<55x240xf32>
    %100 = arith.addf %94, %99 : vector<55x240xf32>
    %101 = vector.extract_strided_slice %2 {offsets = [1, 0], sizes = [55, 28], strides = [1, 1]} : vector<56x28xf32> to vector<55x28xf32>
    %102 = arith.truncf %101 : vector<55x28xf32> to vector<55x28xbf16>
    %c2_68 = arith.constant 2 : index
    %c0_69 = arith.constant 0 : index
    %c0_70 = arith.constant 0 : index
    %103 = vector.load %arg2[%c2_68, %c0_69, %c0_70] : memref<5x28x240xbf16, #tpu.memory_space<vmem>>, vector<1x28x240xbf16>
    %104 = vector.shape_cast %103 : vector<1x28x240xbf16> to vector<28x240xbf16>
    %cst_71 = arith.constant dense<0.000000e+00> : vector<55x240xf32>
    %105 = tpu.matmul %102, %104, %cst_71 {dimension_numbers = #tpu.dot_dimension_numbers<[1], [0], [0], [1], [0, 0, 1, 1], [], []>} : vector<55x28xbf16>, vector<28x240xbf16>, vector<55x240xf32> -> vector<55x240xf32>
    %106 = arith.addf %100, %105 : vector<55x240xf32>
    %107 = vector.extract_strided_slice %5 {offsets = [1, 0], sizes = [55, 28], strides = [1, 1]} : vector<56x28xf32> to vector<55x28xf32>
    %108 = arith.truncf %107 : vector<55x28xf32> to vector<55x28xbf16>
    %c3_72 = arith.constant 3 : index
    %c0_73 = arith.constant 0 : index
    %c0_74 = arith.constant 0 : index
    %109 = vector.load %arg2[%c3_72, %c0_73, %c0_74] : memref<5x28x240xbf16, #tpu.memory_space<vmem>>, vector<1x28x240xbf16>
    %110 = vector.shape_cast %109 : vector<1x28x240xbf16> to vector<28x240xbf16>
    %cst_75 = arith.constant dense<0.000000e+00> : vector<55x240xf32>
    %111 = tpu.matmul %108, %110, %cst_75 {dimension_numbers = #tpu.dot_dimension_numbers<[1], [0], [0], [1], [0, 0, 1, 1], [], []>} : vector<55x28xbf16>, vector<28x240xbf16>, vector<55x240xf32> -> vector<55x240xf32>
    %112 = arith.addf %106, %111 : vector<55x240xf32>
    %113 = vector.extract_strided_slice %8 {offsets = [1, 0], sizes = [55, 28], strides = [1, 1]} : vector<56x28xf32> to vector<55x28xf32>
    %114 = arith.truncf %113 : vector<55x28xf32> to vector<55x28xbf16>
    %c4_76 = arith.constant 4 : index
    %c0_77 = arith.constant 0 : index
    %c0_78 = arith.constant 0 : index
    %115 = vector.load %arg2[%c4_76, %c0_77, %c0_78] : memref<5x28x240xbf16, #tpu.memory_space<vmem>>, vector<1x28x240xbf16>
    %116 = vector.shape_cast %115 : vector<1x28x240xbf16> to vector<28x240xbf16>
    %cst_79 = arith.constant dense<0.000000e+00> : vector<55x240xf32>
    %117 = tpu.matmul %114, %116, %cst_79 {dimension_numbers = #tpu.dot_dimension_numbers<[1], [0], [0], [1], [0, 0, 1, 1], [], []>} : vector<55x28xbf16>, vector<28x240xbf16>, vector<55x240xf32> -> vector<55x240xf32>
    %118 = arith.addf %112, %117 : vector<55x240xf32>
    %cst_80 = arith.constant 0.000000e+00 : f32
    %119 = vector.broadcast %cst_80 : f32 to vector<55x240xf32>
    %120 = vector.extract_strided_slice %11 {offsets = [0, 0], sizes = [55, 28], strides = [1, 1]} : vector<56x28xf32> to vector<55x28xf32>
    %121 = arith.truncf %120 : vector<55x28xf32> to vector<55x28xbf16>
    %c0_81 = arith.constant 0 : index
    %c0_82 = arith.constant 0 : index
    %c0_83 = arith.constant 0 : index
    %122 = vector.load %arg2[%c0_81, %c0_82, %c0_83] : memref<5x28x240xbf16, #tpu.memory_space<vmem>>, vector<1x28x240xbf16>
    %123 = vector.shape_cast %122 : vector<1x28x240xbf16> to vector<28x240xbf16>
    %cst_84 = arith.constant dense<0.000000e+00> : vector<55x240xf32>
    %124 = tpu.matmul %121, %123, %cst_84 {dimension_numbers = #tpu.dot_dimension_numbers<[1], [0], [0], [1], [0, 0, 1, 1], [], []>} : vector<55x28xbf16>, vector<28x240xbf16>, vector<55x240xf32> -> vector<55x240xf32>
    %125 = arith.addf %119, %124 : vector<55x240xf32>
    %126 = vector.extract_strided_slice %2 {offsets = [1, 0], sizes = [55, 28], strides = [1, 1]} : vector<56x28xf32> to vector<55x28xf32>
    %127 = arith.truncf %126 : vector<55x28xf32> to vector<55x28xbf16>
    %c1_85 = arith.constant 1 : index
    %c0_86 = arith.constant 0 : index
    %c0_87 = arith.constant 0 : index
    %128 = vector.load %arg2[%c1_85, %c0_86, %c0_87] : memref<5x28x240xbf16, #tpu.memory_space<vmem>>, vector<1x28x240xbf16>
    %129 = vector.shape_cast %128 : vector<1x28x240xbf16> to vector<28x240xbf16>
    %cst_88 = arith.constant dense<0.000000e+00> : vector<55x240xf32>
    %130 = tpu.matmul %127, %129, %cst_88 {dimension_numbers = #tpu.dot_dimension_numbers<[1], [0], [0], [1], [0, 0, 1, 1], [], []>} : vector<55x28xbf16>, vector<28x240xbf16>, vector<55x240xf32> -> vector<55x240xf32>
    %131 = arith.addf %125, %130 : vector<55x240xf32>
    %132 = vector.extract_strided_slice %5 {offsets = [1, 0], sizes = [55, 28], strides = [1, 1]} : vector<56x28xf32> to vector<55x28xf32>
    %133 = arith.truncf %132 : vector<55x28xf32> to vector<55x28xbf16>
    %c2_89 = arith.constant 2 : index
    %c0_90 = arith.constant 0 : index
    %c0_91 = arith.constant 0 : index
    %134 = vector.load %arg2[%c2_89, %c0_90, %c0_91] : memref<5x28x240xbf16, #tpu.memory_space<vmem>>, vector<1x28x240xbf16>
    %135 = vector.shape_cast %134 : vector<1x28x240xbf16> to vector<28x240xbf16>
    %cst_92 = arith.constant dense<0.000000e+00> : vector<55x240xf32>
    %136 = tpu.matmul %133, %135, %cst_92 {dimension_numbers = #tpu.dot_dimension_numbers<[1], [0], [0], [1], [0, 0, 1, 1], [], []>} : vector<55x28xbf16>, vector<28x240xbf16>, vector<55x240xf32> -> vector<55x240xf32>
    %137 = arith.addf %131, %136 : vector<55x240xf32>
    %138 = vector.extract_strided_slice %8 {offsets = [1, 0], sizes = [55, 28], strides = [1, 1]} : vector<56x28xf32> to vector<55x28xf32>
    %139 = arith.truncf %138 : vector<55x28xf32> to vector<55x28xbf16>
    %c3_93 = arith.constant 3 : index
    %c0_94 = arith.constant 0 : index
    %c0_95 = arith.constant 0 : index
    %140 = vector.load %arg2[%c3_93, %c0_94, %c0_95] : memref<5x28x240xbf16, #tpu.memory_space<vmem>>, vector<1x28x240xbf16>
    %141 = vector.shape_cast %140 : vector<1x28x240xbf16> to vector<28x240xbf16>
    %cst_96 = arith.constant dense<0.000000e+00> : vector<55x240xf32>
    %142 = tpu.matmul %139, %141, %cst_96 {dimension_numbers = #tpu.dot_dimension_numbers<[1], [0], [0], [1], [0, 0, 1, 1], [], []>} : vector<55x28xbf16>, vector<28x240xbf16>, vector<55x240xf32> -> vector<55x240xf32>
    %143 = arith.addf %137, %142 : vector<55x240xf32>
    %144 = vector.extract_strided_slice %11 {offsets = [1, 0], sizes = [55, 28], strides = [1, 1]} : vector<56x28xf32> to vector<55x28xf32>
    %145 = arith.truncf %144 : vector<55x28xf32> to vector<55x28xbf16>
    %c4_97 = arith.constant 4 : index
    %c0_98 = arith.constant 0 : index
    %c0_99 = arith.constant 0 : index
    %146 = vector.load %arg2[%c4_97, %c0_98, %c0_99] : memref<5x28x240xbf16, #tpu.memory_space<vmem>>, vector<1x28x240xbf16>
    %147 = vector.shape_cast %146 : vector<1x28x240xbf16> to vector<28x240xbf16>
    %cst_100 = arith.constant dense<0.000000e+00> : vector<55x240xf32>
    %148 = tpu.matmul %145, %147, %cst_100 {dimension_numbers = #tpu.dot_dimension_numbers<[1], [0], [0], [1], [0, 0, 1, 1], [], []>} : vector<55x28xbf16>, vector<28x240xbf16>, vector<55x240xf32> -> vector<55x240xf32>
    %149 = arith.addf %143, %148 : vector<55x240xf32>
    %150 = arith.maximumf %118, %149 : vector<55x240xf32>
    %c0_101 = arith.constant 0 : index
    %c0_102 = arith.constant 0 : index
    %151 = vector.load %arg3[%c0_101, %c0_102] : memref<1x240xf32, #tpu.memory_space<vmem>>, vector<1x240xf32>
    %152 = vector.broadcast %151 : vector<1x240xf32> to vector<55x240xf32>
    %153 = arith.addf %150, %152 : vector<55x240xf32>
    %cst_103 = arith.constant 0.000000e+00 : f32
    %154 = vector.broadcast %cst_103 : f32 to vector<55x240xf32>
    %155 = arith.maximumf %153, %154 : vector<55x240xf32>
    %156 = arith.truncf %155 : vector<55x240xf32> to vector<55x240xbf16>
    %c0_104 = arith.constant 0 : index
    %c0_105 = arith.constant 0 : index
    %c0_106 = arith.constant 0 : index
    %157 = vector.load %arg4[%c0_104, %c0_105, %c0_106] : memref<2x240x120xbf16, #tpu.memory_space<vmem>>, vector<1x240x120xbf16>
    %158 = vector.shape_cast %157 : vector<1x240x120xbf16> to vector<240x120xbf16>
    %cst_107 = arith.constant dense<0.000000e+00> : vector<55x120xf32>
    %159 = tpu.matmul %156, %158, %cst_107 {dimension_numbers = #tpu.dot_dimension_numbers<[1], [0], [0], [1], [0, 0, 1, 1], [], []>} : vector<55x240xbf16>, vector<240x120xbf16>, vector<55x120xf32> -> vector<55x120xf32>
    %c1_108 = arith.constant 1 : index
    %c0_109 = arith.constant 0 : index
    %c0_110 = arith.constant 0 : index
    %160 = vector.load %arg4[%c1_108, %c0_109, %c0_110] : memref<2x240x120xbf16, #tpu.memory_space<vmem>>, vector<1x240x120xbf16>
    %161 = vector.shape_cast %160 : vector<1x240x120xbf16> to vector<240x120xbf16>
    %cst_111 = arith.constant dense<0.000000e+00> : vector<55x120xf32>
    %162 = tpu.matmul %156, %161, %cst_111 {dimension_numbers = #tpu.dot_dimension_numbers<[1], [0], [0], [1], [0, 0, 1, 1], [], []>} : vector<55x240xbf16>, vector<240x120xbf16>, vector<55x120xf32> -> vector<55x120xf32>
    %163 = arith.maximumf %159, %162 : vector<55x120xf32>
    %cst_112 = arith.constant 0.000000e+00 : f32
    %164 = vector.broadcast %cst_112 : f32 to vector<53x160xf32>
    %165 = vector.extract_strided_slice %87 {offsets = [0, 0], sizes = [53, 120], strides = [1, 1]} : vector<55x120xf32> to vector<53x120xf32>
    %166 = arith.truncf %165 : vector<53x120xf32> to vector<53x120xbf16>
    %c0_113 = arith.constant 0 : index
    %c0_114 = arith.constant 0 : index
    %c0_115 = arith.constant 0 : index
    %167 = vector.load %arg5[%c0_113, %c0_114, %c0_115] : memref<5x120x160xbf16, #tpu.memory_space<vmem>>, vector<1x120x160xbf16>
    %168 = vector.shape_cast %167 : vector<1x120x160xbf16> to vector<120x160xbf16>
    %cst_116 = arith.constant dense<0.000000e+00> : vector<53x160xf32>
    %169 = tpu.matmul %166, %168, %cst_116 {dimension_numbers = #tpu.dot_dimension_numbers<[1], [0], [0], [1], [0, 0, 1, 1], [], []>} : vector<53x120xbf16>, vector<120x160xbf16>, vector<53x160xf32> -> vector<53x160xf32>
    %170 = arith.addf %164, %169 : vector<53x160xf32>
    %171 = vector.extract_strided_slice %163 {offsets = [0, 0], sizes = [53, 120], strides = [1, 1]} : vector<55x120xf32> to vector<53x120xf32>
    %172 = arith.truncf %171 : vector<53x120xf32> to vector<53x120xbf16>
    %c1_117 = arith.constant 1 : index
    %c0_118 = arith.constant 0 : index
    %c0_119 = arith.constant 0 : index
    %173 = vector.load %arg5[%c1_117, %c0_118, %c0_119] : memref<5x120x160xbf16, #tpu.memory_space<vmem>>, vector<1x120x160xbf16>
    %174 = vector.shape_cast %173 : vector<1x120x160xbf16> to vector<120x160xbf16>
    %cst_120 = arith.constant dense<0.000000e+00> : vector<53x160xf32>
    %175 = tpu.matmul %172, %174, %cst_120 {dimension_numbers = #tpu.dot_dimension_numbers<[1], [0], [0], [1], [0, 0, 1, 1], [], []>} : vector<53x120xbf16>, vector<120x160xbf16>, vector<53x160xf32> -> vector<53x160xf32>
    %176 = arith.addf %170, %175 : vector<53x160xf32>
    %177 = vector.extract_strided_slice %87 {offsets = [1, 0], sizes = [53, 120], strides = [1, 1]} : vector<55x120xf32> to vector<53x120xf32>
    %178 = arith.truncf %177 : vector<53x120xf32> to vector<53x120xbf16>
    %c2_121 = arith.constant 2 : index
    %c0_122 = arith.constant 0 : index
    %c0_123 = arith.constant 0 : index
    %179 = vector.load %arg5[%c2_121, %c0_122, %c0_123] : memref<5x120x160xbf16, #tpu.memory_space<vmem>>, vector<1x120x160xbf16>
    %180 = vector.shape_cast %179 : vector<1x120x160xbf16> to vector<120x160xbf16>
    %cst_124 = arith.constant dense<0.000000e+00> : vector<53x160xf32>
    %181 = tpu.matmul %178, %180, %cst_124 {dimension_numbers = #tpu.dot_dimension_numbers<[1], [0], [0], [1], [0, 0, 1, 1], [], []>} : vector<53x120xbf16>, vector<120x160xbf16>, vector<53x160xf32> -> vector<53x160xf32>
    %182 = arith.addf %176, %181 : vector<53x160xf32>
    %183 = vector.extract_strided_slice %163 {offsets = [1, 0], sizes = [53, 120], strides = [1, 1]} : vector<55x120xf32> to vector<53x120xf32>
    %184 = arith.truncf %183 : vector<53x120xf32> to vector<53x120xbf16>
    %c3_125 = arith.constant 3 : index
    %c0_126 = arith.constant 0 : index
    %c0_127 = arith.constant 0 : index
    %185 = vector.load %arg5[%c3_125, %c0_126, %c0_127] : memref<5x120x160xbf16, #tpu.memory_space<vmem>>, vector<1x120x160xbf16>
    %186 = vector.shape_cast %185 : vector<1x120x160xbf16> to vector<120x160xbf16>
    %cst_128 = arith.constant dense<0.000000e+00> : vector<53x160xf32>
    %187 = tpu.matmul %184, %186, %cst_128 {dimension_numbers = #tpu.dot_dimension_numbers<[1], [0], [0], [1], [0, 0, 1, 1], [], []>} : vector<53x120xbf16>, vector<120x160xbf16>, vector<53x160xf32> -> vector<53x160xf32>
    %188 = arith.addf %182, %187 : vector<53x160xf32>
    %189 = vector.extract_strided_slice %87 {offsets = [2, 0], sizes = [53, 120], strides = [1, 1]} : vector<55x120xf32> to vector<53x120xf32>
    %190 = arith.truncf %189 : vector<53x120xf32> to vector<53x120xbf16>
    %c4_129 = arith.constant 4 : index
    %c0_130 = arith.constant 0 : index
    %c0_131 = arith.constant 0 : index
    %191 = vector.load %arg5[%c4_129, %c0_130, %c0_131] : memref<5x120x160xbf16, #tpu.memory_space<vmem>>, vector<1x120x160xbf16>
    %192 = vector.shape_cast %191 : vector<1x120x160xbf16> to vector<120x160xbf16>
    %cst_132 = arith.constant dense<0.000000e+00> : vector<53x160xf32>
    %193 = tpu.matmul %190, %192, %cst_132 {dimension_numbers = #tpu.dot_dimension_numbers<[1], [0], [0], [1], [0, 0, 1, 1], [], []>} : vector<53x120xbf16>, vector<120x160xbf16>, vector<53x160xf32> -> vector<53x160xf32>
    %194 = arith.addf %188, %193 : vector<53x160xf32>
    %cst_133 = arith.constant 0.000000e+00 : f32
    %195 = vector.broadcast %cst_133 : f32 to vector<53x160xf32>
    %196 = vector.extract_strided_slice %163 {offsets = [0, 0], sizes = [53, 120], strides = [1, 1]} : vector<55x120xf32> to vector<53x120xf32>
    %197 = arith.truncf %196 : vector<53x120xf32> to vector<53x120xbf16>
    %c0_134 = arith.constant 0 : index
    %c0_135 = arith.constant 0 : index
    %c0_136 = arith.constant 0 : index
    %198 = vector.load %arg5[%c0_134, %c0_135, %c0_136] : memref<5x120x160xbf16, #tpu.memory_space<vmem>>, vector<1x120x160xbf16>
    %199 = vector.shape_cast %198 : vector<1x120x160xbf16> to vector<120x160xbf16>
    %cst_137 = arith.constant dense<0.000000e+00> : vector<53x160xf32>
    %200 = tpu.matmul %197, %199, %cst_137 {dimension_numbers = #tpu.dot_dimension_numbers<[1], [0], [0], [1], [0, 0, 1, 1], [], []>} : vector<53x120xbf16>, vector<120x160xbf16>, vector<53x160xf32> -> vector<53x160xf32>
    %201 = arith.addf %195, %200 : vector<53x160xf32>
    %202 = vector.extract_strided_slice %87 {offsets = [1, 0], sizes = [53, 120], strides = [1, 1]} : vector<55x120xf32> to vector<53x120xf32>
    %203 = arith.truncf %202 : vector<53x120xf32> to vector<53x120xbf16>
    %c1_138 = arith.constant 1 : index
    %c0_139 = arith.constant 0 : index
    %c0_140 = arith.constant 0 : index
    %204 = vector.load %arg5[%c1_138, %c0_139, %c0_140] : memref<5x120x160xbf16, #tpu.memory_space<vmem>>, vector<1x120x160xbf16>
    %205 = vector.shape_cast %204 : vector<1x120x160xbf16> to vector<120x160xbf16>
    %cst_141 = arith.constant dense<0.000000e+00> : vector<53x160xf32>
    %206 = tpu.matmul %203, %205, %cst_141 {dimension_numbers = #tpu.dot_dimension_numbers<[1], [0], [0], [1], [0, 0, 1, 1], [], []>} : vector<53x120xbf16>, vector<120x160xbf16>, vector<53x160xf32> -> vector<53x160xf32>
    %207 = arith.addf %201, %206 : vector<53x160xf32>
    %208 = vector.extract_strided_slice %163 {offsets = [1, 0], sizes = [53, 120], strides = [1, 1]} : vector<55x120xf32> to vector<53x120xf32>
    %209 = arith.truncf %208 : vector<53x120xf32> to vector<53x120xbf16>
    %c2_142 = arith.constant 2 : index
    %c0_143 = arith.constant 0 : index
    %c0_144 = arith.constant 0 : index
    %210 = vector.load %arg5[%c2_142, %c0_143, %c0_144] : memref<5x120x160xbf16, #tpu.memory_space<vmem>>, vector<1x120x160xbf16>
    %211 = vector.shape_cast %210 : vector<1x120x160xbf16> to vector<120x160xbf16>
    %cst_145 = arith.constant dense<0.000000e+00> : vector<53x160xf32>
    %212 = tpu.matmul %209, %211, %cst_145 {dimension_numbers = #tpu.dot_dimension_numbers<[1], [0], [0], [1], [0, 0, 1, 1], [], []>} : vector<53x120xbf16>, vector<120x160xbf16>, vector<53x160xf32> -> vector<53x160xf32>
    %213 = arith.addf %207, %212 : vector<53x160xf32>
    %214 = vector.extract_strided_slice %87 {offsets = [2, 0], sizes = [53, 120], strides = [1, 1]} : vector<55x120xf32> to vector<53x120xf32>
    %215 = arith.truncf %214 : vector<53x120xf32> to vector<53x120xbf16>
    %c3_146 = arith.constant 3 : index
    %c0_147 = arith.constant 0 : index
    %c0_148 = arith.constant 0 : index
    %216 = vector.load %arg5[%c3_146, %c0_147, %c0_148] : memref<5x120x160xbf16, #tpu.memory_space<vmem>>, vector<1x120x160xbf16>
    %217 = vector.shape_cast %216 : vector<1x120x160xbf16> to vector<120x160xbf16>
    %cst_149 = arith.constant dense<0.000000e+00> : vector<53x160xf32>
    %218 = tpu.matmul %215, %217, %cst_149 {dimension_numbers = #tpu.dot_dimension_numbers<[1], [0], [0], [1], [0, 0, 1, 1], [], []>} : vector<53x120xbf16>, vector<120x160xbf16>, vector<53x160xf32> -> vector<53x160xf32>
    %219 = arith.addf %213, %218 : vector<53x160xf32>
    %220 = vector.extract_strided_slice %163 {offsets = [2, 0], sizes = [53, 120], strides = [1, 1]} : vector<55x120xf32> to vector<53x120xf32>
    %221 = arith.truncf %220 : vector<53x120xf32> to vector<53x120xbf16>
    %c4_150 = arith.constant 4 : index
    %c0_151 = arith.constant 0 : index
    %c0_152 = arith.constant 0 : index
    %222 = vector.load %arg5[%c4_150, %c0_151, %c0_152] : memref<5x120x160xbf16, #tpu.memory_space<vmem>>, vector<1x120x160xbf16>
    %223 = vector.shape_cast %222 : vector<1x120x160xbf16> to vector<120x160xbf16>
    %cst_153 = arith.constant dense<0.000000e+00> : vector<53x160xf32>
    %224 = tpu.matmul %221, %223, %cst_153 {dimension_numbers = #tpu.dot_dimension_numbers<[1], [0], [0], [1], [0, 0, 1, 1], [], []>} : vector<53x120xbf16>, vector<120x160xbf16>, vector<53x160xf32> -> vector<53x160xf32>
    %225 = arith.addf %219, %224 : vector<53x160xf32>
    %226 = arith.maximumf %194, %225 : vector<53x160xf32>
    %c0_154 = arith.constant 0 : index
    %c0_155 = arith.constant 0 : index
    %227 = vector.load %arg6[%c0_154, %c0_155] : memref<1x160xf32, #tpu.memory_space<vmem>>, vector<1x160xf32>
    %228 = vector.broadcast %227 : vector<1x160xf32> to vector<53x160xf32>
    %229 = arith.addf %226, %228 : vector<53x160xf32>
    %cst_156 = arith.constant 0.000000e+00 : f32
    %230 = vector.broadcast %cst_156 : f32 to vector<53x160xf32>
    %231 = arith.maximumf %229, %230 : vector<53x160xf32>
    %232 = arith.truncf %231 : vector<53x160xf32> to vector<53x160xbf16>
    %c0_157 = arith.constant 0 : index
    %c0_158 = arith.constant 0 : index
    %c0_159 = arith.constant 0 : index
    %233 = vector.load %arg7[%c0_157, %c0_158, %c0_159] : memref<2x160x80xbf16, #tpu.memory_space<vmem>>, vector<1x160x80xbf16>
    %234 = vector.shape_cast %233 : vector<1x160x80xbf16> to vector<160x80xbf16>
    %cst_160 = arith.constant dense<0.000000e+00> : vector<53x80xf32>
    %235 = tpu.matmul %232, %234, %cst_160 {dimension_numbers = #tpu.dot_dimension_numbers<[1], [0], [0], [1], [0, 0, 1, 1], [], []>} : vector<53x160xbf16>, vector<160x80xbf16>, vector<53x80xf32> -> vector<53x80xf32>
    %c1_161 = arith.constant 1 : index
    %c0_162 = arith.constant 0 : index
    %c0_163 = arith.constant 0 : index
    %236 = vector.load %arg7[%c1_161, %c0_162, %c0_163] : memref<2x160x80xbf16, #tpu.memory_space<vmem>>, vector<1x160x80xbf16>
    %237 = vector.shape_cast %236 : vector<1x160x80xbf16> to vector<160x80xbf16>
    %cst_164 = arith.constant dense<0.000000e+00> : vector<53x80xf32>
    %238 = tpu.matmul %232, %237, %cst_164 {dimension_numbers = #tpu.dot_dimension_numbers<[1], [0], [0], [1], [0, 0, 1, 1], [], []>} : vector<53x160xbf16>, vector<160x80xbf16>, vector<53x80xf32> -> vector<53x80xf32>
    %239 = arith.maximumf %235, %238 : vector<53x80xf32>
    %cst_165 = arith.constant 0.000000e+00 : f32
    %240 = vector.broadcast %cst_165 : f32 to vector<50x50xf32>
    %241 = vector.extract_strided_slice %239 {offsets = [0, 0], sizes = [50, 80], strides = [1, 1]} : vector<53x80xf32> to vector<50x80xf32>
    %242 = arith.truncf %241 : vector<50x80xf32> to vector<50x80xbf16>
    %c0_166 = arith.constant 0 : index
    %c0_167 = arith.constant 0 : index
    %c0_168 = arith.constant 0 : index
    %243 = vector.load %arg8[%c0_166, %c0_167, %c0_168] : memref<4x80x50xbf16, #tpu.memory_space<vmem>>, vector<1x80x50xbf16>
    %244 = vector.shape_cast %243 : vector<1x80x50xbf16> to vector<80x50xbf16>
    %cst_169 = arith.constant dense<0.000000e+00> : vector<50x50xf32>
    %245 = tpu.matmul %242, %244, %cst_169 {dimension_numbers = #tpu.dot_dimension_numbers<[1], [0], [0], [1], [0, 0, 1, 1], [], []>} : vector<50x80xbf16>, vector<80x50xbf16>, vector<50x50xf32> -> vector<50x50xf32>
    %246 = arith.addf %240, %245 : vector<50x50xf32>
    %247 = vector.extract_strided_slice %239 {offsets = [1, 0], sizes = [50, 80], strides = [1, 1]} : vector<53x80xf32> to vector<50x80xf32>
    %248 = arith.truncf %247 : vector<50x80xf32> to vector<50x80xbf16>
    %c1_170 = arith.constant 1 : index
    %c0_171 = arith.constant 0 : index
    %c0_172 = arith.constant 0 : index
    %249 = vector.load %arg8[%c1_170, %c0_171, %c0_172] : memref<4x80x50xbf16, #tpu.memory_space<vmem>>, vector<1x80x50xbf16>
    %250 = vector.shape_cast %249 : vector<1x80x50xbf16> to vector<80x50xbf16>
    %cst_173 = arith.constant dense<0.000000e+00> : vector<50x50xf32>
    %251 = tpu.matmul %248, %250, %cst_173 {dimension_numbers = #tpu.dot_dimension_numbers<[1], [0], [0], [1], [0, 0, 1, 1], [], []>} : vector<50x80xbf16>, vector<80x50xbf16>, vector<50x50xf32> -> vector<50x50xf32>
    %252 = arith.addf %246, %251 : vector<50x50xf32>
    %253 = vector.extract_strided_slice %239 {offsets = [2, 0], sizes = [50, 80], strides = [1, 1]} : vector<53x80xf32> to vector<50x80xf32>
    %254 = arith.truncf %253 : vector<50x80xf32> to vector<50x80xbf16>
    %c2_174 = arith.constant 2 : index
    %c0_175 = arith.constant 0 : index
    %c0_176 = arith.constant 0 : index
    %255 = vector.load %arg8[%c2_174, %c0_175, %c0_176] : memref<4x80x50xbf16, #tpu.memory_space<vmem>>, vector<1x80x50xbf16>
    %256 = vector.shape_cast %255 : vector<1x80x50xbf16> to vector<80x50xbf16>
    %cst_177 = arith.constant dense<0.000000e+00> : vector<50x50xf32>
    %257 = tpu.matmul %254, %256, %cst_177 {dimension_numbers = #tpu.dot_dimension_numbers<[1], [0], [0], [1], [0, 0, 1, 1], [], []>} : vector<50x80xbf16>, vector<80x50xbf16>, vector<50x50xf32> -> vector<50x50xf32>
    %258 = arith.addf %252, %257 : vector<50x50xf32>
    %259 = vector.extract_strided_slice %239 {offsets = [3, 0], sizes = [50, 80], strides = [1, 1]} : vector<53x80xf32> to vector<50x80xf32>
    %260 = arith.truncf %259 : vector<50x80xf32> to vector<50x80xbf16>
    %c3_178 = arith.constant 3 : index
    %c0_179 = arith.constant 0 : index
    %c0_180 = arith.constant 0 : index
    %261 = vector.load %arg8[%c3_178, %c0_179, %c0_180] : memref<4x80x50xbf16, #tpu.memory_space<vmem>>, vector<1x80x50xbf16>
    %262 = vector.shape_cast %261 : vector<1x80x50xbf16> to vector<80x50xbf16>
    %cst_181 = arith.constant dense<0.000000e+00> : vector<50x50xf32>
    %263 = tpu.matmul %260, %262, %cst_181 {dimension_numbers = #tpu.dot_dimension_numbers<[1], [0], [0], [1], [0, 0, 1, 1], [], []>} : vector<50x80xbf16>, vector<80x50xbf16>, vector<50x50xf32> -> vector<50x50xf32>
    %264 = arith.addf %258, %263 : vector<50x50xf32>
    %c0_182 = arith.constant 0 : index
    %c0_183 = arith.constant 0 : index
    %265 = vector.load %arg9[%c0_182, %c0_183] : memref<1x50xf32, #tpu.memory_space<vmem>>, vector<1x50xf32>
    %266 = vector.broadcast %265 : vector<1x50xf32> to vector<50x50xf32>
    %267 = arith.addf %264, %266 : vector<50x50xf32>
    %268 = arith.truncf %267 : vector<50x50xf32> to vector<50x50xbf16>
    %c0_184 = arith.constant 0 : index
    %c0_185 = arith.constant 0 : index
    %269 = vector.load %arg10[%c0_184, %c0_185] : memref<50x128xbf16, #tpu.memory_space<vmem>>, vector<50x128xbf16>
    %cst_186 = arith.constant dense<0.000000e+00> : vector<50x128xf32>
    %270 = tpu.matmul %268, %269, %cst_186 {dimension_numbers = #tpu.dot_dimension_numbers<[1], [0], [0], [1], [0, 0, 1, 1], [], []>} : vector<50x50xbf16>, vector<50x128xbf16>, vector<50x128xf32> -> vector<50x128xf32>
    %c0_187 = arith.constant 0 : index
    %c0_188 = arith.constant 0 : index
    %271 = vector.load %arg11[%c0_187, %c0_188] : memref<1x128xf32, #tpu.memory_space<vmem>>, vector<1x128xf32>
    %272 = vector.broadcast %271 : vector<1x128xf32> to vector<50x128xf32>
    %273 = arith.addf %270, %272 : vector<50x128xf32>
    %c0_189 = arith.constant 0 : index
    %c0_190 = arith.constant 0 : index
    %c0_191 = arith.constant 0 : index
    %274 = vector.load %arg12[%c0_189, %c0_190, %c0_191] : memref<1x50x128xf32, #tpu.memory_space<vmem>>, vector<1x50x128xf32>
    %275 = vector.shape_cast %274 : vector<1x50x128xf32> to vector<50x128xf32>
    %276 = vector.shape_cast %273 : vector<50x128xf32> to vector<1x50x128xf32>
    tpu.vector_store %arg12[%c0_189, %c0_190, %c0_191], %276 {strides = array<i32>} : memref<1x50x128xf32, #tpu.memory_space<vmem>>, vector<1x50x128xf32>,
    return
  }
  func.func @transform_0(%arg0: i32) -> (i32, i32, i32) {
    %c0_i32 = arith.constant 0 : i32
    %c0_i32_0 = arith.constant 0 : i32
    %c0_i32_1 = arith.constant 0 : i32
    return %c0_i32, %arg0, %c0_i32_0 : i32, i32, i32
  }
  func.func @transform_1(%arg0: i32) -> (i32, i32, i32) {
    %c0_i32 = arith.constant 0 : i32
    %c0_i32_0 = arith.constant 0 : i32
    %c0_i32_1 = arith.constant 0 : i32
    %c0_i32_2 = arith.constant 0 : i32
    return %c0_i32, %c0_i32_0, %c0_i32_1 : i32, i32, i32
  }
  func.func @transform_2(%arg0: i32) -> (i32, i32) {
    %c0_i32 = arith.constant 0 : i32
    %c0_i32_0 = arith.constant 0 : i32
    %c0_i32_1 = arith.constant 0 : i32
    return %c0_i32, %c0_i32_0 : i32, i32
  }
  func.func @transform_3(%arg0: i32) -> (i32, i32, i32) {
    %c0_i32 = arith.constant 0 : i32
    %c0_i32_0 = arith.constant 0 : i32
    %c0_i32_1 = arith.constant 0 : i32
    %c0_i32_2 = arith.constant 0 : i32
    return %c0_i32, %c0_i32_0, %c0_i32_1 : i32, i32, i32
  }
  func.func @transform_4(%arg0: i32) -> (i32, i32, i32) {
    %c0_i32 = arith.constant 0 : i32
    %c0_i32_0 = arith.constant 0 : i32
    %c0_i32_1 = arith.constant 0 : i32
    %c0_i32_2 = arith.constant 0 : i32
    return %c0_i32, %c0_i32_0, %c0_i32_1 : i32, i32, i32
  }
  func.func @transform_5(%arg0: i32) -> (i32, i32) {
    %c0_i32 = arith.constant 0 : i32
    %c0_i32_0 = arith.constant 0 : i32
    %c0_i32_1 = arith.constant 0 : i32
    return %c0_i32, %c0_i32_0 : i32, i32
  }
  func.func @transform_6(%arg0: i32) -> (i32, i32, i32) {
    %c0_i32 = arith.constant 0 : i32
    %c0_i32_0 = arith.constant 0 : i32
    %c0_i32_1 = arith.constant 0 : i32
    %c0_i32_2 = arith.constant 0 : i32
    return %c0_i32, %c0_i32_0, %c0_i32_1 : i32, i32, i32
  }
  func.func @transform_7(%arg0: i32) -> (i32, i32, i32) {
    %c0_i32 = arith.constant 0 : i32
    %c0_i32_0 = arith.constant 0 : i32
    %c0_i32_1 = arith.constant 0 : i32
    %c0_i32_2 = arith.constant 0 : i32
    return %c0_i32, %c0_i32_0, %c0_i32_1 : i32, i32, i32
  }
  func.func @transform_8(%arg0: i32) -> (i32, i32) {
    %c0_i32 = arith.constant 0 : i32
    %c0_i32_0 = arith.constant 0 : i32
    %c0_i32_1 = arith.constant 0 : i32
    return %c0_i32, %c0_i32_0 : i32, i32
  }
  func.func @transform_9(%arg0: i32) -> (i32, i32) {
    %c0_i32 = arith.constant 0 : i32
    %c0_i32_0 = arith.constant 0 : i32
    %c0_i32_1 = arith.constant 0 : i32
    return %c0_i32, %c0_i32_0 : i32, i32
  }
  func.func @transform_10(%arg0: i32) -> (i32, i32) {
    %c0_i32 = arith.constant 0 : i32
    %c0_i32_0 = arith.constant 0 : i32
    %c0_i32_1 = arith.constant 0 : i32
    return %c0_i32, %c0_i32_0 : i32, i32
  }
  func.func @transform_11(%arg0: i32) -> (i32, i32, i32) {
    %c0_i32 = arith.constant 0 : i32
    %c0_i32_0 = arith.constant 0 : i32
    %c0_i32_1 = arith.constant 0 : i32
    return %arg0, %c0_i32, %c0_i32_0 : i32, i32, i32
  }
}

</mosaic_0001>

<bundles_post_ra>
// kernel: _lambda_.1
= control target key start
LH: loop header
LB: loop body
LE: loop exit
PB: predicated region body
PF: predicated region fallthrough
CT: control target
= control target key end

     0   :  { %s7217_s17 = smov 0   ;;  %s7219_s18 = smov 0   ;;  %s9095_s0 = inlined_call_operand.vmem [shape: bf16[4,168,28], index: 0, kind: input, shape index: {}]   ;;  %s9096_s1 = inlined_call_operand.vmem [shape: bf16[5,28,240], index: 1, kind: input, shape index: {}]   ;;  %s9097_s2 = inlined_call_operand.vmem [shape: f32[1,240], index: 2, kind: input, shape index: {}]   ;;  %s9098_s3 = inlined_call_operand.vmem [shape: bf16[2,240,120], index: 3, kind: input, shape index: {}]   ;;  %s9099_s4 = inlined_call_operand.vmem [shape: bf16[5,120,160], index: 4, kind: input, shape index: {}]   ;;  %s9100_s5 = inlined_call_operand.vmem [shape: f32[1,160], index: 5, kind: input, shape index: {}]   ;;  %s9101_s6 = inlined_call_operand.vmem [shape: bf16[2,160,80], index: 6, kind: input, shape index: {}]   ;;  %s9102_s7 = inlined_call_operand.vmem [shape: bf16[4,80,50], index: 7, kind: input, shape index: {}]   ;;  %s9103_s8 = inlined_call_operand.vmem [shape: f32[1,50], index: 8, kind: input, shape index: {}]   ;;  %s9104_s9 = inlined_call_operand.vmem [shape: bf16[50,128], index: 9, kind: input, shape index: {}]   ;;  %s9105_s10 = inlined_call_operand.vmem [shape: f32[1,128], index: 10, kind: input, shape index: {}]   ;;  %s9106_s11 = inlined_call_operand.vmem [shape: f32[3,50,128], index: 11, kind: output, shape index: {}]  }
   0x1   :  { %s7221_s19 = smov 0  }
   0x2 LB: > { %s5751_s20 = sadd.s32 4294967295, %s7154_s19   ;;  %s7234_s21 = sadd.s32 1, %s7154_s19   ;;  %s7154_s19 = sphi %s7221_s19, %s9177_s19   ;;  %s7150_s18 = sphi %s7219_s18, %s9176_s18   ;;  %s7146_s17 = sphi %s7217_s17, %s9175_s17  }
   0x3   : > { %s25_s22 = ssub.s32 %s7154_s19, %s7234_s21  ;;  %s28_s23 = sadd.s32 1, %s7150_s18 }
   0x4   : > { %p26_p0 = scmp.eq.s32.totalorder %s25_s22, 0  ;;  %p35_p1 = scmp.ne.s32.totalorder %s7150_s18, %s7146_s17 }
   0x5   : > { %p36_p2 = scmp.eq.s32.totalorder %s7154_s19, 0  ;;  %p5754_p4 = scmp.ge.s32.totalorder %s7154_s19, 3 }
   0x6   : > { %s7243_s24 = scalar_select %p26_p0, %s7150_s18, %s28_s23  }
   0x7   : > { %p37_p3 = por %p36_p2, %p35_p1  ;;  %327 = sbr.rel (%p5754_p4) target bundleno = 27 (0x1b), region = 56 }
   0xe   : > { %330 = sbr.rel (!%p37_p3) target bundleno = 27 (0x1b), region = 60  ;;  %s332_s25 = sand.u32 (%p37_p3), 1, %s7150_s18  }
   0xf   : > { %s6323_s26 = smul.u32 (%p37_p3), 28, %s7154_s19 }
  0x10   : > { %s6851_s27 = smul.u32 (%p37_p3), 112, %s332_s25 }
  0x11   : > { %s7251_s30 = scalar_lea.vmem (%p37_p3), %s9095_s0, %s6323_s26 }
  0x12   : > { %v353_v0 = vld [vmem:[%s7251_s30] sm:$0xff] (%p37_p3)   ;;  %v357_v1 = vld [vmem:[%s7251_s30 + $0x8] sm:$0xff] (%p37_p3)   ;;  %v361_v2 = vld [vmem:[%s7251_s30 + $0x10] sm:$0xff] (%p37_p3)   ;;  %s334_s12 = scalar_lea.vmem (%p37_p3), [#allocation2], %s6851_s27 }
  0x13   : > { %354 = vst [vmem:[%s334_s12] sm:$0xff] (%p37_p3), %v353_v0   ;;  %358 = vst [vmem:[%s334_s12 + $0x8] sm:$0xff] (%p37_p3), %v357_v1   ;;  %v365_v3 = vld [vmem:[%s7251_s30 + $0x18] sm:$0xf] (%p37_p3)  ;;  %v371_v5 = vld [vmem:[%s7251_s30 + $0x5c] sm:$0xff] (%p37_p3)  }
  0x14   : > { %362 = vst [vmem:[%s334_s12 + $0x10] sm:$0xff] (%p37_p3), %v361_v2   ;;  %v367_v4 = vld [vmem:[%s7251_s30 + $0x54] sm:$0xff] (%p37_p3)   ;;  %366 = vst [vmem:[%s334_s12 + $0x18] sm:$0xf] (%p37_p3), %v365_v3  ;;  %v375_v6 = vld [vmem:[%s7251_s30 + $0x64] sm:$0xff] (%p37_p3)  }
  0x15   : > { %368 = vst [vmem:[%s334_s12 + $0x1c] sm:$0xff] %v367_v4   ;;  %372 = vst [vmem:[%s334_s12 + $0x24] sm:$0xff] %v371_v5   ;;  %v379_v7 = vld [vmem:[%s7251_s30 + $0x6c] sm:$0xf]  ;;  %v385_v9 = vld [vmem:[%s7251_s30 + $0xb0] sm:$0xff]  }
  0x16   : > { %v381_v8 = vld [vmem:[%s7251_s30 + $0xa8] sm:$0xff]   ;;  %376 = vst [vmem:[%s334_s12 + $0x2c] sm:$0xff] %v375_v6   ;;  %380 = vst [vmem:[%s334_s12 + $0x34] sm:$0xf] %v379_v7  ;;  %v389_v10 = vld [vmem:[%s7251_s30 + $0xb8] sm:$0xff]  }
  0x17   : > { %382 = vst [vmem:[%s334_s12 + $0x38] sm:$0xff] %v381_v8   ;;  %v393_v11 = vld [vmem:[%s7251_s30 + $0xc0] sm:$0xf]  ;;  %386 = vst [vmem:[%s334_s12 + $0x40] sm:$0xff] %v385_v9   ;;  %v399_v13 = vld [vmem:[%s7251_s30 + $0x104] sm:$0xff]  }
  0x18   : > { %390 = vst [vmem:[%s334_s12 + $0x48] sm:$0xff] %v389_v10   ;;  %394 = vst [vmem:[%s334_s12 + $0x50] sm:$0xf] %v393_v11  ;;  %v395_v12 = vld [vmem:[%s7251_s30 + $0xfc] sm:$0xff]   ;;  %v403_v14 = vld [vmem:[%s7251_s30 + $0x10c] sm:$0xff]  }
  0x19   : > { %396 = vst [vmem:[%s334_s12 + $0x54] sm:$0xff] %v395_v12   ;;  %400 = vst [vmem:[%s334_s12 + $0x5c] sm:$0xff] %v399_v13   ;;  %v407_v15 = vld [vmem:[%s7251_s30 + $0x114] sm:$0xf] }
  0x1a   : > { %404 = vst [vmem:[%s334_s12 + $0x64] sm:$0xff] %v403_v14   ;;  %408 = vst [vmem:[%s334_s12 + $0x6c] sm:$0xf] %v407_v15 }
  0x1b PF: > { %p5756_p5 = scmp.ge.s32.totalorder %s7154_s19, 1  ;;  %p486_p6 = scmp.lt.s32.totalorder %s7154_s19, 4 }
  0x1d   : > { %p487_p7 = pnand %p5756_p5, %p486_p6 }
  0x1f   : > { %490 = sbr.rel (%p487_p7) target bundleno = 2133 (0x855), region = 101 }
  0x26   : > { %v6879_v16 = vld [vmem:[%s9096_s1 + $0x24] ss:$8 sps:$4 sm:$0xff]   ;;  %vm646_vm0 = vcmask 1045504   ;;  %v9109_v18 = vmov 0   ;;  %s493_s22 = sand.u32 1, %s7146_s17   ;;  %vm633_vm1 = vcmask 228352  }
  0x27   : > { %v6881_v17 = vld [vmem:[%s9096_s1 + $0x4] ss:$8 sps:$4 sm:$0xff]   ;;  %685 = vmatprep.mubr.bf16.mxu1 %v9109_v18  ;;  %792 = vmatprep.mubr.bf16.mxu0 %v9109_v18  ;;  %v6883_v19 = vld [vmem:[%s9096_s1 + $0x20] ss:$8 sps:$4 sm:$0xff]   ;;  %s6852_s28 = smul.u32 112, %s493_s22  ;;  %vm1863_vm3 = vcmask 916480  }
  0x28   : > { %653 = vmatprep.subr.bf16.mxu1 %v6879_v16  ;;  %v7286_v20 = vld [vmem:[%s9096_s1] ss:$8 sps:$4 sm:$0xff]   ;;  %760 = vmatprep.subr.bf16.mxu0 %v6881_v17  ;;  %v6885_v21 = vld [vmem:[%s9096_s1 + $0x34] ss:$8 sps:$4 sm:$0x3f]   ;;  %vm3328_vm4 = vcmask 1043456  }
  0x29   : > { %654 = vmatpush1.bf16.msra.mxu1 %v6883_v19  ;;  %761 = vmatpush1.bf16.msra.mxu0 %v7286_v20  ;;  %v7295_v22 = vld [vmem:[%s9096_s1 + $0x14] ss:$8 sps:$4 sm:$0x3f]   ;;  %v6889_v23 = vld [vmem:[%s9096_s1 + $0x30] ss:$8 sps:$4 sm:$0x3f]  }
  0x2a   : > { %5795 = vmatprep.subr.msk.bf16.mxu1 %vm646_vm0, %v6885_v21  ;;  %v6890_v24 = vld [vmem:[%s9096_s1 + $0x10] ss:$8 sps:$4 sm:$0x3f]   ;;  %5804 = vmatprep.subr.msk.bf16.mxu0 %vm646_vm0, %v7295_v22  ;;  %s7306_s22 = scalar_lea.vmem [#allocation2], %s6852_s28  ;;  %v7312_v26 = vsel %vm646_vm0, %v6889_v23, 0  ;;  %vm3315_vm5 = vcmask 982016  }
  0x2b   : > { %v7309_v25 = vld [vmem:[%s7306_s22 + $0x1c] sm:$0xff]   ;;  %v7315_v27 = vsel %vm646_vm0, %v6890_v24, 0  ;;  %v6894_v30 = vld [vmem:[%s7306_s22 + $0x8] sm:$0xff]   ;;  %v6896_v42 = vld [vmem:[%s7306_s22 + $0x10] sm:$0xff]   ;;  %vm1096_vm2 = vsmask.f32 7424 }
  0x2c   : > { %v6892_v28 = vld [vmem:[%s7306_s22] sm:$0xff]   ;;  %v1103_v31 = vshll.u32 %v6894_v30, 16  ;;  %v1107_v43 = vshrl.u32 %v6894_v30, 16  ;;  %v1110_v47 = vshll.u32 %v6896_v42, 16  ;;  %v7373_v48 = vld [vmem:[%s7306_s22 + $0x2c] sm:$0xff]   ;;  %v1114_v52 = vshrl.u32 %v6896_v42, 16 }
  0x2d   : > { %656 = vmatpush1.bf16.msra.mxu1 %v7312_v26  ;;  %763 = vmatpush1.bf16.msra.mxu0 %v7315_v27  ;;  %v1099_v29 = vshll.u32 %v6892_v28, 16  ;;  %v1097_v32 = vshrl.u32 %v6892_v28, 16  ;;  %v7327_v34 = vld [vmem:[%s7306_s22 + $0x24] sm:$0xff]   ;;  %v7376_v50 = vld [vmem:[%s7306_s22 + $0x18] ss:$0 sps:$4 sm:$0xff]   ;;  %v1557_v60 = vshrl.u32 %v7309_v25, 16 }
  0x2e   : > { %1245 = vmatprep.subr.bf16.mxu1 %v6879_v16  ;;  %v7333_v35 = vld [vmem:[%s9096_s1 + $0x44] ss:$8 sps:$4 sm:$0xff]   ;;  %v7338_v36 = vld [vmem:[%s9096_s1 + $0x40] ss:$8 sps:$4 sm:$0xff]   ;;  %v1105_v38 = vrot.slane %v1103_v31, 1  ;;  %v1112_v49 = vrot.slane %v1110_v47, 1 }
  0x2f   : > { %v1101_v33 = vrot.slane %v1099_v29, 1  ;;  %v7343_v37 = vld [vmem:[%s9096_s1 + $0x54] ss:$8 sps:$4 sm:$0x3f]   ;;  %876 = vmatprep.subr.bf16.mxu0 %v7333_v35  ;;  %v7365_v44 = vld [vmem:[%s9096_s1 + $0x64] ss:$8 sps:$4 sm:$0xff]  }
  0x30   : > { %5796 = vmatmul.mubr.msk.bf16.vlgmr.msra.gmra.mrb[0].mxu1 %vm633_vm1, %v7309_v25  ;;  %5805 = vmatmul.mubr.msk.bf16.vlgmr.msra.gmra.mrb[0].mxu0 %vm633_vm1, %v6892_v28  ;;  %v6904_v39 = vld [vmem:[%s9096_s1 + $0x50] ss:$8 sps:$4 sm:$0x3f]   ;;  %v1109_v46 = vor.u32 %v1107_v43, %v1105_v38  ;;  %v1117_v53 = vshll.u32 %v7376_v50, 16  ;;  %v1116_v55 = vor.u32 %v1114_v52, %v1112_v49  ;;  %v7391_v56 = vld [vmem:[%s7306_s22 + $0x34] ss:$0 sps:$4 sm:$0xff]  }
  0x31   : > { %1246 = vmatpush1.bf16.msra.mxu1 %v6883_v19  ;;  %695 = vmatprep.mubr.bf16.mxu1 %v9109_v18  ;;  %v1102_v40 = vor.u32 %v1101_v33, %v1097_v32  ;;  %v7354_v41 = vsel %vm646_vm0, %v6904_v39, 0  ;;  %v6914_v54 = vld [vmem:[%s9096_s1 + $0x70] ss:$8 sps:$4 sm:$0x3f]   ;;  %v1559_v61 = vshll.u32 %v7309_v25, 16  ;;  %v1563_v62 = vshll.u32 %v7327_v34, 16 }
  0x32   : > { %802 = vmatprep.mubr.bf16.mxu0 %v9109_v18  ;;  %5856 = vmatprep.subr.msk.bf16.mxu1 %vm646_vm0, %v6885_v21  ;;  %v7379_v51 = vsel %vm1096_vm2, %v1109_v46, %v1112_v49  ;;  %v7393_v57 = vrot.slane %v1117_v53, 1  ;;  %v7396_v58 = vsel %vm646_vm0, %v6914_v54, 0  ;;  %v6905_v63 = vld [vmem:[%s7306_s22 + $0x38] sm:$0xff]   ;;  %v1567_v6 = vshrl.u32 %v7327_v34, 16  ;;  %v6906_v8 = vld [vmem:[%s7306_s22 + $0x40] sm:$0xff]   ;;  %v6907_v15 = vld [vmem:[%s7306_s22 + $0x48] sm:$0xff]  }
  0x33   : > { %877 = vmatpush1.bf16.msra.mxu0 %v7338_v36  ;;  %v7369_v45 = vsel %vm1096_vm2, %v1102_v40, %v1105_v38  ;;  %v1561_v0 = vrot.slane %v1559_v61, 1  ;;  %v1565_v1 = vrot.slane %v1563_v62, 1  ;;  %v7415_v2 = vld [vmem:[%s9096_s1 + $0x60] ss:$8 sps:$4 sm:$0xff]   ;;  %v1570_v7 = vshll.u32 %v7373_v48, 16  ;;  %v7633_v39 = vld [vmem:[%s9098_s3 + $0x10] sm:$0xff]  }
  0x34   : > { %5821 = vmatprep.subr.msk.bf16.mxu0 %vm646_vm0, %v7343_v37  ;;  %v7400_v59 = vsel %vm1096_vm2, %v1116_v55, %v7393_v57  ;;  %v7420_v4 = vld [vmem:[%s9096_s1 + $0x74] ss:$8 sps:$4 sm:$0x3f]   ;;  %v7441_v11 = vld [vmem:[%s9096_s1 + $0x84] ss:$8 sps:$4 sm:$0xff]   ;;  %v1574_v13 = vshrl.u32 %v7373_v48, 16 }
  0x35   : > { %1248 = vmatpush1.bf16.msra.mxu1 %v7312_v26  ;;  %v1562_v3 = vor.u32 %v1561_v0, %v1557_v60  ;;  %v1569_v9 = vor.u32 %v1567_v6, %v1565_v1  ;;  %v1572_v10 = vrot.slane %v1570_v7, 1  ;;  %v1577_v14 = vshll.u32 %v7391_v56, 16  ;;  %v6924_v21 = vld [vmem:[%s9096_s1 + $0x90] ss:$8 sps:$4 sm:$0x3f]   ;;  %v7624_v38 = vld [vmem:[%s9098_s3 + $0x80] sm:$0xff]  }
  0x36   : > { %1316 = vmatprep.subr.bf16.mxu1 %v6881_v17  ;;  %v7485_v23 = vld [vmem:[%s9096_s1 + $0x80] ss:$8 sps:$4 sm:$0xff]   ;;  %v7490_v24 = vld [vmem:[%s9096_s1 + $0x94] ss:$8 sps:$4 sm:$0x3f]   ;;  %v7493_v28 = vsel %vm646_vm0, %v6924_v21, 0 }
  0x37   : > { %879 = vmatpush1.bf16.msra.mxu0 %v7354_v41  ;;  %v7423_v5 = vsel %vm1096_vm2, %v1562_v3, %v1565_v1  ;;  %v7445_v12 = vsel %vm1096_vm2, %v1569_v9, %v1572_v10  ;;  %v1576_v16 = vor.u32 %v1574_v13, %v1572_v10  ;;  %v7457_v17 = vrot.slane %v1577_v14, 1  ;;  %v7503_v29 = vld [vmem:[%s7306_s22 + $0x5c] sm:$0xff]   ;;  %p533_p8 = scmp.lt.s32.totalorder %s5751_s20, 2 }
  0x38   : > { %5797 = vmatmul.mubr.msk.bf16.gmra.mrb[4].mxu1 %vm633_vm1, %v7327_v34  ;;  %5806 = vmatmul.mubr.msk.bf16.gmra.mrb[4].mxu0 %vm633_vm1, %v6894_v30  ;;  %v7530_v30 = vld [vmem:[%s7306_s22 + $0x6c] ss:$0 sps:$4 sm:$0xff]   ;;  %v1121_v31 = vshrl.u32 %v7376_v50, 16  ;;  %v1581_v33 = vshrl.u32 %v7391_v56, 16  ;;  %v7652_v43 = vld [vmem:[%s9098_s3 + $0x90] sm:$0xff]   ;;  %v7684_v52 = vld [vmem:[%s9098_s3 + $0xa0] sm:$0xff]  }
  0x39   : > { %705 = vmatprep.mubr.bf16.mxu1 %v9109_v18  ;;  %812 = vmatprep.mubr.bf16.mxu0 %v9109_v18  ;;  %v7461_v19 = vsel %vm1096_vm2, %v1576_v16, %v7457_v17  ;;  %v7638_v40 = vld [vmem:[%s9098_s3 + $0x88] sm:$0xff]   ;;  %v7664_v46 = vld [vmem:[%s9098_s3 + $0x98] sm:$0xff]   ;;  %9132 = vst [vmem:[#allocation3_spill] sm:$0xff] %v7684_v52  ;;  %v7695_v54 = vld [vmem:[%s9098_s3 + $0x30] sm:$0xff]   ;;  %vm4032_vm6 = vcmask 1046528   ;;  %vm4780_vm7 = vcmask 261120  }
  0x3a   : > { %1006 = vmatprep.subr.bf16.mxu0 %v7365_v44  ;;  %v7563_v32 = vor.u32 %v1121_v31, %v7393_v57  ;;  %9133 = vst [vmem:[#allocation4_spill] sm:$0xff] %v7695_v54  ;;  %v7700_v55 = vld [vmem:[%s9098_s3 + $0xa8] sm:$0xff]   ;;  %v7715_v61 = vld [vmem:[%s9098_s3 + $0x38] sm:$0xff]   ;;  %v7720_v62 = vld [vmem:[%s9098_s3 + $0xb0] sm:$0xff]   ;;  %vm5095_vm8 = vcmask 654336   ;;  %vm5615_vm10 = vcmask 1040384  }
  0x3b   : > { %9134 = vst [vmem:[#allocation5_spill] sm:$0xff] %v7700_v55  ;;  %9135 = vst [vmem:[#allocation6_spill] sm:$0xff] %v7715_v61  ;;  %v7731_v0 = vld [vmem:[%s9098_s3 + $0x40] sm:$0xff]   ;;  %v7736_v1 = vld [vmem:[%s9098_s3 + $0xb8] sm:$0xff]   ;;  %vm5420_vm9 = vsmask.f32 6400 }
  0x3c   : > { %9136 = vst [vmem:[#allocation7_spill] sm:$0xff] %v7720_v62  ;;  %9137 = vst [vmem:[#allocation8_spill] sm:$0xff] %v7731_v0  ;;  %v7751_v6 = vld [vmem:[%s9098_s3 + $0x48] sm:$0xff]   ;;  %v7756_v7 = vld [vmem:[%s9098_s3 + $0xc0] sm:$0xff]   ;;  %vm5602_vm11 = vcmask 408576   ;;  %s9179_s20 = smov (!%p533_p8, %s5751_s20), 2 }
  0x3d   : > { %9138 = vst [vmem:[#allocation9_spill] sm:$0xff] %v7736_v1  ;;  %9139 = vst [vmem:[#allocation10_spill] sm:$0xff] %v7751_v6  ;;  %v7767_v9 = vld [vmem:[%s9098_s3 + $0x50] sm:$0xff]   ;;  %v7772_v10 = vld [vmem:[%s9098_s3 + $0xc8] sm:$0xff]   ;;  %s6853_s15 = smul.u32 56, %s9179_s20 }
  0x3e   : > { %9140 = vst [vmem:[#allocation11_spill] sm:$0xff] %v7756_v7  ;;  %9141 = vst [vmem:[#allocation12_spill] sm:$0xff] %v7767_v9  ;;  %v7786_v16 = vld [vmem:[%s9098_s3 + $0xd0] sm:$0xff]   ;;  %v7797_v21 = vld [vmem:[%s9098_s3 + $0x60] sm:$0xff]  }
  0x3f   : > { %9142 = vst [vmem:[#allocation13_spill] sm:$0xff] %v7772_v10  ;;  %9144 = vst [vmem:[#allocation15_spill] sm:$0xff] %v7786_v16  ;;  %v7802_v31 = vld [vmem:[%s9098_s3 + $0xd8] sm:$0xff]   ;;  %s537_s27 = scalar_lea.vmem %s9106_s11, %s6853_s15 }
  0x40   : > { %5798 = vmatmul.mubr.msk.bf16.gmra.mrb[8].mxu1 %vm633_vm1, %v7373_v48  ;;  %5807 = vmatmul.mubr.msk.bf16.gmra.mrb[8].mxu0 %vm633_vm1, %v6896_v42  ;;  %v7647_v42 = vld [vmem:[%s9098_s3 + $0x18] sm:$0xff]   ;;  %9145 = vst [vmem:[#allocation16_spill] sm:$0xff] %v7797_v21  ;;  %9146 = vst [vmem:[#allocation17_spill] sm:$0xff] %v7802_v31 }
  0x41   : > { %715 = vmatprep.mubr.bf16.mxu1 %v9109_v18  ;;  %822 = vmatprep.mubr.bf16.mxu0 %v9109_v18 }
  0x48   : > { %5799 = vmatmul.mubr.msk.bf16.gmra.mrb[12].mxu1 %vm633_vm1, %v7391_v56  ;;  %5808 = vmatmul.mubr.msk.bf16.gmra.mrb[12].mxu0 %vm633_vm1, %v7376_v50  ;;  %v7679_v50 = vld [vmem:[%s9098_s3 + $0x28] sm:$0xff]  }
  0x49   : > { %908 = vmatprep.mubr.bf16.mxu0 %v9109_v18  ;;  %1277 = vmatprep.mubr.bf16.mxu1 %v9109_v18 }
  0x50   : > { %5822 = vmatmul.mubr.msk.bf16.vlgmr.msra.gmra.mrb[0].mxu0 %vm633_vm1, %v6905_v63  ;;  %5857 = vmatmul.mubr.msk.bf16.vlgmr.msra.gmra.mrb[16].mxu1 %vm633_vm1, %v6905_v63 }
  0x51   : > { %1317 = vmatpush1.bf16.msra.mxu1 %v7286_v20  ;;  %918 = vmatprep.mubr.bf16.mxu0 %v9109_v18  ;;  %v7468_v20 = vld [vmem:[%s7306_s22 + $0x50] ss:$0 sps:$4 sm:$0xff]  }
  0x52   : > { %1287 = vmatprep.mubr.bf16.mxu1 %v9109_v18  ;;  %5861 = vmatprep.subr.msk.bf16.mxu1 %vm646_vm0, %v7295_v22  ;;  %v7480_v22 = vld [vmem:[%s7306_s22 + $0x54] sm:$0xff]  }
  0x53   : > { %1007 = vmatpush1.bf16.msra.mxu0 %v7415_v2 }
  0x54   : > { %5838 = vmatprep.subr.msk.bf16.mxu0 %vm646_vm0, %v7420_v4 }
  0x55   : > { %1319 = vmatpush1.bf16.msra.mxu1 %v7315_v27 }
  0x56   : > { %1387 = vmatprep.subr.bf16.mxu1 %v7333_v35  ;;  %v7605_v35 = vld [vmem:[%s9098_s3] sm:$0xff]  }
  0x57   : > { %1009 = vmatpush1.bf16.msra.mxu0 %v7396_v58 }
  0x58   : > { %5823 = vmatmul.mubr.msk.bf16.gmra.mrb[4].mxu0 %vm633_vm1, %v6906_v8  ;;  %5858 = vmatmul.mubr.msk.bf16.gmra.mrb[20].mxu1 %vm633_vm1, %v6906_v8 }
  0x59   : > { %928 = vmatprep.mubr.bf16.mxu0 %v9109_v18  ;;  %1297 = vmatprep.mubr.bf16.mxu1 %v9109_v18 }
  0x5a   : > { %1160 = vmatprep.subr.bf16.mxu0 %v7441_v11 }
  0x60   : > { %5824 = vmatmul.mubr.msk.bf16.gmra.mrb[8].mxu0 %vm633_vm1, %v6907_v15  ;;  %5859 = vmatmul.mubr.msk.bf16.gmra.mrb[24].mxu1 %vm633_vm1, %v6907_v15  ;;  %v7781_v15 = vld [vmem:[%s9098_s3 + $0x58] sm:$0xff]  }
  0x61   : > { %938 = vmatprep.mubr.bf16.mxu0 %v9109_v18  ;;  %1307 = vmatprep.mubr.bf16.mxu1 %v9109_v18  ;;  %9143 = vst [vmem:[#allocation14_spill] sm:$0xff] %v7781_v15 }
  0x68   : > { %5825 = vmatmul.mubr.msk.bf16.gmra.mrb[12].mxu0 %vm633_vm1, %v7468_v20  ;;  %5860 = vmatmul.mubr.msk.bf16.gmra.mrb[28].mxu1 %vm633_vm1, %v7468_v20 }
  0x69   : > { %1038 = vmatprep.mubr.bf16.mxu0 %v9109_v18  ;;  %1348 = vmatprep.mubr.bf16.mxu1 %v9109_v18 }
  0x70   : > { %5839 = vmatmul.mubr.msk.bf16.vlgmr.msra.gmra.mrb[0].mxu0 %vm633_vm1, %v7480_v22  ;;  %5862 = vmatmul.mubr.msk.bf16.vlgmr.msra.gmra.mrb[16].mxu1 %vm633_vm1, %v7309_v25  ;;  %v7520_v25 = vld [vmem:[%s7306_s22 + $0x64] sm:$0xff]  }
  0x71   : > { %1388 = vmatpush1.bf16.msra.mxu1 %v7338_v36  ;;  %1048 = vmatprep.mubr.bf16.mxu0 %v9109_v18  ;;  %v7610_v36 = vld [vmem:[%s9098_s3 + $0x78] sm:$0xff]  }
  0x72   : > { %1358 = vmatprep.mubr.bf16.mxu1 %v9109_v18  ;;  %5866 = vmatprep.subr.msk.bf16.mxu1 %vm646_vm0, %v7343_v37  ;;  %v7619_v37 = vld [vmem:[%s9098_s3 + $0x8] sm:$0xff]  }
  0x73   : > { %1161 = vmatpush1.bf16.msra.mxu0 %v7485_v23 }
  0x74   : > { %5851 = vmatprep.subr.msk.bf16.mxu0 %vm646_vm0, %v7490_v24 }
  0x75   : > { %1390 = vmatpush1.bf16.msra.mxu1 %v7354_v41 }
  0x76   : > { %1472 = vmatprep.subr.bf16.mxu1 %v7365_v44  ;;  %v7659_v44 = vld [vmem:[%s9098_s3 + $0x20] sm:$0xff]  }
  0x77   : > { %1163 = vmatpush1.bf16.msra.mxu0 %v7493_v28 }
  0x78   : > { %5840 = vmatmul.mubr.msk.bf16.gmra.mrb[4].mxu0 %vm633_vm1, %v7503_v29  ;;  %5863 = vmatmul.mubr.msk.bf16.gmra.mrb[20].mxu1 %vm633_vm1, %v7327_v34  ;;  %v7598_v34 = vor.u32 %v1581_v33, %v7457_v17  ;;  %v7811_v33 = vld [vmem:[%s9098_s3 + $0x68] sm:$0xff]  }
  0x79   : > { %1058 = vmatprep.mubr.bf16.mxu0 %v9109_v18  ;;  %1368 = vmatprep.mubr.bf16.mxu1 %v9109_v18  ;;  %9147 = vst [vmem:[#allocation18_spill] sm:$0xff] %v7811_v33 }
  0x7a   : > { %1876 = vmatprep.subr.bf16.mxu0 %v9109_v18 }
  0x80   : > { %5841 = vmatmul.mubr.msk.bf16.gmra.mrb[8].mxu0 %vm633_vm1, %v7520_v25  ;;  %5864 = vmatmul.mubr.msk.bf16.gmra.mrb[24].mxu1 %vm633_vm1, %v7373_v48 }
  0x81   : > { %1068 = vmatprep.mubr.bf16.mxu0 %v9109_v18  ;;  %1378 = vmatprep.mubr.bf16.mxu1 %v9109_v18 }
  0x88   : > { %5842 = vmatmul.mubr.msk.bf16.gmra.mrb[12].mxu0 %vm633_vm1, %v7530_v30  ;;  %5865 = vmatmul.mubr.msk.bf16.gmra.mrb[28].mxu1 %vm633_vm1, %v7391_v56 }
  0x89   : > { %1192 = vmatprep.mubr.bf16.mxu0 %v9109_v18  ;;  %1419 = vmatprep.mubr.bf16.mxu1 %v9109_v18 }
  0x90   : > { %5852 = vmatmul.mubr.msk.bf16.vlgmr.msra.gmra.mrb[0].mxu0 %vm633_vm1, %v7369_v45  ;;  %5867 = vmatmul.mubr.msk.bf16.vlgmr.msra.gmra.mrb[16].mxu1 %vm633_vm1, %v7480_v22 }
  0x91   : > { %1473 = vmatpush1.bf16.msra.mxu1 %v7415_v2  ;;  %1202 = vmatprep.mubr.bf16.mxu0 %v9109_v18 }
  0x92   : > { %1429 = vmatprep.mubr.bf16.mxu1 %v9109_v18  ;;  %5871 = vmatprep.subr.msk.bf16.mxu1 %vm646_vm0, %v7420_v4 }
  0x93   : > { %1877 = vmatpush1.bf16.msra.mxu0 %v7605_v35 }
  0x94   : > { %1878 = vmatprep.subr.bf16.mxu0 %v9109_v18 }
  0x95   : > { %1475 = vmatpush1.bf16.msra.mxu1 %v7396_v58 }
  0x96   : > { %1596 = vmatprep.subr.bf16.mxu1 %v7441_v11 }
  0x97   : > { %1879 = vmatpush1.bf16.msra.mxu0 %v7619_v37 }
  0x98   : > { %5853 = vmatmul.mubr.msk.bf16.gmra.mrb[4].mxu0 %vm633_vm1, %v7379_v51  ;;  %5868 = vmatmul.mubr.msk.bf16.gmra.mrb[20].mxu1 %vm633_vm1, %v7503_v29 }
  0x99   : > { %1212 = vmatprep.mubr.bf16.mxu0 %v9109_v18  ;;  %1439 = vmatprep.mubr.bf16.mxu1 %v9109_v18 }
  0x9a   : > { %1880 = vmatprep.subr.bf16.mxu0 %v9109_v18 }
  0x9b   : > { %1881 = vmatpush1.bf16.msra.mxu0 %v7633_v39 }
  0x9c   : > { %1882 = vmatprep.subr.bf16.mxu0 %v9109_v18 }
  0x9f   : > { %1883 = vmatpush1.bf16.msra.mxu0 %v7647_v42 }
  0xa0   : > { %5854 = vmatmul.mubr.msk.bf16.gmra.mrb[8].mxu0 %vm633_vm1, %v7400_v59  ;;  %5869 = vmatmul.mubr.msk.bf16.gmra.mrb[24].mxu1 %vm633_vm1, %v7520_v25 }
  0xa1   : > { %1222 = vmatprep.mubr.bf16.mxu0 %v9109_v18  ;;  %1449 = vmatprep.mubr.bf16.mxu1 %v9109_v18 }
  0xa2   : > { %1884 = vmatprep.subr.bf16.mxu0 %v9109_v18 }
  0xa3   : > { %1885 = vmatpush1.bf16.msra.mxu0 %v7659_v44 }
  0xa4   : > { %1886 = vmatprep.subr.bf16.mxu0 %v9109_v18 }
  0xa7   : > { %1887 = vmatpush1.bf16.msra.mxu0 %v7679_v50 }
  0xa8   : > { %5855 = vmatmul.mubr.msk.bf16.gmra.mrb[12].mxu0 %vm633_vm1, %v7563_v32  ;;  %5870 = vmatmul.mubr.msk.bf16.gmra.mrb[28].mxu1 %vm633_vm1, %v7530_v30 }
  0xa9   : > { %1504 = vmatprep.mubr.bf16.mxu1 %v9109_v18  ;;  %1888 = vmatprep.subr.bf16.mxu0 %v9109_v18 }
  0xab   : > { %1889 = vmatpush1.bf16.msra.mxu0 %v7695_v54 }
  0xac   : > { %1890 = vmatprep.subr.bf16.mxu0 %v9109_v18 }
  0xaf   : > { %1891 = vmatpush1.bf16.msra.mxu0 %v7715_v61 }
  0xb0   : > { %5872 = vmatmul.mubr.msk.bf16.vlgmr.msra.gmra.mrb[16].mxu1 %vm633_vm1, %v7369_v45  ;;  %1892 = vmatprep.subr.bf16.mxu0 %v9109_v18 }
  0xb1   : > { %1597 = vmatpush1.bf16.msra.mxu1 %v7485_v23  ;;  %1514 = vmatprep.mubr.bf16.mxu1 %v9109_v18 }
  0xb2   : > { %5876 = vmatprep.subr.msk.bf16.mxu1 %vm646_vm0, %v7490_v24 }
  0xb3   : > { %1893 = vmatpush1.bf16.msra.mxu0 %v7731_v0 }
  0xb4   : > { %1894 = vmatprep.subr.bf16.mxu0 %v9109_v18 }
  0xb5   : > { %1599 = vmatpush1.bf16.msra.mxu1 %v7493_v28 }
  0xb6   : > { %2061 = vmatprep.subr.bf16.mxu1 %v9109_v18 }
  0xb7   : > { %1895 = vmatpush1.bf16.msra.mxu0 %v7751_v6 }
  0xb8   : > { %5873 = vmatmul.mubr.msk.bf16.gmra.mrb[20].mxu1 %vm633_vm1, %v7379_v51  ;;  %1896 = vmatprep.subr.bf16.mxu0 %v9109_v18 }
  0xb9   : > { %1524 = vmatprep.mubr.bf16.mxu1 %v9109_v18 }
  0xbb   : > { %1897 = vmatpush1.bf16.msra.mxu0 %v7767_v9 }
  0xbc   : > { %1898 = vmatprep.subr.bf16.mxu0 %v9109_v18 }
  0xbf   : > { %1899 = vmatpush1.bf16.msra.mxu0 %v7781_v15 }
  0xc0   : > { %5874 = vmatmul.mubr.msk.bf16.gmra.mrb[24].mxu1 %vm633_vm1, %v7400_v59  ;;  %1900 = vmatprep.subr.bf16.mxu0 %v9109_v18 }
  0xc1   : > { %1534 = vmatprep.mubr.bf16.mxu1 %v9109_v18 }
  0xc3   : > { %1901 = vmatpush1.bf16.msra.mxu0 %v7797_v21 }
  0xc4   : > { %1902 = vmatprep.subr.bf16.mxu0 %v9109_v18 }
  0xc7   : > { %1903 = vmatpush1.bf16.msra.mxu0 %v7811_v33 }
  0xc8   : > { %5875 = vmatmul.mubr.msk.bf16.gmra.mrb[28].mxu1 %vm633_vm1, %v7563_v32  ;;  %1904 = vmatprep.subr.bf16.mxu0 %v9109_v18 }
  0xc9   : > { %1628 = vmatprep.mubr.bf16.mxu1 %v9109_v18 }
  0xd0   : > { %5877 = vmatmul.mubr.msk.bf16.vlgmr.msra.gmra.mrb[16].mxu1 %vm633_vm1, %v7423_v5 }
  0xd1   : > { %1638 = vmatprep.mubr.bf16.mxu1 %v9109_v18  ;;  %2062 = vmatpush1.bf16.msra.mxu1 %v7610_v36 }
  0xd2   : > { %2063 = vmatprep.subr.bf16.mxu1 %v9109_v18 }
  0xd5   : > { %2064 = vmatpush1.bf16.msra.mxu1 %v7624_v38 }
  0xd6   : > { %2065 = vmatprep.subr.bf16.mxu1 %v9109_v18 }
  0xd8   : > { %5878 = vmatmul.mubr.msk.bf16.gmra.mrb[20].mxu1 %vm633_vm1, %v7445_v12 }
  0xd9   : > { %1648 = vmatprep.mubr.bf16.mxu1 %v9109_v18  ;;  %2066 = vmatpush1.bf16.msra.mxu1 %v7638_v40 }
  0xda   : > { %2067 = vmatprep.subr.bf16.mxu1 %v9109_v18 }
  0xdd   : > { %2068 = vmatpush1.bf16.msra.mxu1 %v7652_v43 }
  0xde   : > { %2069 = vmatprep.subr.bf16.mxu1 %v9109_v18 }
  0xe0   : > { %5879 = vmatmul.mubr.msk.bf16.gmra.mrb[24].mxu1 %vm633_vm1, %v7461_v19 }
  0xe1   : > { %1658 = vmatprep.mubr.bf16.mxu1 %v9109_v18  ;;  %2070 = vmatpush1.bf16.msra.mxu1 %v7664_v46 }
  0xe2   : > { %2071 = vmatprep.subr.bf16.mxu1 %v9109_v18 }
  0xe5   : > { %2072 = vmatpush1.bf16.msra.mxu1 %v7684_v52 }
  0xe6   : > { %2073 = vmatprep.subr.bf16.mxu1 %v9109_v18 }
  0xe8   : > { %5880 = vmatmul.mubr.msk.bf16.gmra.mrb[28].mxu1 %vm633_vm1, %v7598_v34 }
  0xe9   : > { %2074 = vmatpush1.bf16.msra.mxu1 %v7700_v55 }
  0xea   : > { %2075 = vmatprep.subr.bf16.mxu1 %v9109_v18 }
  0xed   : > { %2076 = vmatpush1.bf16.msra.mxu1 %v7720_v62 }
  0xee   : > { %2077 = vmatprep.subr.bf16.mxu1 %v9109_v18 }
  0xf1   : > { %2078 = vmatpush1.bf16.msra.mxu1 %v7736_v1 }
  0xf2   : > { %2079 = vmatprep.subr.bf16.mxu1 %v9109_v18 }
  0xf5   : > { %2080 = vmatpush1.bf16.msra.mxu1 %v7756_v7 }
  0xf6   : > { %2081 = vmatprep.subr.bf16.mxu1 %v9109_v18 }
  0xf9   : > { %2082 = vmatpush1.bf16.msra.mxu1 %v7772_v10 }
  0xfa   : > { %2083 = vmatprep.subr.bf16.mxu1 %v9109_v18 }
  0xfd   : > { %2084 = vmatpush1.bf16.msra.mxu1 %v7786_v16 }
  0xfe   : > { %2085 = vmatprep.subr.bf16.mxu1 %v9109_v18 }
 0x101   : > { %2086 = vmatpush1.bf16.msra.mxu1 %v7802_v31  ;;  %v7830_v31 = vld [vmem:[%s9098_s3 + $0xe8] sm:$0xff]  }
 0x102   : > { %2087 = vmatprep.subr.bf16.mxu1 %v9109_v18  ;;  %9150 = vst [vmem:[#allocation21_spill] sm:$0xff] %v7830_v31 }
 0x103   : > { %v7668_v47 = vpop.f32.mrb[0].mxu1 }
 0x104   : > { %v7670_v48 = vpop.f32.mrb[1].mxu1 }
 0x105   : > { %v7672_v49 = vpop.f32.mrb[2].mxu1 }
 0x106   : > { %v7686_v53 = vpop.f32.mrb[3].mxu1 }
 0x10b   : > { %v7704_v56 = vpop.f32.mrb[4].mxu1 }
 0x10c   : > { %v7706_v57 = vpop.f32.mrb[5].mxu1 }
 0x10d   : > { %v7708_v60 = vpop.f32.mrb[6].mxu1 }
 0x10e   : > { %v7722_v63 = vpop.f32.mrb[7].mxu1 }
 0x113   : > { %v7740_v2 = vpop.f32.mrb[8].mxu1 }
 0x114   : > { %v7742_v3 = vpop.f32.mrb[9].mxu1 }
 0x115   : > { %v7744_v4 = vpop.f32.mrb[10].mxu1 }
 0x116   : > { %v7758_v8 = vpop.f32.mrb[11].mxu1 }
 0x11b   : > { %v717_v11 = vpop.f32.mrb[12].mxu1 }
 0x11c   : > { %v719_v13 = vpop.f32.mrb[13].mxu1 }
 0x11d   : > { %v721_v14 = vpop.f32.mrb[14].mxu1 }
 0x11e   : > { %v722_v17 = vpop.f32.mrb[15].mxu1  ;;  %v7816_v14 = vld [vmem:[%s9098_s3 + $0xe0] sm:$0xff]  }
 0x11f   : > { %9148 = vst [vmem:[#allocation19_spill] sm:$0xff] %v7816_v14  ;;  %2088 = vmatpush1.bf16.msra.mxu1 %v7816_v14  ;;  %v7825_v17 = vld [vmem:[%s9098_s3 + $0x70] sm:$0xff]   ;;  %v7114_v14 = vld [vmem:[%s9096_s1 + $0x24] ss:$8 sps:$4 sm:$0xff]  }
 0x120   : > { %2089 = vmatprep.subr.bf16.mxu1 %v9109_v18  ;;  %9149 = vst [vmem:[#allocation20_spill] sm:$0xff] %v7825_v17  ;;  %1905 = vmatpush1.bf16.msra.mxu0 %v7825_v17 }
 0x121   : > { %2132 = vmatprep.subr.bf16.mxu0 %v7114_v14 }
 0x123   : > { %2090 = vmatpush1.bf16.msra.mxu1 %v7830_v31 }
 0x124   : > { %2568 = vmatprep.subr.bf16.mxu1 %v7114_v14 }
 0x163   : > { %v1194_v18 = vpop.f32.mrb[0].mxu0 }
 0x164   : > { %v6456_v33 = vadd.f32 %v1194_v18, %v7668_v47  ;;  %v1196_v21 = vpop.f32.mrb[1].mxu0 }
 0x165   : > { %v6457_v16 = vadd.f32 %v1196_v21, %v7670_v48  ;;  %v1198_v15 = vpop.f32.mrb[2].mxu0 }
 0x166   : > { %v6458_v10 = vadd.f32 %v1198_v15, %v7672_v49  ;;  %v1200_v9 = vpop.f32.mrb[3].mxu0 }
 0x167   : > { %v6459_v17 = vadd.f32 %v1200_v9, %v7686_v53  ;;  %v1697_v9 = vlaneseq }
 0x169   : > { %v7861_v21 = vshrl.u32 %v1697_v9, 7 }
 0x16b   : > { %v1204_v7 = vpop.f32.mrb[4].mxu0  ;;  %9151 = vst [vmem:[#allocation22_spill] sm:$0xff] %v7861_v21 }
 0x16c   : > { %v6460_v31 = vadd.f32 %v1204_v7, %v7704_v56  ;;  %v1206_v6 = vpop.f32.mrb[5].mxu0 }
 0x16d   : > { %v6461_v1 = vadd.f32 %v1206_v6, %v7706_v57  ;;  %v1208_v0 = vpop.f32.mrb[6].mxu0 }
 0x16e   : > { %v6462_v14 = vadd.f32 %v1208_v0, %v7708_v60  ;;  %v1210_v62 = vpop.f32.mrb[7].mxu0 }
 0x16f   : > { %v6463_v18 = vadd.f32 %v1210_v62, %v7722_v63 }
 0x173   : > { %v1214_v47 = vpop.f32.mrb[8].mxu0 }
 0x174   : > { %v7846_v48 = vadd.f32 %v1214_v47, %v7740_v2  ;;  %v1216_v49 = vpop.f32.mrb[9].mxu0 }
 0x175   : > { %v7849_v15 = vadd.f32 %v1216_v49, %v7742_v3  ;;  %v1218_v53 = vpop.f32.mrb[10].mxu0  ;;  %v9126_v3 = vsub.s32 0, %v7861_v21 }
 0x176   : > { %v7852_v56 = vadd.f32 %v1218_v53, %v7744_v4  ;;  %v1220_v7 = vpop.f32.mrb[11].mxu0  ;;  %v1695_v4 = vld [vmem:[%s9097_s2] sm:$0x3] }
 0x177   : > { %v7855_v57 = vadd.f32 %v1220_v7, %v7758_v8  ;;  %v9131_v8 = vsub.s32 1, %v7861_v21 }
 0x17b   : > { %v1224_v60 = vpop.f32.mrb[12].mxu0 }
 0x17c   : > { %v7857_v0 = vadd.f32 %v1224_v60, %v717_v11  ;;  %v1226_v62 = vpop.f32.mrb[13].mxu0  ;;  %v7870_v11 = vrot.slane %v1695_v4, %v9126_v3 }
 0x17d   : > { %v7859_v63 = vadd.f32 %v1226_v62, %v719_v13  ;;  %v1228_v2 = vpop.f32.mrb[14].mxu0  ;;  %v7874_v13 = vrot.slane %v1695_v4, %v9131_v8 }
 0x17e   : > { %v1229_v6 = vpop.f32.mrb[15].mxu0 }
 0x1a3   : > { %v1630_v47 = vpop.f32.mrb[16].mxu1 }
 0x1a4   : > { %v1681_v49 = vmax.f32 %v6456_v33, %v1630_v47  ;;  %v1632_v53 = vpop.f32.mrb[17].mxu1 }
 0x1a5   : > { %v1682_v7 = vmax.f32 %v6457_v16, %v1632_v53  ;;  %v1634_v60 = vpop.f32.mrb[18].mxu1 }
 0x1a6   : > { %v1707_v62 = vadd.f32 %v7870_v11, %v1681_v49  ;;  %v1683_v2 = vmax.f32 %v6458_v10, %v1634_v60  ;;  %v1636_v6 = vpop.f32.mrb[19].mxu1 }
 0x1a7   : > { %v1708_v9 = vadd.f32 %v7874_v13, %v1682_v7  ;;  %v1684_v61 = vmax.f32 %v6459_v17, %v1636_v6 }
 0x1a8   : > { %v1709_v55 = vadd.f32 %v7870_v11, %v1683_v2  ;;  %v1721_v54 = vmax.f32 %v1707_v62, 0.0 }
 0x1a9   : > { %v1710_v3 = vadd.f32 %v7874_v13, %v1684_v61  ;;  %v1722_v21 = vmax.f32 %v1708_v9, 0.0 }
 0x1aa   : > { %v1723_v52 = vmax.f32 %v1709_v55, 0.0 }
 0x1ab   : > { %v1724_v4 = vmax.f32 %v1710_v3, 0.0  ;;  %v1640_v8 = vpop.f32.mrb[20].mxu1 }
 0x1ac   : > { %v1735_v33 = vpack.c.bf16 %v1723_v52, %v1721_v54  ;;  %v1685_v47 = vmax.f32 %v6460_v31, %v1640_v8  ;;  %v1642_v16 = vpop.f32.mrb[21].mxu1  ;;  %v7115_v54 = vld [vmem:[%s9096_s1 + $0x20] ss:$8 sps:$4 sm:$0xff]   ;;  %v7116_v31 = vld [vmem:[%s9096_s1 + $0x34] ss:$8 sps:$4 sm:$0x3f]  }
 0x1ad   : > { %v1736_v53 = vpack.c.bf16 %v1724_v4, %v1722_v21  ;;  %v1686_v49 = vmax.f32 %v6461_v1, %v1642_v16  ;;  %v1644_v10 = vpop.f32.mrb[22].mxu1 }
 0x1ae   : > { %v1711_v60 = vadd.f32 %v7870_v11, %v1685_v47  ;;  %v1687_v7 = vmax.f32 %v6462_v14, %v1644_v10  ;;  %v1646_v17 = vpop.f32.mrb[23].mxu1 }
 0x1af   : > { %v1712_v2 = vadd.f32 %v7874_v13, %v1686_v49  ;;  %v1688_v6 = vmax.f32 %v6463_v18, %v1646_v17  ;;  %5896 = vmatprep.mubr.msk.bf16.mxu0 %vm1863_vm3, %v1736_v53  ;;  %5945 = vmatprep.mubr.msk.bf16.mxu1 %vm1863_vm3, %v1736_v53  ;;  %v7117_v49 = vld [vmem:[%s9096_s1 + $0x4] ss:$8 sps:$4 sm:$0xff]  }
 0x1b0   : > { %v1713_v55 = vadd.f32 %v7870_v11, %v1687_v7  ;;  %1909 = vmatmul.mubr.bf16.vlgmr.msra.gmra.mrb[16].mxu0 %v1735_v33  ;;  %2094 = vmatmul.mubr.bf16.vlgmr.msra.gmra.mrb[32].mxu1 %v1735_v33  ;;  %v1725_v61 = vmax.f32 %v1711_v60, 0.0 }
 0x1b1   : > { %v1714_v52 = vadd.f32 %v7874_v13, %v1688_v6  ;;  %2133 = vmatpush1.bf16.msra.mxu0 %v7115_v54  ;;  %2569 = vmatpush1.bf16.msra.mxu1 %v7115_v54  ;;  %v1726_v14 = vmax.f32 %v1712_v2, 0.0 }
 0x1b2   : > { %v1727_v1 = vmax.f32 %v1713_v55, 0.0  ;;  %5949 = vmatprep.subr.msk.bf16.mxu0 %vm646_vm0, %v7116_v31  ;;  %5974 = vmatprep.subr.msk.bf16.mxu1 %vm646_vm0, %v7116_v31 }
 0x1b3   : > { %v1728_v18 = vmax.f32 %v1714_v52, 0.0  ;;  %v1650_v21 = vpop.f32.mrb[24].mxu1 }
 0x1b4   : > { %v1689_v3 = vmax.f32 %v7846_v48, %v1650_v21  ;;  %v1652_v8 = vpop.f32.mrb[25].mxu1  ;;  %v1737_v62 = vpack.c.bf16 %v1727_v1, %v1725_v61 }
 0x1b5   : > { %v1738_v9 = vpack.c.bf16 %v1728_v18, %v1726_v14  ;;  %v1690_v4 = vmax.f32 %v7849_v15, %v1652_v8  ;;  %v1654_v33 = vpop.f32.mrb[26].mxu1  ;;  %2135 = vmatpush1.bf16.msra.mxu0 %v7312_v26  ;;  %2571 = vmatpush1.bf16.msra.mxu1 %v7312_v26  ;;  %v7118_v8 = vld [vmem:[%s9096_s1] ss:$8 sps:$4 sm:$0xff]  }
 0x1b6   : > { %v1715_v47 = vadd.f32 %v7870_v11, %v1689_v3  ;;  %v1691_v16 = vmax.f32 %v7852_v56, %v1654_v33  ;;  %v1656_v53 = vpop.f32.mrb[27].mxu1  ;;  %2203 = vmatprep.subr.bf16.mxu0 %v7117_v49  ;;  %2639 = vmatprep.subr.bf16.mxu1 %v7117_v49  ;;  %v9152_v3 = vmov 0   ;;  %v7123_v33 = vld [vmem:[%s9096_s1 + $0x54] ss:$8 sps:$4 sm:$0x3f]  }
 0x1b7   : > { %v1716_v48 = vadd.f32 %v7874_v13, %v1690_v4  ;;  %v1692_v15 = vmax.f32 %v7855_v57, %v1656_v53  ;;  %5897 = vmatprep.mubr.msk.bf16.mxu0 %vm1863_vm3, %v1738_v9  ;;  %5946 = vmatprep.mubr.msk.bf16.mxu1 %vm1863_vm3, %v1738_v9  ;;  %v7120_v9 = vld [vmem:[%s9096_s1 + $0x44] ss:$8 sps:$4 sm:$0xff]   ;;  %v7122_v4 = vld [vmem:[%s9096_s1 + $0x40] ss:$8 sps:$4 sm:$0xff]  }
 0x1b8   : > { %v1717_v26 = vadd.f32 %v7870_v11, %v1691_v16  ;;  %1917 = vmatmul.mubr.bf16.gmra.mrb[20].mxu0 %v1737_v62  ;;  %2102 = vmatmul.mubr.bf16.gmra.mrb[36].mxu1 %v1737_v62  ;;  %v1729_v10 = vmax.f32 %v1715_v47, 0.0  ;;  %v7119_v62 = vld [vmem:[%s9096_s1 + $0x14] ss:$8 sps:$4 sm:$0x3f]  }
 0x1b9   : > { %v1718_v56 = vadd.f32 %v7874_v13, %v1692_v15  ;;  %v1730_v7 = vmax.f32 %v1716_v48, 0.0  ;;  %v7125_v47 = vld [vmem:[%s7306_s22 + $0x40] sm:$0xff]   ;;  %v7982_v16 = vld [vmem:[%s7306_s22 + $0x48] sm:$0xff]  }
 0x1ba   : > { %v1731_v60 = vmax.f32 %v1717_v26, 0.0  ;;  %v2450_v49 = vshll.u32 %v7125_v47, 16  ;;  %v2454_v26 = vshrl.u32 %v7125_v47, 16 }
 0x1bb   : > { %v1732_v17 = vmax.f32 %v1718_v56, 0.0  ;;  %v1660_v2 = vpop.f32.mrb[28].mxu1  ;;  %v2457_v56 = vshll.u32 %v7982_v16, 16 }
 0x1bc   : > { %v1693_v6 = vmax.f32 %v7857_v0, %v1660_v2  ;;  %v1662_v55 = vpop.f32.mrb[29].mxu1  ;;  %v1739_v52 = vpack.c.bf16 %v1731_v60, %v1729_v10  ;;  %v2452_v48 = vrot.slane %v2450_v49, 1  ;;  %v2461_v60 = vshrl.u32 %v7982_v16, 16 }
 0x1bd   : > { %v1740_v57 = vpack.c.bf16 %v1732_v17, %v1730_v7  ;;  %v1694_v54 = vmax.f32 %v7859_v63, %v1662_v55  ;;  %v1664_v61 = vpop.f32.mrb[30].mxu1  ;;  %v2459_v10 = vrot.slane %v2457_v56, 1  ;;  %v7130_v7 = vld [vmem:[%s7306_s22 + $0x50] ss:$0 sps:$4 sm:$0xff]  }
 0x1be   : > { %v1719_v1 = vadd.f32 %v7870_v11, %v1693_v6  ;;  %v1665_v31 = vpop.f32.mrb[31].mxu1  ;;  %v2464_v17 = vshll.u32 %v7130_v7, 16  ;;  %v9171_v56 = vld [vmem:[#allocation21_spill] sm:$0xff] }
 0x1bf   : > { %v1720_v14 = vadd.f32 %v7874_v13, %v1694_v54  ;;  %5898 = vmatprep.mubr.msk.bf16.mxu0 %vm1863_vm3, %v1740_v57  ;;  %5947 = vmatprep.mubr.msk.bf16.mxu1 %vm1863_vm3, %v1740_v57  ;;  %v2886_v54 = vshll.u32 %v7503_v29, 16  ;;  %v2890_v31 = vshrl.u32 %v7503_v29, 16 }
 0x1c0   : > { %1925 = vmatmul.mubr.bf16.gmra.mrb[24].mxu0 %v1739_v52  ;;  %2110 = vmatmul.mubr.bf16.gmra.mrb[40].mxu1 %v1739_v52  ;;  %v1733_v21 = vmax.f32 %v1719_v1, 0.0 }
 0x1c1   : > { %v1734_v18 = vmax.f32 %v1720_v14, 0.0  ;;  %v2888_v61 = vrot.slane %v2886_v54, 1  ;;  %v2893_v14 = vshll.u32 %v7520_v25, 16 }
 0x1c2   : > { %v1741_v63 = vpack.c.bf16 %v1733_v21, %v1733_v21  ;;  %v2897_v21 = vshrl.u32 %v7520_v25, 16 }
 0x1c3   : > { %v1742_v0 = vpack.c.bf16 %v1734_v18, %v1734_v18  ;;  %v2895_v18 = vrot.slane %v2893_v14, 1 }
 0x1c5   : > { %5899 = vmatprep.mubr.msk.bf16.mxu0 %vm1863_vm3, %v1742_v0  ;;  %5948 = vmatprep.mubr.msk.bf16.mxu1 %vm1863_vm3, %v1742_v0  ;;  %v2900_v0 = vshll.u32 %v7530_v30, 16 }
 0x1c8   : > { %1933 = vmatmul.mubr.bf16.gmra.mrb[28].mxu0 %v1741_v63  ;;  %2118 = vmatmul.mubr.bf16.gmra.mrb[44].mxu1 %v1741_v63  ;;  %v9161_v63 = vld [vmem:[#allocation11_spill] sm:$0xff] }
 0x1c9   : > { %2164 = vmatprep.mubr.bf16.mxu0 %v9152_v3  ;;  %2600 = vmatprep.mubr.bf16.mxu1 %v9152_v3 }
 0x1d0   : > { %5950 = vmatmul.mubr.msk.bf16.vlgmr.msra.gmra.mrb[32].mxu0 %vm633_vm1, %v7480_v22  ;;  %5975 = vmatmul.mubr.msk.bf16.vlgmr.msra.gmra.mrb[48].mxu1 %vm633_vm1, %v7369_v45 }
 0x1d1   : > { %2204 = vmatpush1.bf16.msra.mxu0 %v7118_v8  ;;  %2640 = vmatpush1.bf16.msra.mxu1 %v7118_v8  ;;  %v9162_v8 = vld [vmem:[#allocation12_spill] sm:$0xff] }
 0x1d2   : > { %2174 = vmatprep.mubr.bf16.mxu0 %v9152_v3  ;;  %2610 = vmatprep.mubr.bf16.mxu1 %v9152_v3 }
 0x1d3   : > { %5954 = vmatprep.subr.msk.bf16.mxu0 %vm646_vm0, %v7119_v62  ;;  %5979 = vmatprep.subr.msk.bf16.mxu1 %vm646_vm0, %v7119_v62  ;;  %v9163_v62 = vld [vmem:[#allocation13_spill] sm:$0xff] }
 0x1d5   : > { %2206 = vmatpush1.bf16.msra.mxu0 %v7315_v27  ;;  %2642 = vmatpush1.bf16.msra.mxu1 %v7315_v27  ;;  %v7121_v27 = vld [vmem:[%s7306_s22 + $0x38] sm:$0xff]  }
 0x1d6   : > { %2274 = vmatprep.subr.bf16.mxu0 %v7120_v9  ;;  %2710 = vmatprep.subr.bf16.mxu1 %v7120_v9  ;;  %v2444_v53 = vshrl.u32 %v7121_v27, 16  ;;  %v9164_v9 = vld [vmem:[#allocation14_spill] sm:$0xff] }
 0x1d8   : > { %5951 = vmatmul.mubr.msk.bf16.gmra.mrb[36].mxu0 %vm633_vm1, %v7503_v29  ;;  %5976 = vmatmul.mubr.msk.bf16.gmra.mrb[52].mxu1 %vm633_vm1, %v7379_v51 }
 0x1d9   : > { %2184 = vmatprep.mubr.bf16.mxu0 %v9152_v3  ;;  %2620 = vmatprep.mubr.bf16.mxu1 %v9152_v3 }
 0x1e0   : > { %5952 = vmatmul.mubr.msk.bf16.gmra.mrb[40].mxu0 %vm633_vm1, %v7520_v25  ;;  %5977 = vmatmul.mubr.msk.bf16.gmra.mrb[56].mxu1 %vm633_vm1, %v7400_v59 }
 0x1e1   : > { %2194 = vmatprep.mubr.bf16.mxu0 %v9152_v3  ;;  %2630 = vmatprep.mubr.bf16.mxu1 %v9152_v3 }
 0x1e8   : > { %5953 = vmatmul.mubr.msk.bf16.gmra.mrb[44].mxu0 %vm633_vm1, %v7530_v30  ;;  %5978 = vmatmul.mubr.msk.bf16.gmra.mrb[60].mxu1 %vm633_vm1, %v7563_v32 }
 0x1e9   : > { %2235 = vmatprep.mubr.bf16.mxu0 %v9152_v3  ;;  %2671 = vmatprep.mubr.bf16.mxu1 %v9152_v3 }
 0x1f0   : > { %5955 = vmatmul.mubr.msk.bf16.vlgmr.msra.gmra.mrb[32].mxu0 %vm633_vm1, %v7121_v27  ;;  %5980 = vmatmul.mubr.msk.bf16.vlgmr.msra.gmra.mrb[48].mxu1 %vm633_vm1, %v7480_v22  ;;  %v7124_v22 = vld [vmem:[%s9096_s1 + $0x64] ss:$8 sps:$4 sm:$0xff]  }
 0x1f1   : > { %2275 = vmatpush1.bf16.msra.mxu0 %v7122_v4  ;;  %2711 = vmatpush1.bf16.msra.mxu1 %v7122_v4  ;;  %v9166_v4 = vld [vmem:[#allocation16_spill] sm:$0xff] }
 0x1f2   : > { %2245 = vmatprep.mubr.bf16.mxu0 %v9152_v3  ;;  %2681 = vmatprep.mubr.bf16.mxu1 %v9152_v3 }
 0x1f3   : > { %5959 = vmatprep.subr.msk.bf16.mxu0 %vm646_vm0, %v7123_v33  ;;  %5984 = vmatprep.subr.msk.bf16.mxu1 %vm646_vm0, %v7123_v33  ;;  %v9167_v33 = vld [vmem:[#allocation17_spill] sm:$0xff] }
 0x1f5   : > { %2277 = vmatpush1.bf16.msra.mxu0 %v7354_v41  ;;  %2713 = vmatpush1.bf16.msra.mxu1 %v7354_v41  ;;  %v7127_v41 = vld [vmem:[%s9096_s1 + $0x60] ss:$8 sps:$4 sm:$0xff]  }
 0x1f6   : > { %2359 = vmatprep.subr.bf16.mxu0 %v7124_v22  ;;  %2795 = vmatprep.subr.bf16.mxu1 %v7124_v22 }
 0x1f8   : > { %5956 = vmatmul.mubr.msk.bf16.gmra.mrb[36].mxu0 %vm633_vm1, %v7125_v47  ;;  %5981 = vmatmul.mubr.msk.bf16.gmra.mrb[52].mxu1 %vm633_vm1, %v7503_v29 }
 0x1f9   : > { %2255 = vmatprep.mubr.bf16.mxu0 %v9152_v3  ;;  %2691 = vmatprep.mubr.bf16.mxu1 %v9152_v3 }
 0x200   : > { %5957 = vmatmul.mubr.msk.bf16.gmra.mrb[40].mxu0 %vm633_vm1, %v7982_v16  ;;  %5982 = vmatmul.mubr.msk.bf16.gmra.mrb[56].mxu1 %vm633_vm1, %v7520_v25  ;;  %v2902_v25 = vrot.slane %v2900_v0, 1 }
 0x201   : > { %2265 = vmatprep.mubr.bf16.mxu0 %v9152_v3  ;;  %2701 = vmatprep.mubr.bf16.mxu1 %v9152_v3 }
 0x208   : > { %5958 = vmatmul.mubr.msk.bf16.gmra.mrb[44].mxu0 %vm633_vm1, %v7468_v20  ;;  %5983 = vmatmul.mubr.msk.bf16.gmra.mrb[60].mxu1 %vm633_vm1, %v7530_v30  ;;  %v7128_v20 = vld [vmem:[%s9096_s1 + $0x74] ss:$8 sps:$4 sm:$0x3f]  }
 0x209   : > { %2306 = vmatprep.mubr.bf16.mxu0 %v9152_v3  ;;  %2742 = vmatprep.mubr.bf16.mxu1 %v9152_v3 }
 0x210   : > { %5960 = vmatmul.mubr.msk.bf16.vlgmr.msra.gmra.mrb[32].mxu0 %vm633_vm1, %v7369_v45  ;;  %5985 = vmatmul.mubr.msk.bf16.vlgmr.msra.gmra.mrb[48].mxu1 %vm633_vm1, %v7423_v5  ;;  %v7129_v45 = vld [vmem:[%s9096_s1 + $0x84] ss:$8 sps:$4 sm:$0xff]  }
 0x211   : > { %2360 = vmatpush1.bf16.msra.mxu0 %v7127_v41  ;;  %2796 = vmatpush1.bf16.msra.mxu1 %v7127_v41 }
 0x212   : > { %2316 = vmatprep.mubr.bf16.mxu0 %v9152_v3  ;;  %2752 = vmatprep.mubr.bf16.mxu1 %v9152_v3 }
 0x213   : > { %5964 = vmatprep.subr.msk.bf16.mxu0 %vm646_vm0, %v7128_v20  ;;  %5989 = vmatprep.subr.msk.bf16.mxu1 %vm646_vm0, %v7128_v20 }
 0x215   : > { %2362 = vmatpush1.bf16.msra.mxu0 %v7396_v58  ;;  %2798 = vmatpush1.bf16.msra.mxu1 %v7396_v58  ;;  %v2446_v58 = vshll.u32 %v7121_v27, 16  ;;  %v9165_v27 = vld [vmem:[#allocation15_spill] sm:$0xff] }
 0x216   : > { %2483 = vmatprep.subr.bf16.mxu0 %v7129_v45  ;;  %2919 = vmatprep.subr.bf16.mxu1 %v7129_v45 }
 0x218   : > { %5961 = vmatmul.mubr.msk.bf16.gmra.mrb[36].mxu0 %vm633_vm1, %v7379_v51  ;;  %5986 = vmatmul.mubr.msk.bf16.gmra.mrb[52].mxu1 %vm633_vm1, %v7445_v12  ;;  %v2448_v51 = vrot.slane %v2446_v58, 1 }
 0x219   : > { %2326 = vmatprep.mubr.bf16.mxu0 %v9152_v3  ;;  %2762 = vmatprep.mubr.bf16.mxu1 %v9152_v3 }
 0x220   : > { %5962 = vmatmul.mubr.msk.bf16.gmra.mrb[40].mxu0 %vm633_vm1, %v7400_v59  ;;  %5987 = vmatmul.mubr.msk.bf16.gmra.mrb[56].mxu1 %vm633_vm1, %v7461_v19  ;;  %v2449_v59 = vor.u32 %v2448_v51, %v2444_v53 }
 0x221   : > { %2336 = vmatprep.mubr.bf16.mxu0 %v9152_v3  ;;  %2772 = vmatprep.mubr.bf16.mxu1 %v9152_v3 }
 0x222   : > { %v2453_v15 = vsel %vm1096_vm2, %v2449_v59, %v2452_v48  ;;  %v9168_v59 = vld [vmem:[#allocation18_spill] sm:$0xff] }
 0x228   : > { %5963 = vmatmul.mubr.msk.bf16.gmra.mrb[44].mxu0 %vm633_vm1, %v7563_v32  ;;  %5988 = vmatmul.mubr.msk.bf16.gmra.mrb[60].mxu1 %vm633_vm1, %v7598_v34  ;;  %v2456_v32 = vor.u32 %v2454_v26, %v2452_v48  ;;  %v9169_v48 = vld [vmem:[#allocation19_spill] sm:$0xff]  ;;  %v9170_v26 = vld [vmem:[#allocation20_spill] sm:$0xff] }
 0x229   : > { %2391 = vmatprep.mubr.bf16.mxu0 %v9152_v3  ;;  %2827 = vmatprep.mubr.bf16.mxu1 %v9152_v3 }
 0x230   : > { %5965 = vmatmul.mubr.msk.bf16.vlgmr.msra.gmra.mrb[32].mxu0 %vm633_vm1, %v7423_v5  ;;  %5990 = vmatmul.mubr.msk.bf16.vlgmr.msra.gmra.mrb[48].mxu1 %vm633_vm1, %v2453_v15  ;;  %v2460_v5 = vsel %vm1096_vm2, %v2456_v32, %v2459_v10 }
 0x231   : > { %2484 = vmatpush1.bf16.msra.mxu0 %v7485_v23  ;;  %2920 = vmatpush1.bf16.msra.mxu1 %v7485_v23  ;;  %v2463_v23 = vor.u32 %v2461_v60, %v2459_v10 }
 0x232   : > { %2401 = vmatprep.mubr.bf16.mxu0 %v9152_v3  ;;  %2837 = vmatprep.mubr.bf16.mxu1 %v9152_v3 }
 0x233   : > { %5969 = vmatprep.subr.msk.bf16.mxu0 %vm646_vm0, %v7490_v24  ;;  %5994 = vmatprep.subr.msk.bf16.mxu1 %vm646_vm0, %v7490_v24  ;;  %v2466_v24 = vrot.slane %v2464_v17, 1 }
 0x235   : > { %2486 = vmatpush1.bf16.msra.mxu0 %v7493_v28  ;;  %2922 = vmatpush1.bf16.msra.mxu1 %v7493_v28  ;;  %v2467_v2 = vsel %vm1096_vm2, %v2463_v23, %v2466_v24  ;;  %v2468_v28 = vshrl.u32 %v7130_v7, 16 }
 0x236   : > { %3066 = vmatprep.subr.bf16.mxu0 %v9152_v3  ;;  %3130 = vmatprep.subr.bf16.mxu1 %v9152_v3 }
 0x237   : > { %v2470_v55 = vor.u32 %v2468_v28, %v2466_v24 }
 0x238   : > { %5966 = vmatmul.mubr.msk.bf16.gmra.mrb[36].mxu0 %vm633_vm1, %v7445_v12  ;;  %5991 = vmatmul.mubr.msk.bf16.gmra.mrb[52].mxu1 %vm633_vm1, %v2460_v5  ;;  %v7131_v12 = vld [vmem:[%s7306_s22 + $0x54] sm:$0xff]  }
 0x239   : > { %2411 = vmatprep.mubr.bf16.mxu0 %v9152_v3  ;;  %2847 = vmatprep.mubr.bf16.mxu1 %v9152_v3  ;;  %v2882_v6 = vshll.u32 %v7131_v12, 16  ;;  %v2880_v52 = vshrl.u32 %v7131_v12, 16 }
 0x23b   : > { %v2884_v57 = vrot.slane %v2882_v6, 1 }
 0x240   : > { %5967 = vmatmul.mubr.msk.bf16.gmra.mrb[40].mxu0 %vm633_vm1, %v7461_v19  ;;  %5992 = vmatmul.mubr.msk.bf16.gmra.mrb[56].mxu1 %vm633_vm1, %v2467_v2  ;;  %v2885_v19 = vor.u32 %v2884_v57, %v2880_v52 }
 0x241   : > { %2421 = vmatprep.mubr.bf16.mxu0 %v9152_v3  ;;  %2857 = vmatprep.mubr.bf16.mxu1 %v9152_v3 }
 0x242   : > { %v2889_v1 = vsel %vm1096_vm2, %v2885_v19, %v2888_v61 }
 0x248   : > { %5968 = vmatmul.mubr.msk.bf16.gmra.mrb[44].mxu0 %vm633_vm1, %v7598_v34  ;;  %5993 = vmatmul.mubr.msk.bf16.gmra.mrb[60].mxu1 %vm633_vm1, %v2470_v55  ;;  %v2892_v34 = vor.u32 %v2890_v31, %v2888_v61 }
 0x249   : > { %2515 = vmatprep.mubr.bf16.mxu0 %v9152_v3  ;;  %2951 = vmatprep.mubr.bf16.mxu1 %v9152_v3 }
 0x24a   : > { %v2896_v29 = vsel %vm1096_vm2, %v2892_v34, %v2895_v18 }
 0x250   : > { %5970 = vmatmul.mubr.msk.bf16.vlgmr.msra.gmra.mrb[32].mxu0 %vm633_vm1, %v2453_v15  ;;  %5995 = vmatmul.mubr.msk.bf16.vlgmr.msra.gmra.mrb[48].mxu1 %vm633_vm1, %v2889_v1 }
 0x251   : > { %2525 = vmatprep.mubr.bf16.mxu0 %v9152_v3  ;;  %2961 = vmatprep.mubr.bf16.mxu1 %v9152_v3 }
 0x252   : > { %3067 = vmatpush1.bf16.msra.mxu0 %v7605_v35  ;;  %3131 = vmatpush1.bf16.msra.mxu1 %v7610_v36  ;;  %v2899_v35 = vor.u32 %v2897_v21, %v2895_v18 }
 0x253   : > { %3068 = vmatprep.subr.bf16.mxu0 %v9152_v3  ;;  %3132 = vmatprep.subr.bf16.mxu1 %v9152_v3 }
 0x254   : > { %v2903_v36 = vsel %vm1096_vm2, %v2899_v35, %v2902_v25 }
 0x256   : > { %3069 = vmatpush1.bf16.msra.mxu0 %v7619_v37  ;;  %3133 = vmatpush1.bf16.msra.mxu1 %v7624_v38  ;;  %v2904_v37 = vshrl.u32 %v7530_v30, 16  ;;  %v9154_v30 = vld [vmem:[#allocation4_spill] sm:$0xff] }
 0x257   : > { %3070 = vmatprep.subr.bf16.mxu0 %v9152_v3  ;;  %3134 = vmatprep.subr.bf16.mxu1 %v9152_v3 }
 0x258   : > { %5971 = vmatmul.mubr.msk.bf16.gmra.mrb[36].mxu0 %vm633_vm1, %v2460_v5  ;;  %5996 = vmatmul.mubr.msk.bf16.gmra.mrb[52].mxu1 %vm633_vm1, %v2896_v29  ;;  %v2906_v38 = vor.u32 %v2904_v37, %v2902_v25 }
 0x259   : > { %2535 = vmatprep.mubr.bf16.mxu0 %v9152_v3  ;;  %2971 = vmatprep.mubr.bf16.mxu1 %v9152_v3 }
 0x25a   : > { %3071 = vmatpush1.bf16.msra.mxu0 %v7633_v39  ;;  %3135 = vmatpush1.bf16.msra.mxu1 %v7638_v40  ;;  %v9153_v39 = vld [vmem:[#allocation3_spill] sm:$0xff]  ;;  %v9155_v40 = vld [vmem:[#allocation5_spill] sm:$0xff] }
 0x25b   : > { %3072 = vmatprep.subr.bf16.mxu0 %v9152_v3  ;;  %3136 = vmatprep.subr.bf16.mxu1 %v9152_v3 }
 0x25e   : > { %3073 = vmatpush1.bf16.msra.mxu0 %v7647_v42  ;;  %3137 = vmatpush1.bf16.msra.mxu1 %v7652_v43  ;;  %v9156_v42 = vld [vmem:[#allocation6_spill] sm:$0xff]  ;;  %v9157_v43 = vld [vmem:[#allocation7_spill] sm:$0xff] }
 0x25f   : > { %3074 = vmatprep.subr.bf16.mxu0 %v9152_v3  ;;  %3138 = vmatprep.subr.bf16.mxu1 %v9152_v3 }
 0x260   : > { %5972 = vmatmul.mubr.msk.bf16.gmra.mrb[40].mxu0 %vm633_vm1, %v2467_v2  ;;  %5997 = vmatmul.mubr.msk.bf16.gmra.mrb[56].mxu1 %vm633_vm1, %v2903_v36 }
 0x261   : > { %2545 = vmatprep.mubr.bf16.mxu0 %v9152_v3  ;;  %2981 = vmatprep.mubr.bf16.mxu1 %v9152_v3 }
 0x262   : > { %3075 = vmatpush1.bf16.msra.mxu0 %v7659_v44  ;;  %3139 = vmatpush1.bf16.msra.mxu1 %v7664_v46  ;;  %v9158_v44 = vld [vmem:[#allocation8_spill] sm:$0xff]  ;;  %v9159_v46 = vld [vmem:[#allocation9_spill] sm:$0xff] }
 0x263   : > { %3076 = vmatprep.subr.bf16.mxu0 %v9152_v3  ;;  %3140 = vmatprep.subr.bf16.mxu1 %v9152_v3 }
 0x266   : > { %3077 = vmatpush1.bf16.msra.mxu0 %v7679_v50  ;;  %3141 = vmatpush1.bf16.msra.mxu1 %v9153_v39  ;;  %v9160_v50 = vld [vmem:[#allocation10_spill] sm:$0xff] }
 0x267   : > { %3078 = vmatprep.subr.bf16.mxu0 %v9152_v3  ;;  %3142 = vmatprep.subr.bf16.mxu1 %v9152_v3  ;;  %v6957_v39 = vld [vmem:[%s9099_s4 + $0x7c] ss:$8 sps:$4 sm:$0xff]  }
 0x268   : > { %5973 = vmatmul.mubr.msk.bf16.gmra.mrb[44].mxu0 %vm633_vm1, %v2470_v55  ;;  %5998 = vmatmul.mubr.msk.bf16.gmra.mrb[60].mxu1 %vm633_vm1, %v2906_v38 }
 0x26a   : > { %3079 = vmatpush1.bf16.msra.mxu0 %v9154_v30  ;;  %3143 = vmatpush1.bf16.msra.mxu1 %v9155_v40 }
 0x26b   : > { %3080 = vmatprep.subr.bf16.mxu0 %v9152_v3  ;;  %3144 = vmatprep.subr.bf16.mxu1 %v9152_v3 }
 0x26e   : > { %3081 = vmatpush1.bf16.msra.mxu0 %v9156_v42  ;;  %3145 = vmatpush1.bf16.msra.mxu1 %v9157_v43 }
 0x26f   : > { %3082 = vmatprep.subr.bf16.mxu0 %v9152_v3  ;;  %3146 = vmatprep.subr.bf16.mxu1 %v9152_v3 }
 0x272   : > { %3083 = vmatpush1.bf16.msra.mxu0 %v9158_v44  ;;  %3147 = vmatpush1.bf16.msra.mxu1 %v9159_v46 }
 0x273   : > { %3084 = vmatprep.subr.bf16.mxu0 %v9152_v3  ;;  %3148 = vmatprep.subr.bf16.mxu1 %v9152_v3 }
 0x276   : > { %3085 = vmatpush1.bf16.msra.mxu0 %v9160_v50  ;;  %3149 = vmatpush1.bf16.msra.mxu1 %v9161_v63 }
 0x277   : > { %3086 = vmatprep.subr.bf16.mxu0 %v9152_v3  ;;  %3150 = vmatprep.subr.bf16.mxu1 %v9152_v3 }
 0x27a   : > { %3087 = vmatpush1.bf16.msra.mxu0 %v9162_v8  ;;  %3151 = vmatpush1.bf16.msra.mxu1 %v9163_v62 }
 0x27b   : > { %3088 = vmatprep.subr.bf16.mxu0 %v9152_v3  ;;  %3152 = vmatprep.subr.bf16.mxu1 %v9152_v3 }
 0x27e   : > { %3089 = vmatpush1.bf16.msra.mxu0 %v9164_v9  ;;  %3153 = vmatpush1.bf16.msra.mxu1 %v9165_v27 }
 0x27f   : > { %3090 = vmatprep.subr.bf16.mxu0 %v9152_v3  ;;  %3154 = vmatprep.subr.bf16.mxu1 %v9152_v3 }
 0x282   : > { %3091 = vmatpush1.bf16.msra.mxu0 %v9166_v4  ;;  %3155 = vmatpush1.bf16.msra.mxu1 %v9167_v33 }
 0x283   : > { %v1910_v22 = vpop.f32.mrb[16].mxu0  ;;  %v2095_v47 = vpop.f32.mrb[32].mxu1  ;;  %3092 = vmatprep.subr.bf16.mxu0 %v9152_v3  ;;  %3156 = vmatprep.subr.bf16.mxu1 %v9152_v3 }
 0x284   : > { %v2125_v16 = vmax.f32 %v1910_v22, %v2095_v47  ;;  %v1912_v41 = vpop.f32.mrb[17].mxu0  ;;  %v2097_v20 = vpop.f32.mrb[33].mxu1 }
 0x285   : > { %v1913_v45 = vpop.f32.mrb[18].mxu0  ;;  %v2098_v58 = vpop.f32.mrb[34].mxu1 }
 0x286   : > { %v2126_v53 = vmax.f32 %v1913_v45, %v2098_v58  ;;  %v1915_v51 = vpop.f32.mrb[19].mxu0  ;;  %v2100_v49 = vpop.f32.mrb[35].mxu1  ;;  %3093 = vmatpush1.bf16.msra.mxu0 %v9168_v59  ;;  %3157 = vmatpush1.bf16.msra.mxu1 %v9169_v48 }
 0x287   : > { %3094 = vmatprep.subr.bf16.mxu0 %v9152_v3  ;;  %3158 = vmatprep.subr.bf16.mxu1 %v9152_v3 }
 0x288   : > { %v8149_v15 = vpack.c.bf16 %v2126_v53, %v2125_v16 }
 0x28a   : > { %3095 = vmatpush1.bf16.msra.mxu0 %v9170_v26  ;;  %3159 = vmatpush1.bf16.msra.mxu1 %v9171_v56 }
 0x28b   : > { %v1918_v32 = vpop.f32.mrb[20].mxu0  ;;  %v2103_v10 = vpop.f32.mrb[36].mxu1  ;;  %4218 = vmatprep.subr.bf16.mxu1 %v6957_v39  ;;  %3335 = vmatprep.subr.bf16.mxu0 %v6957_v39  ;;  %v6961_v39 = vld [vmem:[%s9099_s4 + $0x98] ss:$8 sps:$4 sm:$0xff]  }
 0x28c   : > { %v2127_v5 = vmax.f32 %v1918_v32, %v2103_v10  ;;  %v1920_v60 = vpop.f32.mrb[21].mxu0  ;;  %v2105_v7 = vpop.f32.mrb[37].mxu1 }
 0x28d   : > { %v1921_v17 = vpop.f32.mrb[22].mxu0  ;;  %v2106_v23 = vpop.f32.mrb[38].mxu1 }
 0x28e   : > { %v2128_v24 = vmax.f32 %v1921_v17, %v2106_v23  ;;  %v1923_v2 = vpop.f32.mrb[23].mxu0  ;;  %v2108_v28 = vpop.f32.mrb[39].mxu1 }
 0x290   : > { %v8153_v12 = vpack.c.bf16 %v2128_v24, %v2127_v5  ;;  %v6955_v5 = vld [vmem:[%s9099_s4 + $0x78] ss:$8 sps:$4 sm:$0xff]   ;;  %v6960_v24 = vld [vmem:[%s9099_s4 + $0x8c] ss:$8 sps:$4 sm:$0xff]  }
 0x293   : > { %v1926_v6 = vpop.f32.mrb[24].mxu0  ;;  %v2111_v55 = vpop.f32.mrb[40].mxu1 }
 0x294   : > { %v2129_v52 = vmax.f32 %v1926_v6, %v2111_v55  ;;  %v1928_v57 = vpop.f32.mrb[25].mxu0  ;;  %v2113_v54 = vpop.f32.mrb[41].mxu1 }
 0x295   : > { %v1929_v19 = vpop.f32.mrb[26].mxu0  ;;  %v2114_v61 = vpop.f32.mrb[42].mxu1 }
 0x296   : > { %v2130_v1 = vmax.f32 %v1929_v19, %v2114_v61  ;;  %v1931_v31 = vpop.f32.mrb[27].mxu0  ;;  %v2116_v14 = vpop.f32.mrb[43].mxu1  ;;  %v6963_v19 = vld [vmem:[%s9099_s4 + $0x9c] ss:$8 sps:$4 sm:$0xff]  }
 0x298   : > { %v8155_v34 = vpack.c.bf16 %v2130_v1, %v2129_v52  ;;  %v6958_v52 = vld [vmem:[%s9099_s4 + $0x88] ss:$8 sps:$4 sm:$0xff]  }
 0x29b   : > { %v1934_v18 = vpop.f32.mrb[28].mxu0  ;;  %v2119_v29 = vpop.f32.mrb[44].mxu1 }
 0x29c   : > { %v8157_v21 = vmax.f32 %v1934_v18, %v2119_v29  ;;  %v1936_v0 = vpop.f32.mrb[29].mxu0  ;;  %v2121_v35 = vpop.f32.mrb[45].mxu1 }
 0x29d   : > { %v1937_v25 = vpop.f32.mrb[30].mxu0  ;;  %v2122_v36 = vpop.f32.mrb[46].mxu1 }
 0x29e   : > { %v1938_v37 = vpop.f32.mrb[31].mxu0  ;;  %v2123_v38 = vpop.f32.mrb[47].mxu1 }
 0x323   : > { %v2517_v30 = vpop.f32.mrb[32].mxu0  ;;  %v2953_v40 = vpop.f32.mrb[48].mxu1 }
 0x324   : > { %v3004_v42 = vmax.f32 %v2517_v30, %v2953_v40  ;;  %v2519_v43 = vpop.f32.mrb[33].mxu0  ;;  %v2955_v44 = vpop.f32.mrb[49].mxu1 }
 0x325   : > { %v3005_v46 = vmax.f32 %v2519_v43, %v2955_v44  ;;  %v2521_v50 = vpop.f32.mrb[34].mxu0  ;;  %v2957_v63 = vpop.f32.mrb[50].mxu1  ;;  %v6966_v44 = vld [vmem:[%s9099_s4 + $0xac] ss:$8 sps:$4 sm:$0xff]  }
 0x326   : > { %v3018_v8 = vadd.f32 %v3004_v42, %v7870_v11  ;;  %v3006_v62 = vmax.f32 %v2521_v50, %v2957_v63  ;;  %v2523_v9 = vpop.f32.mrb[35].mxu0  ;;  %v2959_v27 = vpop.f32.mrb[51].mxu1 }
 0x327   : > { %v3019_v4 = vadd.f32 %v3005_v46, %v7874_v13  ;;  %v3007_v33 = vmax.f32 %v2523_v9, %v2959_v27 }
 0x328   : > { %v3020_v22 = vadd.f32 %v3006_v62, %v7870_v11  ;;  %v3032_v16 = vmax.f32 %v3018_v8, 0.0  ;;  %v6964_v62 = vld [vmem:[%s9099_s4 + $0xa8] ss:$8 sps:$4 sm:$0xff]  }
 0x329   : > { %v3021_v47 = vadd.f32 %v3007_v33, %v7874_v13  ;;  %v3033_v20 = vmax.f32 %v3019_v4, 0.0  ;;  %v6969_v4 = vld [vmem:[%s9099_s4 + $0xbc] ss:$8 sps:$4 sm:$0xff]  }
 0x32a   : > { %v3034_v41 = vmax.f32 %v3020_v22, 0.0 }
 0x32b   : > { %v3035_v45 = vmax.f32 %v3021_v47, 0.0  ;;  %v2527_v58 = vpop.f32.mrb[36].mxu0  ;;  %v2963_v53 = vpop.f32.mrb[52].mxu1 }
 0x32c   : > { %v3046_v51 = vpack.c.bf16 %v3034_v41, %v3032_v16  ;;  %v3008_v49 = vmax.f32 %v2527_v58, %v2963_v53  ;;  %v2529_v59 = vpop.f32.mrb[37].mxu0  ;;  %v2965_v48 = vpop.f32.mrb[53].mxu1 }
 0x32d   : > { %v3047_v26 = vpack.c.bf16 %v3035_v45, %v3033_v20  ;;  %v3009_v56 = vmax.f32 %v2529_v59, %v2965_v48  ;;  %v2531_v32 = vpop.f32.mrb[38].mxu0  ;;  %v2967_v10 = vpop.f32.mrb[54].mxu1  ;;  %v6967_v48 = vld [vmem:[%s9099_s4 + $0xb8] ss:$8 sps:$4 sm:$0xff]  }
 0x32e   : > { %v3022_v60 = vadd.f32 %v3008_v49, %v7870_v11  ;;  %v3010_v7 = vmax.f32 %v2531_v32, %v2967_v10  ;;  %v2533_v17 = vpop.f32.mrb[39].mxu0  ;;  %v2969_v23 = vpop.f32.mrb[55].mxu1  ;;  %v6972_v10 = vld [vmem:[%s9099_s4 + $0xcc] ss:$8 sps:$4 sm:$0xff]  }
 0x32f   : > { %v3023_v2 = vadd.f32 %v3009_v56, %v7874_v13  ;;  %v3011_v28 = vmax.f32 %v2533_v17, %v2969_v23  ;;  %5999 = vmatprep.mubr.msk.bf16.mxu0 %vm1863_vm3, %v3047_v26  ;;  %6003 = vmatprep.mubr.msk.bf16.mxu1 %vm1863_vm3, %v3047_v26  ;;  %v6021_v23 = vld [vmem:[%s9099_s4 + $0xe8] sm:$0xff] }
 0x330   : > { %v3024_v6 = vadd.f32 %v3010_v7, %v7870_v11  ;;  %3099 = vmatmul.mubr.bf16.vlgmr.msra.gmra.mrb[48].mxu0 %v3046_v51  ;;  %3163 = vmatmul.mubr.bf16.vlgmr.msra.gmra.mrb[64].mxu1 %v3046_v51  ;;  %v3036_v57 = vmax.f32 %v3022_v60, 0.0  ;;  %v6970_v7 = vld [vmem:[%s9099_s4 + $0xc8] ss:$8 sps:$4 sm:$0xff]  }
 0x331   : > { %v3025_v55 = vadd.f32 %v3011_v28, %v7874_v13  ;;  %4219 = vmatpush1.bf16.msra.mxu1 %v6955_v5  ;;  %3336 = vmatpush1.bf16.msra.mxu0 %v6955_v5  ;;  %v3037_v61 = vmax.f32 %v3023_v2, 0.0  ;;  %v6973_v28 = vld [vmem:[%s9099_s4 + $0xd8] ss:$8 sps:$4 sm:$0xff]  }
 0x332   : > { %v3038_v54 = vmax.f32 %v3024_v6, 0.0  ;;  %4220 = vmatprep.subr.bf16.mxu1 %v6960_v24  ;;  %3337 = vmatprep.subr.bf16.mxu0 %v6960_v24  ;;  %v3588_v24 = vshll.u32 %v8149_v15, 16  ;;  %v6037_v6 = vcombine.high %v6021_v23, %v6021_v23 }
 0x333   : > { %v3039_v1 = vmax.f32 %v3025_v55, 0.0  ;;  %v2537_v31 = vpop.f32.mrb[40].mxu0  ;;  %v2973_v14 = vpop.f32.mrb[56].mxu1  ;;  %v6036_v55 = vcombine.low %v6021_v23, %v6021_v23  ;;  %v8381_v23 = vld [vmem:[%s9099_s4 + $0x100] ss:$8 sps:$4 sm:$0xff]  }
 0x334   : > { %v3012_v18 = vmax.f32 %v2537_v31, %v2973_v14  ;;  %v2539_v29 = vpop.f32.mrb[41].mxu0  ;;  %v2975_v0 = vpop.f32.mrb[57].mxu1  ;;  %v3048_v35 = vpack.c.bf16 %v3038_v54, %v3036_v57  ;;  %v3590_v57 = vrot.slane %v3588_v24, 1  ;;  %v8240_v14 = vld [vmem:[%s9099_s4] ss:$8 sps:$4 sm:$0xff]  }
 0x335   : > { %v3049_v25 = vpack.c.bf16 %v3039_v1, %v3037_v61  ;;  %v3013_v36 = vmax.f32 %v2539_v29, %v2975_v0  ;;  %v2541_v37 = vpop.f32.mrb[42].mxu0  ;;  %v2977_v38 = vpop.f32.mrb[58].mxu1  ;;  %4221 = vmatpush1.bf16.msra.mxu1 %v6958_v52  ;;  %3338 = vmatpush1.bf16.msra.mxu0 %v6958_v52  ;;  %v3592_v52 = vshll.u32 %v8153_v12, 16  ;;  %v3330_v54 = vsel %vm3328_vm4, %v6036_v55, 0  ;;  %v8388_v55 = vld [vmem:[%s9099_s4 + $0x114] ss:$8 sps:$4 sm:$0xff]  }
 0x336   : > { %v3026_v30 = vadd.f32 %v3012_v18, %v7870_v11  ;;  %v3014_v40 = vmax.f32 %v2541_v37, %v2977_v38  ;;  %v2543_v42 = vpop.f32.mrb[43].mxu0  ;;  %v2979_v43 = vpop.f32.mrb[59].mxu1  ;;  %4222 = vmatprep.subr.bf16.mxu1 %v6963_v19  ;;  %3339 = vmatprep.subr.bf16.mxu0 %v6963_v19  ;;  %v6980_v19 = vld [vmem:[%s9099_s4 + $0x4] ss:$8 sps:$4 sm:$0xff]   ;;  %v3586_v61 = vshrl.u32 %v8149_v15, 16  ;;  %v3599_v0 = vshll.u32 %v8155_v34, 16 }
 0x337   : > { %v3027_v46 = vadd.f32 %v3013_v36, %v7874_v13  ;;  %v3015_v50 = vmax.f32 %v2543_v42, %v2979_v43  ;;  %6000 = vmatprep.mubr.msk.bf16.mxu0 %vm1863_vm3, %v3049_v25  ;;  %6004 = vmatprep.mubr.msk.bf16.mxu1 %vm1863_vm3, %v3049_v25  ;;  %v3594_v1 = vrot.slane %v3592_v52, 1  ;;  %v8245_v18 = vld [vmem:[%s9099_s4 + $0x14] ss:$8 sps:$4 sm:$0xff]   ;;  %v8264_v25 = vld [vmem:[%s9099_s4 + $0x24] ss:$8 sps:$4 sm:$0xff]   ;;  %v8268_v36 = vpack.c.bf16 %v8157_v21, %v8157_v21 }
 0x338   : > { %v3028_v63 = vadd.f32 %v3014_v40, %v7870_v11  ;;  %3107 = vmatmul.mubr.bf16.gmra.mrb[52].mxu0 %v3048_v35  ;;  %3171 = vmatmul.mubr.bf16.gmra.mrb[68].mxu1 %v3048_v35  ;;  %v3040_v9 = vmax.f32 %v3026_v30, 0.0  ;;  %v3591_v31 = vor.u32 %v3590_v57, %v3586_v61  ;;  %v8258_v35 = vld [vmem:[%s9099_s4 + $0x10] ss:$8 sps:$4 sm:$0xff]   ;;  %v3596_v37 = vshrl.u32 %v8153_v12, 16  ;;  %v8275_v30 = vld [vmem:[%s9099_s4 + $0x20] ss:$8 sps:$4 sm:$0xff]  }
 0x339   : > { %v3029_v8 = vadd.f32 %v3015_v50, %v7874_v13  ;;  %4223 = vmatpush1.bf16.msra.mxu1 %v6961_v39  ;;  %3340 = vmatpush1.bf16.msra.mxu0 %v6961_v39  ;;  %v3041_v33 = vmax.f32 %v3027_v46, 0.0  ;;  %v3601_v38 = vrot.slane %v3599_v0, 1  ;;  %v8281_v40 = vld [vmem:[%s9099_s4 + $0x34] ss:$8 sps:$4 sm:$0xff]   ;;  %v3606_v42 = vshll.u32 %v8268_v36, 16 }
 0x33a   : > { %v3042_v27 = vmax.f32 %v3028_v63, 0.0  ;;  %4224 = vmatprep.subr.bf16.mxu1 %v6966_v44  ;;  %3341 = vmatprep.subr.bf16.mxu0 %v6966_v44  ;;  %v8248_v29 = vsel %vm1096_vm2, %v3591_v31, %v3594_v1  ;;  %v3598_v39 = vor.u32 %v3596_v37, %v3594_v1  ;;  %v8294_v43 = vld [vmem:[%s9099_s4 + $0x30] ss:$8 sps:$4 sm:$0xff]   ;;  %v8300_v44 = vld [vmem:[%s9099_s4 + $0x44] ss:$8 sps:$4 sm:$0xff]   ;;  %v3603_v46 = vshrl.u32 %v8155_v34, 16 }
 0x33b   : > { %v3043_v22 = vmax.f32 %v3029_v8, 0.0  ;;  %v2547_v47 = vpop.f32.mrb[44].mxu0  ;;  %v2983_v16 = vpop.f32.mrb[60].mxu1  ;;  %v3608_v50 = vrot.slane %v3606_v42, 1  ;;  %v8307_v8 = vld [vmem:[%s9099_s4 + $0x40] ss:$8 sps:$4 sm:$0xff]  }
 0x33c   : > { %v3016_v41 = vmax.f32 %v2547_v47, %v2983_v16  ;;  %v2549_v20 = vpop.f32.mrb[45].mxu0  ;;  %v2985_v45 = vpop.f32.mrb[61].mxu1  ;;  %v3050_v58 = vpack.c.bf16 %v3042_v27, %v3040_v9  ;;  %v8284_v21 = vsel %vm1096_vm2, %v3598_v39, %v3601_v38  ;;  %v3605_v63 = vor.u32 %v3603_v46, %v3601_v38  ;;  %v8325_v27 = vld [vmem:[%s9099_s4 + $0x50] ss:$8 sps:$4 sm:$0xff]  }
 0x33d   : > { %v3051_v53 = vpack.c.bf16 %v3043_v22, %v3041_v33  ;;  %v3017_v51 = vmax.f32 %v2549_v20, %v2985_v45  ;;  %v2551_v49 = vpop.f32.mrb[46].mxu0  ;;  %v2987_v59 = vpop.f32.mrb[62].mxu1  ;;  %4225 = vmatpush1.bf16.msra.mxu1 %v6964_v62  ;;  %3342 = vmatpush1.bf16.msra.mxu0 %v6964_v62  ;;  %v8313_v62 = vld [vmem:[%s9099_s4 + $0x54] ss:$8 sps:$4 sm:$0xff]   ;;  %v3610_v33 = vshrl.u32 %v8268_v36, 16 }
 0x33e   : > { %v3030_v26 = vadd.f32 %v3016_v41, %v7870_v11  ;;  %v2552_v56 = vpop.f32.mrb[47].mxu0  ;;  %v2988_v32 = vpop.f32.mrb[63].mxu1  ;;  %4226 = vmatprep.subr.bf16.mxu1 %v6969_v4  ;;  %3343 = vmatprep.subr.bf16.mxu0 %v6969_v4  ;;  %v8316_v9 = vsel %vm1096_vm2, %v3605_v63, %v3608_v50  ;;  %v8331_v4 = vld [vmem:[%s9099_s4 + $0x64] ss:$8 sps:$4 sm:$0xff]   ;;  %v8338_v22 = vld [vmem:[%s9099_s4 + $0x60] ss:$8 sps:$4 sm:$0xff]  }
 0x33f   : > { %v3031_v5 = vadd.f32 %v3017_v51, %v7874_v13  ;;  %6001 = vmatprep.mubr.msk.bf16.mxu0 %vm1863_vm3, %v3051_v53  ;;  %6005 = vmatprep.mubr.msk.bf16.mxu1 %vm1863_vm3, %v3051_v53  ;;  %v6975_v13 = vld [vmem:[%s9099_s4 + $0xdc] ss:$8 sps:$4 sm:$0xff]   ;;  %v8340_v47 = vor.u32 %v3610_v33, %v3608_v50  ;;  %v3219_v16 = vld [vmem:[%s9099_s4 + $0x70] sm:$0xff] }
 0x340   : > { %3115 = vmatmul.mubr.bf16.gmra.mrb[56].mxu0 %v3050_v58  ;;  %3179 = vmatmul.mubr.bf16.gmra.mrb[72].mxu1 %v3050_v58  ;;  %v3044_v11 = vmax.f32 %v3030_v26, 0.0  ;;  %v8350_v41 = vcombine.high %v3219_v16, %v3219_v16  ;;  %v6057_v20 = vcombine.low %v3219_v16, %v3219_v16  ;;  %v8361_v58 = vld [vmem:[%s9099_s4 + $0xf4] ss:$8 sps:$4 sm:$0xff]   ;;  %v8397_v1 = vld [vmem:[%s9099_s4 + $0x110] ss:$8 sps:$4 sm:$0xff]  }
 0x341   : > { %v3045_v60 = vmax.f32 %v3031_v5, 0.0  ;;  %4227 = vmatpush1.bf16.msra.mxu1 %v6967_v48  ;;  %3344 = vmatpush1.bf16.msra.mxu0 %v6967_v48  ;;  %v8420_v33 = vld [vmem:[%s9099_s4 + $0x134] ss:$8 sps:$4 sm:$0xff]  }
 0x342   : > { %4228 = vmatprep.subr.bf16.mxu1 %v6972_v10  ;;  %3345 = vmatprep.subr.bf16.mxu0 %v6972_v10  ;;  %v3052_v2 = vpack.c.bf16 %v3044_v11, %v3044_v11  ;;  %v8355_v45 = vsel %vm3328_vm4, %v6057_v20, 0 }
 0x343   : > { %v3053_v17 = vpack.c.bf16 %v3045_v60, %v3045_v60  ;;  %v8367_v60 = vld [vmem:[%s9099_s4 + $0xf0] ss:$8 sps:$4 sm:$0xff]  }
 0x345   : > { %6002 = vmatprep.mubr.msk.bf16.mxu0 %vm1863_vm3, %v3053_v17  ;;  %6006 = vmatprep.mubr.msk.bf16.mxu1 %vm1863_vm3, %v3053_v17 }
 0x346   : > { %4229 = vmatpush1.bf16.msra.mxu1 %v6970_v7  ;;  %3346 = vmatpush1.bf16.msra.mxu0 %v6970_v7  ;;  %v8372_v7 = vld [vmem:[%s9099_s4 + $0x104] ss:$8 sps:$4 sm:$0xff]  }
 0x347   : > { %4230 = vmatprep.subr.bf16.mxu1 %v6975_v13  ;;  %3347 = vmatprep.subr.bf16.mxu0 %v6975_v13 }
 0x348   : > { %3123 = vmatmul.mubr.bf16.gmra.mrb[60].mxu0 %v3052_v2  ;;  %3187 = vmatmul.mubr.bf16.gmra.mrb[76].mxu1 %v3052_v2 }
 0x349   : > { %4250 = vmatprep.mubr.bf16.mxu1 %v9152_v3  ;;  %3367 = vmatprep.mubr.bf16.mxu0 %v9152_v3 }
 0x34a   : > { %4231 = vmatpush1.bf16.msra.mxu1 %v6973_v28  ;;  %3348 = vmatpush1.bf16.msra.mxu0 %v6973_v28 }
 0x34b   : > { %6172 = vmatprep.subr.msk.bf16.mxu1 %vm3328_vm4, %v6037_v6  ;;  %6038 = vmatprep.subr.msk.bf16.mxu0 %vm3328_vm4, %v6037_v6 }
 0x34e   : > { %4233 = vmatpush1.bf16.msra.mxu1 %v3330_v54  ;;  %3350 = vmatpush1.bf16.msra.mxu0 %v3330_v54 }
 0x34f   : > { %4289 = vmatprep.subr.bf16.mxu1 %v6980_v19  ;;  %3499 = vmatprep.subr.bf16.mxu0 %v6980_v19 }
 0x351   : > { %6173 = vmatmul.mubr.msk.bf16.vlgmr.msra.gmra.mrb[80].mxu1 %vm3315_vm5, %v8248_v29 }
 0x352   : > { %4260 = vmatprep.mubr.bf16.mxu1 %v9152_v3  ;;  %4290 = vmatpush1.bf16.msra.mxu1 %v8240_v14 }
 0x353   : > { %4291 = vmatprep.subr.bf16.mxu1 %v8245_v18 }
 0x356   : > { %4292 = vmatpush1.bf16.msra.mxu1 %v8258_v35 }
 0x357   : > { %4293 = vmatprep.subr.bf16.mxu1 %v8264_v25 }
 0x359   : > { %6174 = vmatmul.mubr.msk.bf16.gmra.mrb[84].mxu1 %vm3315_vm5, %v8284_v21 }
 0x35a   : > { %4270 = vmatprep.mubr.bf16.mxu1 %v9152_v3  ;;  %4294 = vmatpush1.bf16.msra.mxu1 %v8275_v30 }
 0x35b   : > { %4295 = vmatprep.subr.bf16.mxu1 %v8281_v40 }
 0x35e   : > { %4296 = vmatpush1.bf16.msra.mxu1 %v8294_v43 }
 0x35f   : > { %4297 = vmatprep.subr.bf16.mxu1 %v8300_v44 }
 0x361   : > { %6175 = vmatmul.mubr.msk.bf16.gmra.mrb[88].mxu1 %vm3315_vm5, %v8316_v9 }
 0x362   : > { %4280 = vmatprep.mubr.bf16.mxu1 %v9152_v3  ;;  %4298 = vmatpush1.bf16.msra.mxu1 %v8307_v8 }
 0x363   : > { %4299 = vmatprep.subr.bf16.mxu1 %v8313_v62 }
 0x366   : > { %4300 = vmatpush1.bf16.msra.mxu1 %v8325_v27 }
 0x367   : > { %4301 = vmatprep.subr.bf16.mxu1 %v8331_v4 }
 0x369   : > { %6176 = vmatmul.mubr.msk.bf16.gmra.mrb[92].mxu1 %vm3315_vm5, %v8340_v47 }
 0x36a   : > { %4302 = vmatpush1.bf16.msra.mxu1 %v8338_v22  ;;  %4321 = vmatprep.mubr.bf16.mxu1 %v9152_v3 }
 0x36b   : > { %6177 = vmatprep.subr.msk.bf16.mxu1 %vm3328_vm4, %v8350_v41 }
 0x36e   : > { %4304 = vmatpush1.bf16.msra.mxu1 %v8355_v45 }
 0x36f   : > { %4360 = vmatprep.subr.bf16.mxu1 %v8361_v58 }
 0x403   : > { %v3100_v53 = vpop.f32.mrb[48].mxu0  ;;  %v3164_v51 = vpop.f32.mrb[64].mxu1 }
 0x404   : > { %v3194_v49 = vmax.f32 %v3100_v53, %v3164_v51  ;;  %v3102_v59 = vpop.f32.mrb[49].mxu0  ;;  %v3166_v48 = vpop.f32.mrb[65].mxu1 }
 0x405   : > { %v3103_v26 = vpop.f32.mrb[50].mxu0  ;;  %v3167_v56 = vpop.f32.mrb[66].mxu1 }
 0x406   : > { %v3195_v32 = vmax.f32 %v3103_v26, %v3167_v56  ;;  %v3105_v10 = vpop.f32.mrb[51].mxu0  ;;  %v3169_v5 = vpop.f32.mrb[67].mxu1  ;;  %v8435_v26 = vld [vmem:[%s9099_s4 + $0x130] ss:$8 sps:$4 sm:$0xff]  }
 0x408   : > { %v3220_v11 = vpack.c.bf16 %v3195_v32, %v3194_v49  ;;  %v8442_v32 = vld [vmem:[%s9099_s4 + $0x144] ss:$8 sps:$4 sm:$0xff]  }
 0x40a   : > { %6039 = vmatmul.mubr.msk.bf16.vlgmr.msra.gmra.mrb[64].mxu0 %vm3315_vm5, %v3220_v11  ;;  %6178 = vmatmul.mubr.msk.bf16.vlgmr.msra.gmra.mrb[80].mxu1 %vm3315_vm5, %v3220_v11  ;;  %v3809_v24 = vshll.u32 %v3220_v11, 16  ;;  %v3807_v0 = vshrl.u32 %v3220_v11, 16  ;;  %v4534_v37 = vrot.slane %v3220_v11, 1 }
 0x40b   : > { %v3108_v17 = vpop.f32.mrb[52].mxu0  ;;  %v3172_v13 = vpop.f32.mrb[68].mxu1  ;;  %3500 = vmatpush1.bf16.msra.mxu0 %v8240_v14  ;;  %4361 = vmatpush1.bf16.msra.mxu1 %v8367_v60  ;;  %v8404_v14 = vld [vmem:[%s9099_s4 + $0x124] ss:$8 sps:$4 sm:$0xff]  }
 0x40c   : > { %v3196_v2 = vmax.f32 %v3108_v17, %v3172_v13  ;;  %v3110_v28 = vpop.f32.mrb[53].mxu0  ;;  %v3174_v6 = vpop.f32.mrb[69].mxu1  ;;  %3501 = vmatprep.subr.bf16.mxu0 %v8245_v18  ;;  %4362 = vmatprep.subr.bf16.mxu1 %v8372_v7  ;;  %v3811_v18 = vrot.slane %v3809_v24, 1 }
 0x40d   : > { %v3111_v52 = vpop.f32.mrb[54].mxu0  ;;  %v3175_v57 = vpop.f32.mrb[70].mxu1  ;;  %3377 = vmatprep.mubr.bf16.mxu0 %v9152_v3  ;;  %4331 = vmatprep.mubr.bf16.mxu1 %v9152_v3  ;;  %v8458_v28 = vld [vmem:[%s9099_s4 + $0x154] ss:$8 sps:$4 sm:$0xff]  }
 0x40e   : > { %v3197_v54 = vmax.f32 %v3111_v52, %v3175_v57  ;;  %v3113_v19 = vpop.f32.mrb[55].mxu0  ;;  %v3177_v61 = vpop.f32.mrb[71].mxu1 }
 0x40f   : > { %3502 = vmatpush1.bf16.msra.mxu0 %v8258_v35  ;;  %4363 = vmatpush1.bf16.msra.mxu1 %v8381_v23 }
 0x410   : > { %v3221_v31 = vpack.c.bf16 %v3197_v54, %v3196_v2  ;;  %3503 = vmatprep.subr.bf16.mxu0 %v8264_v25  ;;  %4364 = vmatprep.subr.bf16.mxu1 %v8388_v55  ;;  %v8413_v25 = vld [vmem:[%s9099_s4 + $0x120] ss:$8 sps:$4 sm:$0xff]  }
 0x412   : > { %6040 = vmatmul.mubr.msk.bf16.gmra.mrb[68].mxu0 %vm3315_vm5, %v3221_v31  ;;  %6179 = vmatmul.mubr.msk.bf16.gmra.mrb[84].mxu1 %vm3315_vm5, %v3221_v31  ;;  %v3813_v35 = vshll.u32 %v3221_v31, 16  ;;  %v4535_v38 = vrot.slane %v3221_v31, 1 }
 0x413   : > { %v3116_v39 = vpop.f32.mrb[56].mxu0  ;;  %v3180_v42 = vpop.f32.mrb[72].mxu1  ;;  %3504 = vmatpush1.bf16.msra.mxu0 %v8275_v30  ;;  %4365 = vmatpush1.bf16.msra.mxu1 %v8397_v1  ;;  %v3812_v30 = vor.u32 %v3811_v18, %v3807_v0  ;;  %v8478_v0 = vld [vmem:[%s9099_s4 + $0x150] ss:$8 sps:$4 sm:$0xff]  }
 0x414   : > { %v3198_v46 = vmax.f32 %v3116_v39, %v3180_v42  ;;  %v3118_v50 = vpop.f32.mrb[57].mxu0  ;;  %v3182_v63 = vpop.f32.mrb[73].mxu1  ;;  %3505 = vmatprep.subr.bf16.mxu0 %v8281_v40  ;;  %4366 = vmatprep.subr.bf16.mxu1 %v8404_v14  ;;  %v3815_v16 = vrot.slane %v3813_v35, 1  ;;  %v8423_v20 = vsel %vm4032_vm6, %v4534_v37, %v4535_v38 }
 0x415   : > { %v3119_v53 = vpop.f32.mrb[58].mxu0  ;;  %v3183_v51 = vpop.f32.mrb[74].mxu1  ;;  %3387 = vmatprep.mubr.bf16.mxu0 %v9152_v3  ;;  %4341 = vmatprep.mubr.bf16.mxu1 %v9152_v3  ;;  %v8509_v63 = vld [vmem:[%s9099_s4 + $0x16c] ss:$8 sps:$4 sm:$0xff]  }
 0x416   : > { %v3199_v49 = vmax.f32 %v3119_v53, %v3183_v51  ;;  %v3121_v40 = vpop.f32.mrb[59].mxu0  ;;  %v3185_v59 = vpop.f32.mrb[75].mxu1  ;;  %v8428_v48 = vsel %vm1096_vm2, %v3812_v30, %v3815_v16  ;;  %v8628_v51 = vld [vmem:[%s9099_s4 + $0x1c8] ss:$8 sps:$4 sm:$0xff]  }
 0x417   : > { %3506 = vmatpush1.bf16.msra.mxu0 %v8294_v43  ;;  %4367 = vmatpush1.bf16.msra.mxu1 %v8413_v25  ;;  %v3817_v43 = vshrl.u32 %v3221_v31, 16 }
 0x418   : > { %v3222_v56 = vpack.c.bf16 %v3199_v49, %v3198_v46  ;;  %3507 = vmatprep.subr.bf16.mxu0 %v8300_v44  ;;  %4368 = vmatprep.subr.bf16.mxu1 %v8420_v33  ;;  %v8451_v44 = vld [vmem:[%s9099_s4 + $0x140] ss:$8 sps:$4 sm:$0xff]  }
 0x419   : > { %v3819_v6 = vor.u32 %v3817_v43, %v3815_v16  ;;  %v6114_v16 = vld [vmem:[%s9099_s4 + $0x1d8] sm:$0xff]  ;;  %v4033_v43 = vrot.slane %v8149_v15, 1 }
 0x41a   : > { %6041 = vmatmul.mubr.msk.bf16.gmra.mrb[72].mxu0 %vm3315_vm5, %v3222_v56  ;;  %6180 = vmatmul.mubr.msk.bf16.gmra.mrb[88].mxu1 %vm3315_vm5, %v3222_v56  ;;  %v3820_v10 = vshll.u32 %v3222_v56, 16  ;;  %v4537_v5 = vrot.slane %v3222_v56, 1  ;;  %v8635_v40 = vcombine.high %v6114_v16, %v6114_v16  ;;  %v6129_v59 = vcombine.low %v6114_v16, %v6114_v16 }
 0x41b   : > { %v3124_v11 = vpop.f32.mrb[60].mxu0  ;;  %v3188_v17 = vpop.f32.mrb[76].mxu1  ;;  %3508 = vmatpush1.bf16.msra.mxu0 %v8307_v8  ;;  %4369 = vmatpush1.bf16.msra.mxu1 %v8435_v26  ;;  %v6078_v8 = vld [vmem:[%s9099_s4 + $0x160] sm:$0xff] }
 0x41c   : > { %v3200_v13 = vmax.f32 %v3124_v11, %v3188_v17  ;;  %v3126_v24 = vpop.f32.mrb[61].mxu0  ;;  %v3190_v2 = vpop.f32.mrb[77].mxu1  ;;  %3509 = vmatprep.subr.bf16.mxu0 %v8313_v62  ;;  %4370 = vmatprep.subr.bf16.mxu1 %v8442_v32  ;;  %v3822_v52 = vrot.slane %v3820_v10, 1  ;;  %v8464_v57 = vsel %vm4032_vm6, %v4535_v38, %v4537_v5  ;;  %v8480_v35 = vcombine.high %v6078_v8, %v6078_v8  ;;  %v8664_v10 = vld [vmem:[%s9099_s4 + $0x1e0] ss:$8 sps:$4 sm:$0xff]  }
 0x41d   : > { %v3127_v54 = vpop.f32.mrb[62].mxu0  ;;  %v3191_v19 = vpop.f32.mrb[78].mxu1  ;;  %3397 = vmatprep.mubr.bf16.mxu0 %v9152_v3  ;;  %4351 = vmatprep.mubr.bf16.mxu1 %v9152_v3  ;;  %v6093_v37 = vcombine.low %v6078_v8, %v6078_v8  ;;  %v3824_v38 = vshrl.u32 %v3222_v56, 16  ;;  %v8653_v56 = vld [vmem:[%s9099_s4 + $0x1e4] ss:$8 sps:$4 sm:$0xff]   ;;  %v4036_v11 = vrot.slane %v8155_v34, 1 }
 0x41e   : > { %v8468_v62 = vpack.c.bf16 %v3200_v13, %v3200_v13  ;;  %v3128_v61 = vpop.f32.mrb[63].mxu0  ;;  %v3192_v31 = vpop.f32.mrb[79].mxu1  ;;  %v8471_v18 = vsel %vm1096_vm2, %v3819_v6, %v3822_v52  ;;  %v8702_v17 = vld [vmem:[%s9099_s4 + $0x200] ss:$8 sps:$4 sm:$0xff]   ;;  %v7061_v24 = vld [vmem:[%s9099_s4 + $0x224] ss:$8 sps:$4 sm:$0xff]  }
 0x41f   : > { %3510 = vmatpush1.bf16.msra.mxu0 %v8325_v27  ;;  %4371 = vmatpush1.bf16.msra.mxu1 %v8451_v44  ;;  %v3826_v27 = vor.u32 %v3824_v38, %v3822_v52  ;;  %v8504_v50 = vsel %vm3328_vm4, %v6093_v37, 0  ;;  %v7059_v2 = vld [vmem:[%s9099_s4 + $0x220] ss:$8 sps:$4 sm:$0xff]   ;;  %v7067_v6 = vld [vmem:[%s9099_s4 + $0x244] ss:$8 sps:$4 sm:$0xff]   ;;  %v7079_v37 = vld [vmem:[%s9101_s6 + $0x70] sm:$0xff]  }
 0x420   : > { %3511 = vmatprep.subr.bf16.mxu0 %v8331_v4  ;;  %4372 = vmatprep.subr.bf16.mxu1 %v8458_v28  ;;  %v3827_v39 = vshll.u32 %v8468_v62, 16  ;;  %v4539_v42 = vrot.slane %v8468_v62, 1  ;;  %v3831_v53 = vshrl.u32 %v8468_v62, 16  ;;  %v7065_v52 = vld [vmem:[%s9099_s4 + $0x240] ss:$8 sps:$4 sm:$0xff]  }
 0x421   : > { %v7075_v31 = vld [vmem:[%s9101_s6 + $0x60] sm:$0xff]   ;;  %v7080_v38 = vld [vmem:[%s9101_s6 + $0x28] sm:$0xff]  }
 0x422   : > { %6042 = vmatmul.mubr.msk.bf16.gmra.mrb[76].mxu0 %vm3315_vm5, %v8468_v62  ;;  %6181 = vmatmul.mubr.msk.bf16.gmra.mrb[92].mxu1 %vm3315_vm5, %v8468_v62  ;;  %v8490_v46 = vrot.slane %v3827_v39, 1  ;;  %v8495_v4 = vsel %vm4032_vm6, %v4537_v5, %v4539_v42  ;;  %v8685_v5 = vld [vmem:[%s9099_s4 + $0x1f0] ss:$8 sps:$4 sm:$0xff]  }
 0x423   : > { %3512 = vmatpush1.bf16.msra.mxu0 %v8338_v22  ;;  %4373 = vmatpush1.bf16.msra.mxu1 %v8478_v0  ;;  %v8522_v22 = vld [vmem:[%s9099_s4 + $0x168] ss:$8 sps:$4 sm:$0xff]   ;;  %v7081_v39 = vld [vmem:[%s9101_s6 + $0x78] sm:$0xff]  }
 0x424   : > { %6059 = vmatprep.subr.msk.bf16.mxu0 %vm3328_vm4, %v8350_v41  ;;  %6182 = vmatprep.subr.msk.bf16.mxu1 %vm3328_vm4, %v8480_v35  ;;  %v8513_v30 = vsel %vm1096_vm2, %v3826_v27, %v8490_v46  ;;  %v8529_v41 = vld [vmem:[%s9099_s4 + $0x17c] ss:$8 sps:$4 sm:$0xff]   ;;  %v8632_v49 = vor.u32 %v3831_v53, %v8490_v46  ;;  %v7074_v62 = vld [vmem:[%s9101_s6 + $0x10] sm:$0xff]  }
 0x425   : > { %3531 = vmatprep.mubr.bf16.mxu0 %v9152_v3  ;;  %4392 = vmatprep.mubr.bf16.mxu1 %v9152_v3  ;;  %v7083_v27 = vld [vmem:[%s9101_s6 + $0x80] sm:$0xff]   ;;  %v7084_v46 = vld [vmem:[%s9101_s6 + $0x38] sm:$0xff]  }
 0x427   : > { %3514 = vmatpush1.bf16.msra.mxu0 %v8355_v45  ;;  %4375 = vmatpush1.bf16.msra.mxu1 %v8504_v50  ;;  %v8540_v45 = vld [vmem:[%s9099_s4 + $0x178] ss:$8 sps:$4 sm:$0xff]  }
 0x428   : > { %3706 = vmatprep.subr.bf16.mxu0 %v8361_v58  ;;  %4445 = vmatprep.subr.bf16.mxu1 %v8509_v63  ;;  %v8547_v58 = vld [vmem:[%s9099_s4 + $0x18c] ss:$8 sps:$4 sm:$0xff]  }
 0x42a   : > { %6060 = vmatmul.mubr.msk.bf16.vlgmr.msra.gmra.mrb[64].mxu0 %vm3315_vm5, %v8149_v15  ;;  %6183 = vmatmul.mubr.msk.bf16.vlgmr.msra.gmra.mrb[80].mxu1 %vm3315_vm5, %v8428_v48 }
 0x42b   : > { %3707 = vmatpush1.bf16.msra.mxu0 %v8367_v60  ;;  %4446 = vmatpush1.bf16.msra.mxu1 %v8522_v22  ;;  %v8556_v60 = vld [vmem:[%s9099_s4 + $0x188] ss:$8 sps:$4 sm:$0xff]  }
 0x42c   : > { %3708 = vmatprep.subr.bf16.mxu0 %v8372_v7  ;;  %4447 = vmatprep.subr.bf16.mxu1 %v8529_v41  ;;  %v8563_v7 = vld [vmem:[%s9099_s4 + $0x19c] ss:$8 sps:$4 sm:$0xff]  }
 0x42d   : > { %3541 = vmatprep.mubr.bf16.mxu0 %v9152_v3  ;;  %4402 = vmatprep.mubr.bf16.mxu1 %v9152_v3 }
 0x42f   : > { %3709 = vmatpush1.bf16.msra.mxu0 %v8381_v23  ;;  %4448 = vmatpush1.bf16.msra.mxu1 %v8540_v45  ;;  %v8574_v23 = vld [vmem:[%s9099_s4 + $0x198] ss:$8 sps:$4 sm:$0xff]  }
 0x430   : > { %3710 = vmatprep.subr.bf16.mxu0 %v8388_v55  ;;  %4449 = vmatprep.subr.bf16.mxu1 %v8547_v58  ;;  %v8581_v55 = vld [vmem:[%s9099_s4 + $0x1ac] ss:$8 sps:$4 sm:$0xff]  }
 0x432   : > { %6061 = vmatmul.mubr.msk.bf16.gmra.mrb[68].mxu0 %vm3315_vm5, %v8153_v12  ;;  %6184 = vmatmul.mubr.msk.bf16.gmra.mrb[84].mxu1 %vm3315_vm5, %v8471_v18 }
 0x433   : > { %3711 = vmatpush1.bf16.msra.mxu0 %v8397_v1  ;;  %4450 = vmatpush1.bf16.msra.mxu1 %v8556_v60  ;;  %v8590_v1 = vld [vmem:[%s9099_s4 + $0x1a8] ss:$8 sps:$4 sm:$0xff]  }
 0x434   : > { %3712 = vmatprep.subr.bf16.mxu0 %v8404_v14  ;;  %4451 = vmatprep.subr.bf16.mxu1 %v8563_v7  ;;  %v8597_v14 = vld [vmem:[%s9099_s4 + $0x1bc] ss:$8 sps:$4 sm:$0xff]  }
 0x435   : > { %3551 = vmatprep.mubr.bf16.mxu0 %v9152_v3  ;;  %4412 = vmatprep.mubr.bf16.mxu1 %v9152_v3 }
 0x437   : > { %3713 = vmatpush1.bf16.msra.mxu0 %v8413_v25  ;;  %4452 = vmatpush1.bf16.msra.mxu1 %v8574_v23  ;;  %v8608_v25 = vld [vmem:[%s9099_s4 + $0x1b8] ss:$8 sps:$4 sm:$0xff]  }
 0x438   : > { %3714 = vmatprep.subr.bf16.mxu0 %v8420_v33  ;;  %4453 = vmatprep.subr.bf16.mxu1 %v8581_v55  ;;  %v8615_v33 = vld [vmem:[%s9099_s4 + $0x1cc] ss:$8 sps:$4 sm:$0xff]  }
 0x43a   : > { %6062 = vmatmul.mubr.msk.bf16.gmra.mrb[72].mxu0 %vm3315_vm5, %v8155_v34  ;;  %6185 = vmatmul.mubr.msk.bf16.gmra.mrb[88].mxu1 %vm3315_vm5, %v8513_v30  ;;  %v7056_v34 = vld [vmem:[%s9099_s4 + $0x210] ss:$8 sps:$4 sm:$0xff]  }
 0x43b   : > { %3715 = vmatpush1.bf16.msra.mxu0 %v8435_v26  ;;  %4454 = vmatpush1.bf16.msra.mxu1 %v8590_v1  ;;  %v8648_v26 = vsel %vm3328_vm4, %v6129_v59, 0  ;;  %v4652_v59 = vld [vmem:[%s9100_s5] sm:$0x3] }
 0x43c   : > { %3716 = vmatprep.subr.bf16.mxu0 %v8442_v32  ;;  %4455 = vmatprep.subr.bf16.mxu1 %v8597_v14  ;;  %v4034_v32 = vrot.slane %v8153_v12, 1  ;;  %v8671_v12 = vld [vmem:[%s9099_s4 + $0x1f4] ss:$8 sps:$4 sm:$0xff]  }
 0x43d   : > { %3561 = vmatprep.mubr.bf16.mxu0 %v9152_v3  ;;  %4422 = vmatprep.mubr.bf16.mxu1 %v9152_v3 }
 0x43e   : > { %v8674_v15 = vsel %vm4032_vm6, %v4033_v43, %v4034_v32  ;;  %v8710_v13 = vsel %vm4032_vm6, %v4034_v32, %v4036_v11 }
 0x43f   : > { %3717 = vmatpush1.bf16.msra.mxu0 %v8451_v44  ;;  %4456 = vmatpush1.bf16.msra.mxu1 %v8608_v25  ;;  %v7058_v44 = vld [vmem:[%s9099_s4 + $0x214] ss:$8 sps:$4 sm:$0xff]  }
 0x440   : > { %3718 = vmatprep.subr.bf16.mxu0 %v8458_v28  ;;  %4457 = vmatprep.subr.bf16.mxu1 %v8615_v33  ;;  %v7064_v28 = vld [vmem:[%s9099_s4 + $0x234] ss:$8 sps:$4 sm:$0xff]  }
 0x442   : > { %6063 = vmatmul.mubr.msk.bf16.gmra.mrb[76].mxu0 %vm3315_vm5, %v8268_v36  ;;  %6186 = vmatmul.mubr.msk.bf16.gmra.mrb[92].mxu1 %vm3315_vm5, %v8632_v49 }
 0x443   : > { %3719 = vmatpush1.bf16.msra.mxu0 %v8478_v0  ;;  %4458 = vmatpush1.bf16.msra.mxu1 %v8628_v51  ;;  %v7077_v0 = vld [vmem:[%s9101_s6 + $0x68] sm:$0xff]  }
 0x444   : > { %6095 = vmatprep.subr.msk.bf16.mxu0 %vm3328_vm4, %v8480_v35  ;;  %6187 = vmatprep.subr.msk.bf16.mxu1 %vm3328_vm4, %v8635_v40  ;;  %v7078_v35 = vld [vmem:[%s9101_s6 + $0x20] sm:$0xff]  }
 0x445   : > { %3738 = vmatprep.mubr.bf16.mxu0 %v9152_v3  ;;  %4477 = vmatprep.mubr.bf16.mxu1 %v9152_v3 }
 0x447   : > { %3721 = vmatpush1.bf16.msra.mxu0 %v8504_v50  ;;  %4460 = vmatpush1.bf16.msra.mxu1 %v8648_v26  ;;  %v7086_v50 = vld [vmem:[%s9101_s6 + $0x40] sm:$0xff]  }
 0x448   : > { %3927 = vmatprep.subr.bf16.mxu0 %v8509_v63  ;;  %4553 = vmatprep.subr.bf16.mxu1 %v8653_v56  ;;  %v7087_v63 = vld [vmem:[%s9101_s6 + $0x90] sm:$0xff]  }
 0x44a   : > { %6096 = vmatmul.mubr.msk.bf16.vlgmr.msra.gmra.mrb[64].mxu0 %vm3315_vm5, %v8248_v29  ;;  %6188 = vmatmul.mubr.msk.bf16.vlgmr.msra.gmra.mrb[80].mxu1 %vm3315_vm5, %v8674_v15  ;;  %v8692_v29 = vld [vmem:[%s9099_s4 + $0x204] ss:$8 sps:$4 sm:$0xff]  }
 0x44b   : > { %3928 = vmatpush1.bf16.msra.mxu0 %v8522_v22  ;;  %4554 = vmatpush1.bf16.msra.mxu1 %v8664_v10  ;;  %v7089_v22 = vld [vmem:[%s9101_s6 + $0x98] sm:$0xff]  }
 0x44c   : > { %3929 = vmatprep.subr.bf16.mxu0 %v8529_v41  ;;  %4555 = vmatprep.subr.bf16.mxu1 %v8671_v12  ;;  %v7090_v41 = vld [vmem:[%s9102_s7 + $0x28] sm:$0xff]  }
 0x44d   : > { %3748 = vmatprep.mubr.bf16.mxu0 %v9152_v3  ;;  %4487 = vmatprep.mubr.bf16.mxu1 %v9152_v3 }
 0x44f   : > { %3930 = vmatpush1.bf16.msra.mxu0 %v8540_v45  ;;  %4556 = vmatpush1.bf16.msra.mxu1 %v8685_v5 }
 0x450   : > { %3931 = vmatprep.subr.bf16.mxu0 %v8547_v58  ;;  %4557 = vmatprep.subr.bf16.mxu1 %v8692_v29 }
 0x452   : > { %6097 = vmatmul.mubr.msk.bf16.gmra.mrb[68].mxu0 %vm3315_vm5, %v8284_v21  ;;  %6189 = vmatmul.mubr.msk.bf16.gmra.mrb[84].mxu1 %vm3315_vm5, %v8710_v13  ;;  %v8728_v21 = vrot.slane %v8268_v36, 1  ;;  %v7062_v36 = vld [vmem:[%s9099_s4 + $0x230] ss:$8 sps:$4 sm:$0xff]  }
 0x453   : > { %3932 = vmatpush1.bf16.msra.mxu0 %v8556_v60  ;;  %4558 = vmatpush1.bf16.msra.mxu1 %v8702_v17 }
 0x454   : > { %3933 = vmatprep.subr.bf16.mxu0 %v8563_v7  ;;  %4559 = vmatprep.subr.bf16.mxu1 %v7058_v44  ;;  %v8740_v8 = vsel %vm4032_vm6, %v4036_v11, %v8728_v21 }
 0x455   : > { %3758 = vmatprep.mubr.bf16.mxu0 %v9152_v3  ;;  %4497 = vmatprep.mubr.bf16.mxu1 %v9152_v3 }
 0x457   : > { %3934 = vmatpush1.bf16.msra.mxu0 %v8574_v23  ;;  %4560 = vmatpush1.bf16.msra.mxu1 %v7056_v34 }
 0x458   : > { %3935 = vmatprep.subr.bf16.mxu0 %v8581_v55  ;;  %4561 = vmatprep.subr.bf16.mxu1 %v7061_v24 }
 0x45a   : > { %6098 = vmatmul.mubr.msk.bf16.gmra.mrb[72].mxu0 %vm3315_vm5, %v8316_v9  ;;  %6190 = vmatmul.mubr.msk.bf16.gmra.mrb[88].mxu1 %vm3315_vm5, %v8740_v8  ;;  %v6150_v9 = vld [vmem:[%s9099_s4 + $0x250] sm:$0xff] }
 0x45b   : > { %3936 = vmatpush1.bf16.msra.mxu0 %v8590_v1  ;;  %4562 = vmatpush1.bf16.msra.mxu1 %v7059_v2  ;;  %v6166_v54 = vcombine.high %v6150_v9, %v6150_v9  ;;  %v6165_v19 = vcombine.low %v6150_v9, %v6150_v9 }
 0x45c   : > { %3937 = vmatprep.subr.bf16.mxu0 %v8597_v14  ;;  %4563 = vmatprep.subr.bf16.mxu1 %v7064_v28 }
 0x45d   : > { %3768 = vmatprep.mubr.bf16.mxu0 %v9152_v3  ;;  %4507 = vmatprep.mubr.bf16.mxu1 %v9152_v3  ;;  %v4128_v61 = vsel %vm3328_vm4, %v6165_v19, 0 }
 0x45f   : > { %3938 = vmatpush1.bf16.msra.mxu0 %v8608_v25  ;;  %4564 = vmatpush1.bf16.msra.mxu1 %v7062_v36 }
 0x460   : > { %3939 = vmatprep.subr.bf16.mxu0 %v8615_v33  ;;  %4565 = vmatprep.subr.bf16.mxu1 %v7067_v6 }
 0x462   : > { %6099 = vmatmul.mubr.msk.bf16.gmra.mrb[76].mxu0 %vm3315_vm5, %v8340_v47  ;;  %6191 = vmatmul.mubr.msk.bf16.gmra.mrb[92].mxu1 %vm3315_vm5, %v8728_v21  ;;  %v7070_v47 = vld [vmem:[%s9101_s6] sm:$0xff]  }
 0x463   : > { %3940 = vmatpush1.bf16.msra.mxu0 %v8628_v51  ;;  %4566 = vmatpush1.bf16.msra.mxu1 %v7065_v52 }
 0x464   : > { %6131 = vmatprep.subr.msk.bf16.mxu0 %vm3328_vm4, %v8635_v40  ;;  %6192 = vmatprep.subr.msk.bf16.mxu1 %vm3328_vm4, %v6166_v54 }
 0x465   : > { %3959 = vmatprep.mubr.bf16.mxu0 %v9152_v3  ;;  %4585 = vmatprep.mubr.bf16.mxu1 %v9152_v3 }
 0x467   : > { %3942 = vmatpush1.bf16.msra.mxu0 %v8648_v26  ;;  %4568 = vmatpush1.bf16.msra.mxu1 %v4128_v61  ;;  %v9172_v26 = vld [vmem:[#allocation22_spill] sm:$0xff] }
 0x468   : > { %4133 = vmatprep.subr.bf16.mxu0 %v8653_v56  ;;  %4938 = vmatprep.subr.bf16.mxu1 %v9152_v3  ;;  %v9173_v56 = vsub.s32 0, %v9172_v26 }
 0x46a   : > { %6132 = vmatmul.mubr.msk.bf16.vlgmr.msra.gmra.mrb[64].mxu0 %vm3315_vm5, %v8428_v48  ;;  %6193 = vmatmul.mubr.msk.bf16.vlgmr.msra.gmra.mrb[80].mxu1 %vm3315_vm5, %v8423_v20  ;;  %v7071_v20 = vld [vmem:[%s9101_s6 + $0x50] sm:$0xff]   ;;  %v7072_v48 = vld [vmem:[%s9101_s6 + $0x8] sm:$0xff]   ;;  %v8914_v32 = vrot.slane %v4652_v59, %v9173_v56 }
 0x46b   : > { %4134 = vmatpush1.bf16.msra.mxu0 %v8664_v10  ;;  %3969 = vmatprep.mubr.bf16.mxu0 %v9152_v3  ;;  %v9174_v10 = vsub.s32 1, %v9172_v26 }
 0x46c   : > { %4135 = vmatprep.subr.bf16.mxu0 %v8671_v12  ;;  %4595 = vmatprep.mubr.bf16.mxu1 %v9152_v3 }
 0x46d   : > { %4939 = vmatpush1.bf16.msra.mxu1 %v7071_v20  ;;  %v8918_v12 = vrot.slane %v4652_v59, %v9174_v10 }
 0x46e   : > { %4940 = vmatprep.subr.bf16.mxu1 %v9152_v3 }
 0x46f   : > { %4136 = vmatpush1.bf16.msra.mxu0 %v8685_v5 }
 0x470   : > { %4137 = vmatprep.subr.bf16.mxu0 %v8692_v29 }
 0x472   : > { %6133 = vmatmul.mubr.msk.bf16.gmra.mrb[68].mxu0 %vm3315_vm5, %v8471_v18  ;;  %6194 = vmatmul.mubr.msk.bf16.gmra.mrb[84].mxu1 %vm3315_vm5, %v8464_v57  ;;  %v7073_v57 = vld [vmem:[%s9101_s6 + $0x58] sm:$0xff]  }
 0x473   : > { %4138 = vmatpush1.bf16.msra.mxu0 %v8702_v17  ;;  %3979 = vmatprep.mubr.bf16.mxu0 %v9152_v3  ;;  %v7076_v18 = vld [vmem:[%s9101_s6 + $0x18] sm:$0xff]  }
 0x474   : > { %4139 = vmatprep.subr.bf16.mxu0 %v7058_v44  ;;  %4605 = vmatprep.mubr.bf16.mxu1 %v9152_v3 }
 0x475   : > { %4941 = vmatpush1.bf16.msra.mxu1 %v7073_v57 }
 0x476   : > { %4942 = vmatprep.subr.bf16.mxu1 %v9152_v3 }
 0x477   : > { %4140 = vmatpush1.bf16.msra.mxu0 %v7056_v34 }
 0x478   : > { %4141 = vmatprep.subr.bf16.mxu0 %v7061_v24 }
 0x479   : > { %4943 = vmatpush1.bf16.msra.mxu1 %v7075_v31 }
 0x47a   : > { %6134 = vmatmul.mubr.msk.bf16.gmra.mrb[72].mxu0 %vm3315_vm5, %v8513_v30  ;;  %6195 = vmatmul.mubr.msk.bf16.gmra.mrb[88].mxu1 %vm3315_vm5, %v8495_v4  ;;  %v7085_v4 = vld [vmem:[%s9101_s6 + $0x88] sm:$0xff]  }
 0x47b   : > { %4142 = vmatpush1.bf16.msra.mxu0 %v7059_v2  ;;  %3989 = vmatprep.mubr.bf16.mxu0 %v9152_v3  ;;  %v7088_v30 = vld [vmem:[%s9101_s6 + $0x48] sm:$0xff]  }
 0x47c   : > { %4143 = vmatprep.subr.bf16.mxu0 %v7064_v28  ;;  %4615 = vmatprep.mubr.bf16.mxu1 %v9152_v3 }
 0x47d   : > { %4944 = vmatprep.subr.bf16.mxu1 %v9152_v3 }
 0x47e   : > { %4945 = vmatpush1.bf16.msra.mxu1 %v7077_v0 }
 0x47f   : > { %4144 = vmatpush1.bf16.msra.mxu0 %v7062_v36  ;;  %4946 = vmatprep.subr.bf16.mxu1 %v9152_v3 }
 0x480   : > { %4145 = vmatprep.subr.bf16.mxu0 %v7067_v6 }
 0x482   : > { %6135 = vmatmul.mubr.msk.bf16.gmra.mrb[76].mxu0 %vm3315_vm5, %v8632_v49  ;;  %6196 = vmatmul.mubr.msk.bf16.gmra.mrb[92].mxu1 %vm3315_vm5, %v4539_v42  ;;  %v7082_v42 = vld [vmem:[%s9101_s6 + $0x30] sm:$0xff]  }
 0x483   : > { %4146 = vmatpush1.bf16.msra.mxu0 %v7065_v52  ;;  %4165 = vmatprep.mubr.bf16.mxu0 %v9152_v3 }
 0x484   : > { %6167 = vmatprep.subr.msk.bf16.mxu0 %vm3328_vm4, %v6166_v54  ;;  %4947 = vmatpush1.bf16.msra.mxu1 %v7079_v37 }
 0x485   : > { %4948 = vmatprep.subr.bf16.mxu1 %v9152_v3 }
 0x487   : > { %4148 = vmatpush1.bf16.msra.mxu0 %v4128_v61 }
 0x488   : > { %4793 = vmatprep.subr.bf16.mxu0 %v9152_v3  ;;  %4949 = vmatpush1.bf16.msra.mxu1 %v7081_v39 }
 0x489   : > { %4950 = vmatprep.subr.bf16.mxu1 %v9152_v3 }
 0x48a   : > { %6168 = vmatmul.mubr.msk.bf16.vlgmr.msra.gmra.mrb[64].mxu0 %vm3315_vm5, %v8674_v15 }
 0x48b   : > { %4175 = vmatprep.mubr.bf16.mxu0 %v9152_v3  ;;  %4794 = vmatpush1.bf16.msra.mxu0 %v7070_v47 }
 0x48c   : > { %4795 = vmatprep.subr.bf16.mxu0 %v9152_v3  ;;  %4951 = vmatpush1.bf16.msra.mxu1 %v7083_v27 }
 0x48d   : > { %4952 = vmatprep.subr.bf16.mxu1 %v9152_v3 }
 0x48f   : > { %4796 = vmatpush1.bf16.msra.mxu0 %v7072_v48 }
 0x490   : > { %4797 = vmatprep.subr.bf16.mxu0 %v9152_v3  ;;  %4953 = vmatpush1.bf16.msra.mxu1 %v7085_v4 }
 0x491   : > { %4954 = vmatprep.subr.bf16.mxu1 %v9152_v3 }
 0x492   : > { %6169 = vmatmul.mubr.msk.bf16.gmra.mrb[68].mxu0 %vm3315_vm5, %v8710_v13 }
 0x493   : > { %4185 = vmatprep.mubr.bf16.mxu0 %v9152_v3  ;;  %4798 = vmatpush1.bf16.msra.mxu0 %v7074_v62 }
 0x494   : > { %4799 = vmatprep.subr.bf16.mxu0 %v9152_v3  ;;  %4955 = vmatpush1.bf16.msra.mxu1 %v7087_v63 }
 0x495   : > { %4956 = vmatprep.subr.bf16.mxu1 %v9152_v3 }
 0x497   : > { %4800 = vmatpush1.bf16.msra.mxu0 %v7076_v18 }
 0x498   : > { %4801 = vmatprep.subr.bf16.mxu0 %v9152_v3  ;;  %4957 = vmatpush1.bf16.msra.mxu1 %v7089_v22 }
 0x49a   : > { %6170 = vmatmul.mubr.msk.bf16.gmra.mrb[72].mxu0 %vm3315_vm5, %v8740_v8 }
 0x49b   : > { %4195 = vmatprep.mubr.bf16.mxu0 %v9152_v3  ;;  %4802 = vmatpush1.bf16.msra.mxu0 %v7078_v35 }
 0x49c   : > { %4803 = vmatprep.subr.bf16.mxu0 %v9152_v3 }
 0x49f   : > { %4804 = vmatpush1.bf16.msra.mxu0 %v7080_v38 }
 0x4a0   : > { %4805 = vmatprep.subr.bf16.mxu0 %v9152_v3 }
 0x4a2   : > { %6171 = vmatmul.mubr.msk.bf16.gmra.mrb[76].mxu0 %vm3315_vm5, %v8728_v21 }
 0x4a3   : > { %4806 = vmatpush1.bf16.msra.mxu0 %v7082_v42 }
 0x4a4   : > { %4807 = vmatprep.subr.bf16.mxu0 %v9152_v3 }
 0x4a7   : > { %4808 = vmatpush1.bf16.msra.mxu0 %v7084_v46 }
 0x4a8   : > { %4809 = vmatprep.subr.bf16.mxu0 %v9152_v3 }
 0x4ab   : > { %4810 = vmatpush1.bf16.msra.mxu0 %v7086_v50 }
 0x4ac   : > { %4811 = vmatprep.subr.bf16.mxu0 %v9152_v3 }
 0x4af   : > { %4812 = vmatpush1.bf16.msra.mxu0 %v7088_v30 }
 0x4b0   : > { %6368 = vmatprep.subr.bf16.mxu0 %v7090_v41 }
 0x53d   : > { %v4587_v45 = vpop.f32.mrb[80].mxu1 }
 0x53e   : > { %v4589_v58 = vpop.f32.mrb[81].mxu1 }
 0x53f   : > { %v4591_v60 = vpop.f32.mrb[82].mxu1 }
 0x540   : > { %v4593_v7 = vpop.f32.mrb[83].mxu1 }
 0x545   : > { %v4597_v3 = vpop.f32.mrb[84].mxu1 }
 0x546   : > { %v4599_v23 = vpop.f32.mrb[85].mxu1 }
 0x547   : > { %v4601_v55 = vpop.f32.mrb[86].mxu1 }
 0x548   : > { %v4603_v1 = vpop.f32.mrb[87].mxu1 }
 0x54d   : > { %v4607_v14 = vpop.f32.mrb[88].mxu1 }
 0x54e   : > { %v4609_v25 = vpop.f32.mrb[89].mxu1 }
 0x54f   : > { %v8901_v33 = vpop.f32.mrb[90].mxu1 }
 0x550   : > { %v8903_v16 = vpop.f32.mrb[91].mxu1 }
 0x555   : > { %v8905_v53 = vpop.f32.mrb[92].mxu1 }
 0x556   : > { %v8907_v51 = vpop.f32.mrb[93].mxu1 }
 0x557   : > { %v4621_v49 = vpop.f32.mrb[94].mxu1 }
 0x558   : > { %v4622_v40 = vpop.f32.mrb[95].mxu1 }
 0x55d   : > { %v4167_v43 = vpop.f32.mrb[64].mxu0 }
 0x55e   : > { %v4638_v15 = vmax.f32 %v4167_v43, %v4587_v45  ;;  %v4169_v5 = vpop.f32.mrb[65].mxu0 }
 0x55f   : > { %v4639_v29 = vmax.f32 %v4169_v5, %v4589_v58  ;;  %v4171_v11 = vpop.f32.mrb[66].mxu0 }
 0x560   : > { %v4664_v17 = vadd.f32 %v8914_v32, %v4638_v15  ;;  %v4640_v44 = vmax.f32 %v4171_v11, %v4591_v60  ;;  %v4173_v13 = vpop.f32.mrb[67].mxu0  ;;  %v7093_v11 = vld [vmem:[%s9102_s7 + $0x40] sm:$0xff]  }
 0x561   : > { %v4665_v34 = vadd.f32 %v8918_v12, %v4639_v29  ;;  %v4641_v24 = vmax.f32 %v4173_v13, %v4593_v7 }
 0x562   : > { %v4666_v21 = vadd.f32 %v8914_v32, %v4640_v44  ;;  %v4678_v28 = vmax.f32 %v4664_v17, 0.0  ;;  %v7094_v17 = vld [vmem:[%s9102_s7 + $0x48] sm:$0xff]   ;;  %v8961_v44 = vld [vmem:[%s9102_s7] sm:$0xff]  }
 0x563   : > { %v4667_v2 = vadd.f32 %v8918_v12, %v4641_v24  ;;  %v4679_v36 = vmax.f32 %v4665_v34, 0.0 }
 0x564   : > { %v4680_v8 = vmax.f32 %v4666_v21, 0.0 }
 0x565   : > { %v4681_v6 = vmax.f32 %v4667_v2, 0.0  ;;  %v4177_v9 = vpop.f32.mrb[68].mxu0 }
 0x566   : > { %v4692_v52 = vpack.c.bf16 %v4680_v8, %v4678_v28  ;;  %v4642_v54 = vmax.f32 %v4177_v9, %v4597_v3  ;;  %v4179_v19 = vpop.f32.mrb[69].mxu0 }
 0x567   : > { %v4693_v61 = vpack.c.bf16 %v4681_v6, %v4679_v36  ;;  %v4643_v47 = vmax.f32 %v4179_v19, %v4599_v23  ;;  %v4181_v20 = vpop.f32.mrb[70].mxu0 }
 0x568   : > { %v4668_v48 = vadd.f32 %v8914_v32, %v4642_v54  ;;  %v4644_v57 = vmax.f32 %v4181_v20, %v4601_v55  ;;  %v4183_v62 = vpop.f32.mrb[71].mxu0 }
 0x569   : > { %v4669_v31 = vadd.f32 %v8918_v12, %v4643_v47  ;;  %v4645_v18 = vmax.f32 %v4183_v62, %v4603_v1  ;;  %6207 = vmatprep.mubr.msk.bf16.mxu0 %vm4780_vm7, %v4693_v61  ;;  %6241 = vmatprep.mubr.msk.bf16.mxu1 %vm4780_vm7, %v4693_v61 }
 0x56a   : > { %v4670_v0 = vadd.f32 %v8914_v32, %v4644_v57  ;;  %4826 = vmatmul.mubr.bf16.vlgmr.msra.gmra.mrb[80].mxu0 %v4692_v52  ;;  %4971 = vmatmul.mubr.bf16.vlgmr.msra.gmra.mrb[96].mxu1 %v4692_v52  ;;  %v4682_v37 = vmax.f32 %v4668_v48, 0.0 }
 0x56b   : > { %v4671_v35 = vadd.f32 %v8918_v12, %v4645_v18  ;;  %6369 = vmatpush3.bf16.msra.mxu0 %v7090_v41  ;;  %v4683_v39 = vmax.f32 %v4669_v31, 0.0 }
 0x56c   : > { %v4684_v38 = vmax.f32 %v4670_v0, 0.0 }
 0x56d   : > { %v4685_v42 = vmax.f32 %v4671_v35, 0.0  ;;  %v4187_v27 = vpop.f32.mrb[72].mxu0 }
 0x56e   : > { %v4646_v46 = vmax.f32 %v4187_v27, %v4607_v14  ;;  %v4189_v4 = vpop.f32.mrb[73].mxu0  ;;  %v4694_v50 = vpack.c.bf16 %v4684_v38, %v4682_v37 }
 0x56f   : > { %v4695_v63 = vpack.c.bf16 %v4685_v42, %v4683_v39  ;;  %v4647_v30 = vmax.f32 %v4189_v4, %v4609_v25  ;;  %v4191_v22 = vpop.f32.mrb[74].mxu0 }
 0x570   : > { %v4672_v45 = vadd.f32 %v8914_v32, %v4646_v46  ;;  %v4648_v58 = vmax.f32 %v4191_v22, %v8901_v33  ;;  %v4193_v60 = vpop.f32.mrb[75].mxu0 }
 0x571   : > { %v4673_v7 = vadd.f32 %v8918_v12, %v4647_v30  ;;  %v4649_v41 = vmax.f32 %v4193_v60, %v8903_v16  ;;  %6208 = vmatprep.mubr.msk.bf16.mxu0 %vm4780_vm7, %v4695_v63  ;;  %6242 = vmatprep.mubr.msk.bf16.mxu1 %vm4780_vm7, %v4695_v63 }
 0x572   : > { %v4674_v3 = vadd.f32 %v8914_v32, %v4648_v58  ;;  %4834 = vmatmul.mubr.bf16.gmra.mrb[84].mxu0 %v4694_v50  ;;  %4979 = vmatmul.mubr.bf16.gmra.mrb[100].mxu1 %v4694_v50  ;;  %v4686_v55 = vmax.f32 %v4672_v45, 0.0 }
 0x573   : > { %v4675_v23 = vadd.f32 %v8918_v12, %v4649_v41  ;;  %v4687_v14 = vmax.f32 %v4673_v7, 0.0 }
 0x574   : > { %v4688_v1 = vmax.f32 %v4674_v3, 0.0 }
 0x575   : > { %v4689_v25 = vmax.f32 %v4675_v23, 0.0  ;;  %v4197_v33 = vpop.f32.mrb[76].mxu0 }
 0x576   : > { %v4650_v49 = vmax.f32 %v4197_v33, %v8905_v53  ;;  %v4199_v40 = vpop.f32.mrb[77].mxu0  ;;  %v4696_v59 = vpack.c.bf16 %v4688_v1, %v4686_v55 }
 0x577   : > { %v4697_v16 = vpack.c.bf16 %v4689_v25, %v4687_v14  ;;  %v4651_v26 = vmax.f32 %v4199_v40, %v8907_v51  ;;  %v4201_v56 = vpop.f32.mrb[78].mxu0 }
 0x578   : > { %v4676_v43 = vadd.f32 %v8914_v32, %v4650_v49  ;;  %v4202_v10 = vpop.f32.mrb[79].mxu0  ;;  %v7091_v32 = vld [vmem:[%s9102_s7 + $0x30] sm:$0xff]  }
 0x579   : > { %v4677_v15 = vadd.f32 %v8918_v12, %v4651_v26  ;;  %6209 = vmatprep.mubr.msk.bf16.mxu0 %vm4780_vm7, %v4697_v16  ;;  %6243 = vmatprep.mubr.msk.bf16.mxu1 %vm4780_vm7, %v4697_v16  ;;  %v7092_v12 = vld [vmem:[%s9102_s7 + $0x38] sm:$0xff]  }
 0x57a   : > { %4842 = vmatmul.mubr.bf16.gmra.mrb[88].mxu0 %v4696_v59  ;;  %4987 = vmatmul.mubr.bf16.gmra.mrb[104].mxu1 %v4696_v59  ;;  %v4690_v29 = vmax.f32 %v4676_v43, 0.0 }
 0x57b   : > { %v4691_v5 = vmax.f32 %v4677_v15, 0.0  ;;  %6370 = vmatprep.subr.bf16.mxu0 %v7091_v32 }
 0x57c   : > { %v4698_v51 = vpack.c.bf16 %v4690_v29, %v4690_v29  ;;  %6371 = vmatpush3.bf16.msra.mxu0 %v7091_v32 }
 0x57d   : > { %v4699_v53 = vpack.c.bf16 %v4691_v5, %v4691_v5  ;;  %6372 = vmatprep.subr.bf16.mxu0 %v7092_v12 }
 0x57f   : > { %6210 = vmatprep.mubr.msk.bf16.mxu0 %vm4780_vm7, %v4699_v53  ;;  %6244 = vmatprep.mubr.msk.bf16.mxu1 %vm4780_vm7, %v4699_v53 }
 0x580   : > { %6373 = vmatpush3.bf16.msra.mxu0 %v7092_v12 }
 0x581   : > { %6374 = vmatprep.subr.bf16.mxu0 %v7093_v11 }
 0x582   : > { %4850 = vmatmul.mubr.bf16.gmra.mrb[92].mxu0 %v4698_v51  ;;  %4995 = vmatmul.mubr.bf16.gmra.mrb[108].mxu1 %v4698_v51 }
 0x584   : > { %6375 = vmatpush3.bf16.msra.mxu0 %v7093_v11 }
 0x585   : > { %6376 = vmatprep.subr.bf16.mxu0 %v7094_v17 }
 0x588   : > { %6377 = vmatpush3.bf16.msra.mxu0 %v7094_v17 }
 0x589   : > { %6386 = vmatprep.subr.bf16.mxu0 %v8961_v44 }
 0x63d   : > { %v4827_v13 = vpop.f32.mrb[80].mxu0  ;;  %v4972_v34 = vpop.f32.mrb[96].mxu1 }
 0x63e   : > { %v5002_v24 = vmax.f32 %v4827_v13, %v4972_v34  ;;  %v4829_v21 = vpop.f32.mrb[81].mxu0  ;;  %v4974_v2 = vpop.f32.mrb[97].mxu1 }
 0x63f   : > { %v4830_v28 = vpop.f32.mrb[82].mxu0  ;;  %v4975_v8 = vpop.f32.mrb[98].mxu1 }
 0x640   : > { %v5003_v36 = vmax.f32 %v4830_v28, %v4975_v8  ;;  %v4832_v6 = vpop.f32.mrb[83].mxu0  ;;  %v4977_v9 = vpop.f32.mrb[99].mxu1 }
 0x642   : > { %v8964_v52 = vpack.c.bf16 %v5003_v36, %v5002_v24  ;;  %v7096_v24 = vld [vmem:[%s9102_s7 + $0x8] sm:$0xff]  }
 0x644   : > { %v5037_v54 = vshll.u32 %v8964_v52, 16  ;;  %v5035_v35 = vshrl.u32 %v8964_v52, 16  ;;  %v5289_v27 = vrot.slane %v8964_v52, 1 }
 0x645   : > { %v4835_v19 = vpop.f32.mrb[84].mxu0  ;;  %v4980_v61 = vpop.f32.mrb[100].mxu1 }
 0x646   : > { %v5004_v47 = vmax.f32 %v4835_v19, %v4980_v61  ;;  %v4837_v20 = vpop.f32.mrb[85].mxu0  ;;  %v4982_v48 = vpop.f32.mrb[101].mxu1  ;;  %v5039_v37 = vrot.slane %v5037_v54, 1  ;;  %v5421_v30 = vrot.slane %v5035_v35, 1  ;;  %v5422_v22 = vrot.slane %v5037_v54, 2 }
 0x647   : > { %v4838_v57 = vpop.f32.mrb[86].mxu0  ;;  %v4983_v62 = vpop.f32.mrb[102].mxu1  ;;  %v7097_v20 = vld [vmem:[%s9102_s7 + $0x10] sm:$0xff]  }
 0x648   : > { %v5005_v31 = vmax.f32 %v4838_v57, %v4983_v62  ;;  %v4840_v18 = vpop.f32.mrb[87].mxu0  ;;  %v4985_v0 = vpop.f32.mrb[103].mxu1  ;;  %v5040_v63 = vor.u32 %v5039_v37, %v5035_v35  ;;  %v5423_v40 = vor.u32 %v5422_v22, %v5421_v30  ;;  %v7098_v35 = vld [vmem:[%s9102_s7 + $0x18] sm:$0xff]   ;;  %v7108_v30 = vld [vmem:[%s9102_s7 + $0x90] sm:$0xff]  }
 0x649   : > { %v7109_v22 = vld [vmem:[%s9102_s7 + $0x98] sm:$0xff]  }
 0x64a   : > { %v8968_v38 = vpack.c.bf16 %v5005_v31, %v5004_v47 }
 0x64c   : > { %v5046_v39 = vshrl.u32 %v8968_v38, 16  ;;  %v5042_v42 = vshll.u32 %v8968_v38, 16  ;;  %v5290_v46 = vrot.slane %v8968_v38, 1 }
 0x64d   : > { %v4843_v4 = vpop.f32.mrb[88].mxu0  ;;  %v4988_v50 = vpop.f32.mrb[104].mxu1 }
 0x64e   : > { %v5006_v45 = vmax.f32 %v4843_v4, %v4988_v50  ;;  %v4845_v58 = vpop.f32.mrb[89].mxu0  ;;  %v4990_v60 = vpop.f32.mrb[105].mxu1  ;;  %v5044_v7 = vrot.slane %v5042_v42, 1  ;;  %v8975_v41 = vsel %vm4032_vm6, %v5289_v27, %v5290_v46  ;;  %v5424_v3 = vrot.slane %v5046_v39, 1  ;;  %v7101_v27 = vld [vmem:[%s9102_s7 + $0x58] sm:$0xff]   ;;  %v7106_v50 = vld [vmem:[%s9102_s7 + $0x80] sm:$0xff]  }
 0x64f   : > { %v4846_v23 = vpop.f32.mrb[90].mxu0  ;;  %v4991_v55 = vpop.f32.mrb[106].mxu1  ;;  %v5425_v1 = vrot.slane %v5042_v42, 2  ;;  %v7100_v42 = vld [vmem:[%s9102_s7 + $0x50] sm:$0xff]   ;;  %v7105_v4 = vld [vmem:[%s9102_s7 + $0x78] sm:$0xff]   ;;  %v7111_v58 = vld [vmem:[%s9104_s9 + $0x8] sm:$0xff]  }
 0x650   : > { %v5007_v14 = vmax.f32 %v4846_v23, %v4991_v55  ;;  %v4848_v25 = vpop.f32.mrb[91].mxu0  ;;  %v4993_v33 = vpop.f32.mrb[107].mxu1  ;;  %v5045_v49 = vsel %vm1096_vm2, %v5040_v63, %v5044_v7  ;;  %v5048_v15 = vor.u32 %v5046_v39, %v5044_v7  ;;  %v7099_v39 = vld [vmem:[%s9102_s7 + $0x20] sm:$0xff]   ;;  %v7107_v63 = vld [vmem:[%s9102_s7 + $0x88] sm:$0xff]   ;;  %v7112_v60 = vld [vmem:[%s9104_s9 + $0x10] sm:$0xff]  }
 0x651   : > { %6378 = vmatprep.mubr.msk.bf16.mxu0 %vm5095_vm8, %v5045_v49  ;;  %v5426_v59 = vor.u32 %v5425_v1, %v5424_v3  ;;  %v7113_v7 = vld [vmem:[%s9104_s9 + $0x18] ss:$0 sps:$4 sm:$0x11]  }
 0x652   : > { %v5011_v16 = vpack.c.bf16 %v5007_v14, %v5006_v45  ;;  %v7110_v45 = vld [vmem:[%s9104_s9] sm:$0xff]  }
 0x653   : > { %v8980_v26 = vsel %vm5420_vm9, %v5423_v40, %v5426_v59  ;;  %6440 = vmatprep.subr.bf16.mxu1 %v7110_v45 }
 0x654   : > { %v5050_v56 = vshll.u32 %v5011_v16, 16  ;;  %v5292_v43 = vrot.slane %v5011_v16, 1  ;;  %v5054_v10 = vshrl.u32 %v5011_v16, 16  ;;  %6441 = vmatpush3.bf16.msra.mxu1 %v7110_v45 }
 0x655   : > { %v4851_v5 = vpop.f32.mrb[92].mxu0  ;;  %v4996_v29 = vpop.f32.mrb[108].mxu1  ;;  %6442 = vmatprep.subr.bf16.mxu1 %v7111_v58 }
 0x656   : > { %v5052_v53 = vrot.slane %v5050_v56, 1  ;;  %v5429_v51 = vrot.slane %v5050_v56, 2  ;;  %v5008_v32 = vmax.f32 %v4851_v5, %v4996_v29  ;;  %v4853_v12 = vpop.f32.mrb[93].mxu0  ;;  %v4998_v11 = vpop.f32.mrb[109].mxu1  ;;  %v5428_v17 = vrot.slane %v5054_v10, 1 }
 0x657   : > { %v4854_v13 = vpop.f32.mrb[94].mxu0  ;;  %v4999_v34 = vpop.f32.mrb[110].mxu1  ;;  %v5293_v21 = vsel %vm4032_vm6, %v5290_v46, %v5292_v43  ;;  %v7103_v46 = vld [vmem:[%s9102_s7 + $0x68] sm:$0xff]  }
 0x658   : > { %v8986_v2 = vpack.c.bf16 %v5008_v32, %v5008_v32  ;;  %v4855_v28 = vpop.f32.mrb[95].mxu0  ;;  %v5000_v8 = vpop.f32.mrb[111].mxu1  ;;  %v5053_v36 = vsel %vm1096_vm2, %v5048_v15, %v5052_v53  ;;  %v5430_v6 = vor.u32 %v5429_v51, %v5428_v17  ;;  %v5056_v47 = vor.u32 %v5054_v10, %v5052_v53  ;;  %6443 = vmatpush3.bf16.msra.mxu1 %v7111_v58  ;;  %v6311_v51 = vld [vmem:[%s9103_s8] ss:$0 sm:$0xff] }
 0x659   : > { %6379 = vmatmul.mubr.msk.bf16.vlgmr.msra.gmra.mrb[96].mxu0 %vm5095_vm8, %v5053_v36  ;;  %6444 = vmatprep.subr.bf16.mxu1 %v7112_v60 }
 0x65a   : > { %v5058_v9 = vshll.u32 %v8986_v2, 16  ;;  %v5062_v54 = vshrl.u32 %v8986_v2, 16  ;;  %6387 = vmatpush3.bf16.msra.mxu0 %v8961_v44  ;;  %v5294_v19 = vrot.slane %v8986_v2, 1  ;;  %v5431_v61 = vsel %vm5420_vm9, %v5426_v59, %v5430_v6 }
 0x65b   : > { %6388 = vmatprep.subr.bf16.mxu0 %v7096_v24 }
 0x65c   : > { %v5060_v48 = vrot.slane %v5058_v9, 1  ;;  %v5295_v57 = vsel %vm4032_vm6, %v5292_v43, %v5294_v19  ;;  %v5432_v62 = vrot.slane %v5062_v54, 1  ;;  %v5433_v31 = vrot.slane %v5058_v9, 2  ;;  %6445 = vmatpush3.bf16.msra.mxu1 %v7112_v60 }
 0x65d   : > { %6850 = vmatprep.subr.msk.bf16.mxu1 %vm5615_vm10, %v7113_v7 }
 0x65e   : > { %6389 = vmatpush3.bf16.msra.mxu0 %v7096_v24  ;;  %v5061_v18 = vsel %vm1096_vm2, %v5056_v47, %v5060_v48  ;;  %v5064_v0 = vor.u32 %v5062_v54, %v5060_v48  ;;  %v5434_v44 = vor.u32 %v5433_v31, %v5432_v62  ;;  %v6312_v62 = vld [vmem:[%s9105_s10] ss:$0 sm:$0xff] }
 0x65f   : > { %6382 = vmatprep.mubr.msk.bf16.mxu0 %vm5095_vm8, %v5061_v18  ;;  %6390 = vmatprep.subr.bf16.mxu0 %v7097_v20 }
 0x660   : > { %v5435_v37 = vsel %vm5420_vm9, %v5430_v6, %v5434_v44 }
 0x661   : > { %6383 = vmatmul.mubr.msk.bf16.gmra.mrb[100].mxu0 %vm5095_vm8, %v5064_v0 }
 0x662   : > { %6391 = vmatpush3.bf16.msra.mxu0 %v7097_v20  ;;  %6396 = vmatprep.mubr.msk.bf16.mxu0 %vm5095_vm8, %v8964_v52  ;;  %v7102_v52 = vld [vmem:[%s9102_s7 + $0x60] sm:$0xff]  }
 0x663   : > { %6392 = vmatprep.subr.bf16.mxu0 %v7098_v35 }
 0x666   : > { %6393 = vmatpush3.bf16.msra.mxu0 %v7098_v35 }
 0x667   : > { %6394 = vmatprep.subr.bf16.mxu0 %v7099_v39 }
 0x66a   : > { %6395 = vmatpush3.bf16.msra.mxu0 %v7099_v39 }
 0x66b   : > { %6404 = vmatprep.subr.bf16.mxu0 %v7100_v42 }
 0x66d   : > { %6397 = vmatmul.mubr.msk.bf16.vlgmr.msra.gmra.mrb[96].mxu0 %vm5095_vm8, %v8968_v38  ;;  %v7104_v38 = vld [vmem:[%s9102_s7 + $0x70] sm:$0xff]  }
 0x66e   : > { %6400 = vmatprep.mubr.msk.bf16.mxu0 %vm5095_vm8, %v5011_v16  ;;  %6405 = vmatpush3.bf16.msra.mxu0 %v7100_v42 }
 0x66f   : > { %6406 = vmatprep.subr.bf16.mxu0 %v7101_v27 }
 0x672   : > { %6407 = vmatpush3.bf16.msra.mxu0 %v7101_v27 }
 0x673   : > { %6408 = vmatprep.subr.bf16.mxu0 %v7102_v52 }
 0x675   : > { %6401 = vmatmul.mubr.msk.bf16.gmra.mrb[104].mxu0 %vm5095_vm8, %v8986_v2 }
 0x676   : > { %6409 = vmatpush3.bf16.msra.mxu0 %v7102_v52  ;;  %6414 = vmatprep.mubr.msk.bf16.mxu0 %vm5095_vm8, %v8975_v41  ;;  %v5617_v41 = vsel %vm5615_vm10, %v7113_v7, 0 }
 0x677   : > { %6410 = vmatprep.subr.bf16.mxu0 %v7103_v46  ;;  %6447 = vmatpush3.bf16.msra.mxu1 %v5617_v41 }
 0x67a   : > { %6411 = vmatpush3.bf16.msra.mxu0 %v7103_v46 }
 0x67b   : > { %6412 = vmatprep.subr.bf16.mxu0 %v7104_v38 }
 0x67e   : > { %6413 = vmatpush3.bf16.msra.mxu0 %v7104_v38 }
 0x67f   : > { %6422 = vmatprep.subr.bf16.mxu0 %v7105_v4 }
 0x681   : > { %6415 = vmatmul.mubr.msk.bf16.vlgmr.msra.gmra.mrb[96].mxu0 %vm5095_vm8, %v5293_v21 }
 0x682   : > { %6418 = vmatprep.mubr.msk.bf16.mxu0 %vm5095_vm8, %v5295_v57  ;;  %6423 = vmatpush3.bf16.msra.mxu0 %v7105_v4 }
 0x683   : > { %6424 = vmatprep.subr.bf16.mxu0 %v7106_v50 }
 0x686   : > { %6425 = vmatpush3.bf16.msra.mxu0 %v7106_v50 }
 0x687   : > { %6426 = vmatprep.subr.bf16.mxu0 %v7107_v63 }
 0x689   : > { %6419 = vmatmul.mubr.msk.bf16.gmra.mrb[108].mxu0 %vm5095_vm8, %v5294_v19 }
 0x68a   : > { %6427 = vmatpush3.bf16.msra.mxu0 %v7107_v63  ;;  %6432 = vmatprep.mubr.msk.bf16.mxu0 %vm5095_vm8, %v8980_v26 }
 0x68b   : > { %6428 = vmatprep.subr.bf16.mxu0 %v7108_v30 }
 0x68e   : > { %6429 = vmatpush3.bf16.msra.mxu0 %v7108_v30 }
 0x68f   : > { %6430 = vmatprep.subr.bf16.mxu0 %v7109_v22 }
 0x692   : > { %6431 = vmatpush3.bf16.msra.mxu0 %v7109_v22 }
 0x695   : > { %6433 = vmatmul.mubr.msk.bf16.vlgmr.msra.gmra.mrb[96].mxu0 %vm5095_vm8, %v5431_v61 }
 0x696   : > { %6436 = vmatprep.mubr.msk.bf16.mxu0 %vm5095_vm8, %v5435_v37 }
 0x69d   : > { %6437 = vmatmul.mubr.msk.bf16.gmra.mrb[112].mxu0 %vm5095_vm8, %v5434_v44 }
 0x734   : > { %v6384_v3 = vpop.f32.mrb[100].mxu0 }
 0x735   : > { %v5158_v23 = vpop.f32.mrb[101].mxu0 }
 0x736   : > { %v6385_v55 = vpop.f32.mrb[102].mxu0 }
 0x737   : > { %v5161_v1 = vpop.f32.mrb[103].mxu0 }
 0x748   : > { %v6402_v14 = vpop.f32.mrb[104].mxu0 }
 0x749   : > { %v5269_v25 = vadd.f32 %v6402_v14, %v6384_v3  ;;  %v5260_v33 = vpop.f32.mrb[105].mxu0 }
 0x74a   : > { %v5261_v49 = vadd.f32 %v5260_v33, %v5158_v23  ;;  %v6403_v40 = vpop.f32.mrb[106].mxu0 }
 0x74b   : > { %v5263_v59 = vpop.f32.mrb[107].mxu0 }
 0x74c   : > { %v5264_v16 = vadd.f32 %v5263_v59, %v5161_v1 }
 0x75c   : > { %v6420_v26 = vpop.f32.mrb[108].mxu0 }
 0x75d   : > { %v5408_v56 = vadd.f32 %v6420_v26, %v5269_v25  ;;  %v5388_v43 = vpop.f32.mrb[109].mxu0 }
 0x75e   : > { %v5406_v10 = vadd.f32 %v5388_v43, %v5261_v49  ;;  %v6421_v15 = vpop.f32.mrb[110].mxu0 }
 0x75f   : > { %v5391_v5 = vpop.f32.mrb[111].mxu0 }
 0x760   : > { %v5407_v29 = vadd.f32 %v5391_v5, %v5264_v16 }
 0x768   : > { %v6434_v53 = vpop.f32.mrb[96].mxu0 }
 0x769   : > { %v5512_v32 = vpop.f32.mrb[97].mxu0  ;;  %v5558_v11 = vadd.f32 %v6434_v53, %v6311_v51 }
 0x76a   : > { %v6435_v12 = vpop.f32.mrb[98].mxu0  ;;  %v5556_v34 = vadd.f32 %v6311_v51, %v5512_v32 }
 0x76b   : > { %v5559_v17 = vadd.f32 %v6435_v12, %v6311_v51  ;;  %v5515_v13 = vpop.f32.mrb[99].mxu0 }
 0x76c   : > { %v5557_v24 = vadd.f32 %v6311_v51, %v5515_v13 }
 0x76d   : > { %v5564_v21 = vpack.c.bf16 %v5559_v17, %v5558_v11 }
 0x76e   : > { %v5563_v2 = vpack.c.bf16 %v5557_v24, %v5556_v34 }
 0x770   : > { %v6438_v28 = vpop.f32.mrb[112].mxu0  ;;  %6448 = vmatprep.mubr.msk.bf16.mxu1 %vm5602_vm11, %v5563_v2 }
 0x771   : > { %v5548_v8 = vadd.f32 %v6438_v28, %v5408_v56  ;;  %v5528_v36 = vpop.f32.mrb[113].mxu0  ;;  %6449 = vmatmul.mubr.msk.bf16.vlgmr.msra.gmra.mrb[112].mxu1 %vm5602_vm11, %v5564_v21 }
 0x772   : > { %v5546_v6 = vadd.f32 %v5528_v36, %v5406_v10  ;;  %v6439_v9 = vpop.f32.mrb[114].mxu0 }
 0x773   : > { %v5531_v54 = vpop.f32.mrb[115].mxu0  ;;  %v5562_v61 = vadd.f32 %v6311_v51, %v5548_v8 }
 0x774   : > { %v5547_v19 = vadd.f32 %v5531_v54, %v5407_v29  ;;  %v5560_v47 = vadd.f32 %v6311_v51, %v5546_v6 }
 0x775   : > { %v5566_v57 = vpack.c.bf16 %v5562_v61, %v5562_v61 }
 0x776   : > { %v5561_v20 = vadd.f32 %v6311_v51, %v5547_v19 }
 0x778   : > { %v5565_v48 = vpack.c.bf16 %v5561_v20, %v5560_v47 }
 0x77a   : > { %6452 = vmatprep.mubr.msk.bf16.mxu1 %vm5602_vm11, %v5565_v48 }
 0x77b   : > { %6453 = vmatmul.mubr.msk.bf16.gmra.mrb[116].mxu1 %vm5602_vm11, %v5566_v57 }
 0x844   : > { %v6450_v31 = vpop.f32.mrb[112].mxu1 }
 0x845   : > { %v5662_v18 = vadd.f32 %v6450_v31, %v6312_v62  ;;  %v5653_v0 = vpop.f32.mrb[113].mxu1 }
 0x846   : > { %v5654_v44 = vadd.f32 %v6312_v62, %v5653_v0  ;;  %v6451_v35 = vpop.f32.mrb[114].mxu1 }
 0x847   : > { %5685 = vst [vmem:[%s537_s27 + $0x10] sm:$0xff] %v5662_v18  ;;  %v5665_v37 = vadd.f32 %v6451_v35, %v6312_v62  ;;  %v5656_v39 = vpop.f32.mrb[115].mxu1 }
 0x848   : > { %5683 = vst [vmem:[%s537_s27] sm:$0xff] %v5654_v44  ;;  %v5657_v42 = vadd.f32 %v6312_v62, %v5656_v39 }
 0x849   : > { %5686 = vst [vmem:[%s537_s27 + $0x18] sm:$0xff] %v5665_v37 }
 0x84a   : > { %5684 = vst [vmem:[%s537_s27 + $0x8] sm:$0xff] %v5657_v42 }
 0x84e   : > { %v6454_v27 = vpop.f32.mrb[116].mxu1 }
 0x84f   : > { %v5678_v52 = vadd.f32 %v6454_v27, %v6312_v62  ;;  %v5669_v46 = vpop.f32.mrb[117].mxu1 }
 0x850   : > { %v5670_v38 = vadd.f32 %v6312_v62, %v5669_v46  ;;  %v6455_v4 = vpop.f32.mrb[118].mxu1 }
 0x851   : > { %5689 = vst [vmem:[%s537_s27 + $0x30] sm:$0x3] %v5678_v52  ;;  %v5672_v50 = vpop.f32.mrb[119].mxu1 }
 0x852   : > { %5687 = vst [vmem:[%s537_s27 + $0x20] sm:$0xff] %v5670_v38  ;;  %v5673_v63 = vadd.f32 %v6312_v62, %v5672_v50 }
 0x854   : > { %5688 = vst [vmem:[%s537_s27 + $0x28] sm:$0xff] %v5673_v63 }
 0x855 PF: > { %p18_p9 = scmp.ge.s32.totalorder %s7234_s21, 5   ;;  %s9175_s17 = smov %s7150_s18 }
 0x856   : > { %s9176_s18 = smov %s7243_s24  ;;  %s9177_s19 = smov %s7234_s21 }
 0x857   :  { %20 = sbr.rel (!%p18_p9) target bundleno = 2 (0x2), region = 156 }

</bundles_post_ra>
